<compile_context>
chip_gen: v5e
topology: v5e:2x2
jax: 0.10.0
libtpu: 0.0.40
codegen_flags: <defaults>
</compile_context>

<pallas_src>
import math

import jax
import jax.numpy as jnp
from jax.experimental import pallas as pl
from jax.experimental.pallas import tpu as pltpu

NUM_HEADS = 2
LRELU_SLOPE = 0.2
BN_EPS = 1e-5
NEG_INF = -1e30
TB_TARGET = 16          # batch elements per grid step (16 * L=16 -> 256 MXU rows)
MXU_ROWS = 256          # target stacked-slab height


def _leaky_relu(y):
    return jnp.where(y > 0, y, LRELU_SLOPE * y)


def _round_up(x, m):
    return -(-x // m) * m


# ----------------------------------------------------------------------------
# Pallas kernel: one grid step processes TB batch elements as a (TB*L, .) slab
# ----------------------------------------------------------------------------
def _fd_kernel(x_ref, cos_ref, wqkv_ref, bqkv_ref, wout_ref,
               convw_ref, bias_ref, fusw_ref, fusb_ref, out_ref):
    TB, L, F = x_ref.shape
    H = wout_ref.shape[0]
    dh = H // NUM_HEADS
    TBL = TB * L
    f32, bf16 = jnp.float32, jnp.bfloat16

    # ---- structural masks generated in-kernel (no DMA, works for any L) ----
    # P[t, j]  = 1  iff column j belongs to sample t   (pooling indicator)
    r_tb = jax.lax.broadcasted_iota(jnp.int32, (TB, TBL), 0)
    c_tbl = jax.lax.broadcasted_iota(jnp.int32, (TB, TBL), 1)
    p_ind = jnp.where(jnp.logical_and(c_tbl >= r_tb * L, c_tbl < r_tb * L + L),
                      1.0, 0.0)                                          # (TB, TBL)

    # PT[i, t] = 1  iff row i belongs to sample t
    r_i = jax.lax.broadcasted_iota(jnp.int32, (TBL, TB), 0)
    c_t = jax.lax.broadcasted_iota(jnp.int32, (TBL, TB), 1)
    pt_ind = jnp.where(jnp.logical_and(r_i >= c_t * L, r_i < c_t * L + L),
                       1.0, 0.0)                                         # (TBL, TB)

    # block-diagonal "same sample" indicator (exact 0/1 even with bf16 operands)
    same = jnp.dot(pt_ind.astype(bf16), p_ind.astype(bf16),
                   preferred_element_type=f32)                           # (TBL, TBL)
    amask = jnp.where(same > 0.5, 0.0, NEG_INF)                          # f32

    # conv boundary masks: zero the rolled-in row at sample starts / ends
    start_row = jnp.sum(jnp.where(r_i == c_t * L, 1.0, 0.0),
                        axis=1, keepdims=True)                           # (TBL, 1)
    end_row = jnp.sum(jnp.where(r_i == c_t * L + (L - 1), 1.0, 0.0),
                      axis=1, keepdims=True)
    mprev = 1.0 - start_row
    mnext = 1.0 - end_row

    pool = (p_ind * (1.0 / L)).astype(bf16)                              # (TB, TBL)

    # ---- feature_proj + pos-encoding + attention in_proj: one fused matmul ----
    xs = x_ref[...].reshape(TBL, F).astype(bf16)
    qkv = jnp.dot(xs, wqkv_ref[...], preferred_element_type=f32) + bqkv_ref[...]

    # ---- 2-head self-attention over the stacked slab (block-diagonal mask) ----
    inv_sqrt_dh = 1.0 / math.sqrt(dh)
    wout = wout_ref[...]                               # (H, H) bf16
    cb = bias_ref[...]                                 # (5, H) f32
    attn = cb[4:5, :]                                  # out_proj bias, broadcasts

    for hh in range(NUM_HEADS):
        q_h = qkv[:, hh * dh:(hh + 1) * dh].astype(bf16)
        k_h = qkv[:, H + hh * dh:H + (hh + 1) * dh].astype(bf16)
        v_h = qkv[:, 2 * H + hh * dh:2 * H + (hh + 1) * dh].astype(bf16)
        s = jax.lax.dot_general(q_h, k_h, (((1,), (1,)), ((), ())),
                                preferred_element_type=f32)
        s = s * inv_sqrt_dh + amask
        s = s - jnp.max(s, axis=-1, keepdims=True)
        p = jnp.exp(s)
        p = p * pl.reciprocal(jnp.sum(p, axis=-1, keepdims=True), approx=True)
        ctx = jnp.dot(p.astype(bf16), v_h, preferred_element_type=f32)   # (TBL, dh)
        # fused head-concat + out_proj: concat(heads) @ W_out == sum_h ctx_h @ W_out[h]
        attn = attn + jnp.dot(ctx.astype(bf16), wout[hh * dh:(hh + 1) * dh, :],
                              preferred_element_type=f32)

    # real part of the per-sample FFT along the sequence axis == block-diagonal
    # cosine-DFT matmul.
    fft_real = jnp.dot(cos_ref[...], attn.astype(bf16), preferred_element_type=f32)

    cw = convw_ref[...]                                # (4, 3H, H) bf16

    def conv3_bn_lrelu(z, w_flat, b_row):
        # Conv1d(k=3, padding=1) with BN folded in, then LeakyReLU(0.2).
        # +/-1 sequence shifts via sublane roll (XLU) + boundary masks; the
        # three taps are fused into one (TBL, 3C) @ (3C, C) bf16 MXU matmul.
        zprev = pltpu.roll(z, shift=1, axis=0) * mprev
        znext = pltpu.roll(z, shift=TBL - 1, axis=0) * mnext
        zcat = jnp.concatenate([zprev, z, znext], axis=-1).astype(bf16)
        y = jnp.dot(zcat, w_flat, preferred_element_type=f32) + b_row
        return _leaky_relu(y)

    fr = conv3_bn_lrelu(conv3_bn_lrelu(fft_real, cw[0], cb[0:1]), cw[1], cb[1:2])
    tm = conv3_bn_lrelu(conv3_bn_lrelu(attn,     cw[2], cb[2:3]), cw[3], cb[3:4])

    # adaptive_avg_pool1d(., 1) for both branches fused into one pooling matmul.
    cat = jnp.concatenate([fr, tm], axis=-1).astype(bf16)                # (TBL, 2H)
    comb = jnp.dot(pool, cat, preferred_element_type=f32)                # (TB, 2H)

    # fusion MLP + sigmoid (dropouts: eval-mode identity). Weights are
    # zero-padded into uniform (2H, 2H) slabs; padded lanes stay exactly 0.
    fw = fusw_ref[...]                                 # (3, 2H, 2H) bf16
    fb = fusb_ref[...]                                 # (3, 2H) f32
    y = _leaky_relu(jnp.dot(comb.astype(bf16), fw[0],
                            preferred_element_type=f32) + fb[0:1])
    y = _leaky_relu(jnp.dot(y.astype(bf16), fw[1],
                            preferred_element_type=f32) + fb[1:2])
    y = jnp.dot(y.astype(bf16), fw[2], preferred_element_type=f32) + fb[2:3]
    out_ref[...] = 1.0 / (1.0 + jnp.exp(-y[:, 0:1]))                     # (TB, 1)


# ----------------------------------------------------------------------------
# Wrapper
# ----------------------------------------------------------------------------
def frequency_discriminator(x, params):
    """x: (B, 5, L) float32 -- same NCL convention as the PyTorch module."""
    B, F, L = x.shape
    H = params["w_proj"].shape[1]
    dh = H // NUM_HEADS
    f32, bf16 = jnp.float32, jnp.bfloat16

    # ---- TB selection (perf review): target TBL ~= 256 rows; keep TB a
    # multiple of 8 (aligned output blocks / MXU-friendly); split small batches
    # over >= 2 grid steps so both v7x TensorCores get work.
    tb_cap = min(TB_TARGET, max(8, _round_up(max(1, MXU_ROWS // L), 8)))
    n_steps_min = 2 if B >= 2 else 1
    TB = min(tb_cap, _round_up(-(-B // n_steps_min), 8))
    n_steps = max(n_steps_min, -(-B // TB))
    B_pad = n_steps * TB
    TBL = TB * L

    x_lf = jnp.transpose(x, (0, 2, 1)).astype(f32)                        # (B, L, F)
    if B_pad != B:
        x_lf = jnp.pad(x_lf, ((0, B_pad - B), (0, 0), (0, 0)))

    # ---- fold feature_proj + pos-encoding + MHA in_proj into one matmul ----
    pe = positional_encoding(L, H)
    w_qkv = (params["w_proj"] @ params["w_in"]).astype(bf16)              # (F, 3H)
    b_qkv = ((pe + params["b_proj"]) @ params["w_in"] + params["b_in"])   # (L, 3H)
    b_qkv = jnp.tile(b_qkv, (TB, 1)).astype(f32)                          # (TBL, 3H)

    cos_bd = jnp.kron(jnp.eye(TB, dtype=f32),
                      dft_cos_matrix(L)).astype(bf16)                     # (TBL, TBL)

    # ---- packed parameters (few DMA descriptors, bf16 weights) ----
    convw = jnp.stack([params[k].reshape(3 * H, H)
                       for k in ("freq_w1", "freq_w2", "time_w1", "time_w2")]
                      ).astype(bf16)                                      # (4, 3H, H)
    bias_hb = jnp.concatenate(
        [params["freq_b1"], params["freq_b2"], params["time_b1"],
         params["time_b2"], params["b_out"]], axis=0).astype(f32)         # (5, H)

    fus_w = jnp.zeros((3, 2 * H, 2 * H), f32)
    fus_w = fus_w.at[0, :2 * H, :H].set(params["fus_w1"])
    fus_w = fus_w.at[1, :H, :H // 2].set(params["fus_w2"])
    fus_w = fus_w.at[2, :H // 2, :1].set(params["fus_w3"])
    fus_w = fus_w.astype(bf16)                                            # (3, 2H, 2H)
    fus_b = jnp.zeros((3, 2 * H), f32)
    fus_b = fus_b.at[0, :H].set(params["fus_b1"][0])
    fus_b = fus_b.at[1, :H // 2].set(params["fus_b2"][0])
    fus_b = fus_b.at[2, :1].set(params["fus_b3"][0])

    w_out = params["w_out"].astype(bf16)

    consts = [cos_bd, w_qkv, b_qkv, w_out, convw, bias_hb, fus_w, fus_b]

    def _const_spec(a):
        nd = a.ndim
        return pl.BlockSpec(a.shape, lambda g, nd=nd: (0,) * nd)

    in_specs = ([pl.BlockSpec((TB, L, F), lambda g: (g, 0, 0))]
                + [_const_spec(a) for a in consts])

    per_sample_flops = (
        2 * L * F * 3 * H                                  # fused proj + in_proj
        + NUM_HEADS * (4 * L * L * dh + 2 * L * dh * H)    # attention + out_proj
        + 2 * L * L * H                                    # cosine DFT
        + 4 * (2 * L * 3 * H * H)                          # convs
        + 2 * L * 2 * H                                    # fused pooling
        + 3 * (2 * 2 * H * 2 * H))                         # fusion MLP (padded)
    per_step_flops = 2 * TBL * TB * TBL                    # in-kernel indicator matmul
    cost = pl.CostEstimate(
        flops=int(B_pad * per_sample_flops + n_steps * per_step_flops),
        transcendentals=int(B_pad * (NUM_HEADS * L * L + 1)),
        bytes_accessed=int(x_lf.size * 4 + B_pad * 4
                           + sum(int(c.size) * c.dtype.itemsize for c in consts)))

    out = pl.pallas_call(
        _fd_kernel,
        out_shape=jax.ShapeDtypeStruct((B_pad, 1), jnp.float32),
        grid=(n_steps,),
        in_specs=in_specs,
        out_specs=pl.BlockSpec((TB, 1), lambda g: (g, 0)),
        compiler_params=pltpu.CompilerParams(
            dimension_semantics=("parallel",)),   # batch steps shard across v7x's 2 TCs
        cost_estimate=cost,
    )(x_lf, *consts)

    return out[:B]


# ----------------------------------------------------------------------------
# Deterministic parameter construction (shapes from the module's __init__)
# ----------------------------------------------------------------------------
def init_params(key, hidden_dim=32, in_features=5):
    H = hidden_dim
    keys = iter(jax.random.split(key, 64))

    def nrm(shape, s=0.1):
        return (s * jax.random.normal(next(keys), shape)).astype(jnp.float32)

    p = {
        "w_proj": nrm((in_features, H)),    # Linear(5, H).weight.T
        "b_proj": nrm((1, H)),
        "w_in":   nrm((H, 3 * H)),          # MHA in_proj_weight.T
        "b_in":   nrm((1, 3 * H)),
        "w_out":  nrm((H, H)),              # MHA out_proj.weight.T
        "b_out":  nrm((1, H)),
    }

    def conv_bn_fold():
        w = nrm((3, H, H))                  # [tap, cin, cout] == torch weight[cout, cin, tap]
        b = nrm((1, H))
        gamma = 1.0 + nrm((1, H))
        beta = nrm((1, H))
        run_mean = nrm((1, H))
        run_var = 1.0 + jnp.abs(nrm((1, H)))
        scale = gamma / jnp.sqrt(run_var + BN_EPS)      # eval-mode BatchNorm1d fold
        return w * scale[None], (b - run_mean) * scale + beta

    p["freq_w1"], p["freq_b1"] = conv_bn_fold()
    p["freq_w2"], p["freq_b2"] = conv_bn_fold()
    p["time_w1"], p["time_b1"] = conv_bn_fold()
    p["time_w2"], p["time_b2"] = conv_bn_fold()

    p["fus_w1"] = nrm((2 * H, H));   p["fus_b1"] = nrm((1, H))
    p["fus_w2"] = nrm((H, H // 2));  p["fus_b2"] = nrm((1, H // 2))
    p["fus_w3"] = nrm((H // 2, 1));  p["fus_b3"] = nrm((1, 1))
    return p


def positional_encoding(L, H):
    pos = jnp.arange(L, dtype=jnp.float32)[:, None]
    div = jnp.exp(jnp.arange(0, H, 2, dtype=jnp.float32) * (-math.log(10000.0) / H))
    pe = jnp.zeros((L, H), jnp.float32)
    pe = pe.at[:, 0::2].set(jnp.sin(pos * div))
    pe = pe.at[:, 1::2].set(jnp.cos(pos * div))
    return pe


def dft_cos_matrix(L):
    n = jnp.arange(L, dtype=jnp.float32)
    return jnp.cos(2.0 * math.pi * n[:, None] * n[None, :] / L)


# ----------------------------------------------------------------------------
# Independent pure-JAX f32 reference (no Pallas, no roll/block-diag tricks)
# ----------------------------------------------------------------------------
def reference_forward(x, params):
    B, F, L = x.shape
    H = params["w_proj"].shape[1]
    dh = H // NUM_HEADS
    pe = positional_encoding(L, H)
    x_lf = jnp.transpose(x, (0, 2, 1)).astype(jnp.float32)

    def conv(z, w, b):
        zp = jnp.pad(z, ((1, 1), (0, 0)))
        y = zp[:-2] @ w[0] + zp[1:-1] @ w[1] + zp[2:] @ w[2] + b
        return _leaky_relu(y)

    outs = []
    for bi in range(B):
        h = x_lf[bi] @ params["w_proj"] + params["b_proj"] + pe
        qkv = h @ params["w_in"] + params["b_in"]
        q, k, v = qkv[:, :H], qkv[:, H:2 * H], qkv[:, 2 * H:]
        heads = []
        for hh in range(NUM_HEADS):
            sl = slice(hh * dh, (hh + 1) * dh)
            p = jax.nn.softmax((q[:, sl] @ k[:, sl].T) / math.sqrt(dh), axis=-1)
            heads.append(p @ v[:, sl])
        attn = jnp.concatenate(heads, axis=-1) @ params["w_out"] + params["b_out"]
        fft_real = jnp.fft.fft(attn, axis=0).real
        fr = conv(conv(fft_real, params["freq_w1"], params["freq_b1"]),
                  params["freq_w2"], params["freq_b2"])
        tm = conv(conv(attn, params["time_w1"], params["time_b1"]),
                  params["time_w2"], params["time_b2"])
        comb = jnp.concatenate([fr.mean(0, keepdims=True),
                                tm.mean(0, keepdims=True)], axis=-1)
        y = _leaky_relu(comb @ params["fus_w1"] + params["fus_b1"])
        y = _leaky_relu(y @ params["fus_w2"] + params["fus_b2"])
        y = y @ params["fus_w3"] + params["fus_b3"]
        outs.append(jax.nn.sigmoid(y))
    return jnp.concatenate(outs, axis=0)


if __name__ == "__main__":
    B, F, L, H = 2, 5, 16, 32          # batch, features, sequence_length, hidden_dim
    key = jax.random.PRNGKey(0)
    kx, kp = jax.random.split(key)

    x = jax.random.normal(kx, (B, F, L), dtype=jnp.float32)
    params = init_params(kp, hidden_dim=H, in_features=F)

    fd = jax.jit(frequency_discriminator)

    # tolerance covers bf16 MXU operands (f32 accumulation) + the EUP
    # approximate reciprocal in the softmax denominator vs the f32 reference.
    ATOL = RTOL = 2e-2

    out = jax.block_until_ready(fd(x, params))
    ref = reference_forward(x, params)
    assert out.shape == (B, 1), out.shape
    if not jnp.allclose(out, ref, atol=ATOL, rtol=RTOL):
        raise AssertionError(f"Pallas/reference mismatch:\n{out}\nvs\n{ref}")

    # also exercise the multi-step grid + batch-padding path (B % TB != 0)
    B2 = 10
    x2 = jax.random.normal(jax.random.PRNGKey(1), (B2, F, L), dtype=jnp.float32)
    out2 = jax.block_until_ready(fd(x2, params))
    ref2 = reference_forward(x2, params)
    assert out2.shape == (B2, 1), out2.shape
    if not jnp.allclose(out2, ref2, atol=ATOL, rtol=RTOL):
        raise AssertionError(f"Pallas/reference mismatch (padded batch):\n{out2}\nvs\n{ref2}")

    print("KERNEL_OK")
</pallas_src>

<mosaic_0001>
module attributes {stable_mosaic.version = 11 : i64} {
  func.func @_fd_kernel(%arg0: i32, %arg1: memref<8x16x5xf32, #tpu.memory_space<vmem>>, %arg2: memref<128x128xbf16, #tpu.memory_space<vmem>>, %arg3: memref<5x96xbf16, #tpu.memory_space<vmem>>, %arg4: memref<128x96xf32, #tpu.memory_space<vmem>>, %arg5: memref<32x32xbf16, #tpu.memory_space<vmem>>, %arg6: memref<4x96x32xbf16, #tpu.memory_space<vmem>>, %arg7: memref<5x32xf32, #tpu.memory_space<vmem>>, %arg8: memref<3x64x64xbf16, #tpu.memory_space<vmem>>, %arg9: memref<3x64xf32, #tpu.memory_space<vmem>>, %arg10: memref<8x1xf32, #tpu.memory_space<vmem>>) attributes {dimension_semantics = [#tpu.dimension_semantics<parallel>], iteration_bounds = array<i64: 2>, scalar_prefetch = 0 : i64, scratch_operands = 0 : i64, tpu.core_type = #tpu.core_type<tc>, window_params = [{transform_indices = @transform_0, window_bounds = array<i64: 8, 16, 5>}, {pipeline_mode = #tpu.pipeline_mode<synchronous>, transform_indices = @transform_1, window_bounds = array<i64: 128, 128>}, {pipeline_mode = #tpu.pipeline_mode<synchronous>, transform_indices = @transform_2, window_bounds = array<i64: 5, 96>}, {pipeline_mode = #tpu.pipeline_mode<synchronous>, transform_indices = @transform_3, window_bounds = array<i64: 128, 96>}, {pipeline_mode = #tpu.pipeline_mode<synchronous>, transform_indices = @transform_4, window_bounds = array<i64: 32, 32>}, {pipeline_mode = #tpu.pipeline_mode<synchronous>, transform_indices = @transform_5, window_bounds = array<i64: 4, 96, 32>}, {pipeline_mode = #tpu.pipeline_mode<synchronous>, transform_indices = @transform_6, window_bounds = array<i64: 5, 32>}, {pipeline_mode = #tpu.pipeline_mode<synchronous>, transform_indices = @transform_7, window_bounds = array<i64: 3, 64, 64>}, {pipeline_mode = #tpu.pipeline_mode<synchronous>, transform_indices = @transform_8, window_bounds = array<i64: 3, 64>}, {transform_indices = @transform_9, window_bounds = array<i64: 8, 1>}]} {
    %0 = tpu.iota {dimensions = array<i32: 0>} : vector<8x128xi32>
    %1 = tpu.iota {dimensions = array<i32: 1>} : vector<8x128xi32>
    %c16_i32 = arith.constant 16 : i32
    %2 = vector.broadcast %c16_i32 : i32 to vector<8x128xi32>
    %3 = arith.muli %0, %2 : vector<8x128xi32>
    %4 = arith.cmpi sge, %1, %3 : vector<8x128xi32>
    %c16_i32_0 = arith.constant 16 : i32
    %5 = vector.broadcast %c16_i32_0 : i32 to vector<8x128xi32>
    %6 = arith.muli %0, %5 : vector<8x128xi32>
    %c16_i32_1 = arith.constant 16 : i32
    %7 = vector.broadcast %c16_i32_1 : i32 to vector<8x128xi32>
    %8 = arith.addi %6, %7 : vector<8x128xi32>
    %9 = arith.cmpi slt, %1, %8 : vector<8x128xi32>
    %10 = arith.andi %4, %9 : vector<8x128xi1>
    %cst = arith.constant 1.000000e+00 : f32
    %cst_2 = arith.constant 0.000000e+00 : f32
    %11 = vector.broadcast %cst : f32 to vector<8x128xf32>
    %12 = vector.broadcast %cst_2 : f32 to vector<8x128xf32>
    %13 = arith.select %10, %11, %12 : vector<8x128xi1>, vector<8x128xf32>
    %14 = tpu.iota {dimensions = array<i32: 0>} : vector<128x8xi32>
    %15 = tpu.iota {dimensions = array<i32: 1>} : vector<128x8xi32>
    %c16_i32_3 = arith.constant 16 : i32
    %16 = vector.broadcast %c16_i32_3 : i32 to vector<128x8xi32>
    %17 = arith.muli %15, %16 : vector<128x8xi32>
    %18 = arith.cmpi sge, %14, %17 : vector<128x8xi32>
    %c16_i32_4 = arith.constant 16 : i32
    %19 = vector.broadcast %c16_i32_4 : i32 to vector<128x8xi32>
    %20 = arith.muli %15, %19 : vector<128x8xi32>
    %c16_i32_5 = arith.constant 16 : i32
    %21 = vector.broadcast %c16_i32_5 : i32 to vector<128x8xi32>
    %22 = arith.addi %20, %21 : vector<128x8xi32>
    %23 = arith.cmpi slt, %14, %22 : vector<128x8xi32>
    %24 = arith.andi %18, %23 : vector<128x8xi1>
    %cst_6 = arith.constant 1.000000e+00 : f32
    %cst_7 = arith.constant 0.000000e+00 : f32
    %25 = vector.broadcast %cst_6 : f32 to vector<128x8xf32>
    %26 = vector.broadcast %cst_7 : f32 to vector<128x8xf32>
    %27 = arith.select %24, %25, %26 : vector<128x8xi1>, vector<128x8xf32>
    %28 = arith.truncf %27 : vector<128x8xf32> to vector<128x8xbf16>
    %29 = arith.truncf %13 : vector<8x128xf32> to vector<8x128xbf16>
    %cst_8 = arith.constant dense<0.000000e+00> : vector<128x128xf32>
    %30 = tpu.matmul %28, %29, %cst_8 {dimension_numbers = #tpu.dot_dimension_numbers<[1], [0], [0], [1], [0, 0, 1, 1], [], []>} : vector<128x8xbf16>, vector<8x128xbf16>, vector<128x128xf32> -> vector<128x128xf32>
    %cst_9 = arith.constant 5.000000e-01 : f32
    %31 = vector.broadcast %cst_9 : f32 to vector<128x128xf32>
    %32 = arith.cmpf ogt, %30, %31 : vector<128x128xf32>
    %cst_10 = arith.constant 0.000000e+00 : f32
    %cst_11 = arith.constant -1.000000e+30 : f32
    %33 = vector.broadcast %cst_10 : f32 to vector<128x128xf32>
    %34 = vector.broadcast %cst_11 : f32 to vector<128x128xf32>
    %35 = arith.select %32, %33, %34 : vector<128x128xi1>, vector<128x128xf32>
    %c16_i32_12 = arith.constant 16 : i32
    %36 = vector.broadcast %c16_i32_12 : i32 to vector<128x8xi32>
    %37 = arith.muli %15, %36 : vector<128x8xi32>
    %38 = arith.cmpi eq, %14, %37 : vector<128x8xi32>
    %cst_13 = arith.constant 1.000000e+00 : f32
    %cst_14 = arith.constant 0.000000e+00 : f32
    %39 = vector.broadcast %cst_13 : f32 to vector<128x8xf32>
    %40 = vector.broadcast %cst_14 : f32 to vector<128x8xf32>
    %41 = arith.select %38, %39, %40 : vector<128x8xi1>, vector<128x8xf32>
    %cst_15 = arith.constant dense<0.000000e+00> : vector<128xf32>
    %42 = vector.multi_reduction <add>, %41, %cst_15 [1] : vector<128x8xf32> to vector<128xf32>
    %43 = vector.shape_cast %42 : vector<128xf32> to vector<128x1xf32>
    %c16_i32_16 = arith.constant 16 : i32
    %44 = vector.broadcast %c16_i32_16 : i32 to vector<128x8xi32>
    %45 = arith.muli %15, %44 : vector<128x8xi32>
    %c15_i32 = arith.constant 15 : i32
    %46 = vector.broadcast %c15_i32 : i32 to vector<128x8xi32>
    %47 = arith.addi %45, %46 : vector<128x8xi32>
    %48 = arith.cmpi eq, %14, %47 : vector<128x8xi32>
    %cst_17 = arith.constant 1.000000e+00 : f32
    %cst_18 = arith.constant 0.000000e+00 : f32
    %49 = vector.broadcast %cst_17 : f32 to vector<128x8xf32>
    %50 = vector.broadcast %cst_18 : f32 to vector<128x8xf32>
    %51 = arith.select %48, %49, %50 : vector<128x8xi1>, vector<128x8xf32>
    %cst_19 = arith.constant dense<0.000000e+00> : vector<128xf32>
    %52 = vector.multi_reduction <add>, %51, %cst_19 [1] : vector<128x8xf32> to vector<128xf32>
    %53 = vector.shape_cast %52 : vector<128xf32> to vector<128x1xf32>
    %cst_20 = arith.constant 1.000000e+00 : f32
    %54 = vector.broadcast %cst_20 : f32 to vector<128x1xf32>
    %55 = arith.subf %54, %43 : vector<128x1xf32>
    %cst_21 = arith.constant 1.000000e+00 : f32
    %56 = vector.broadcast %cst_21 : f32 to vector<128x1xf32>
    %57 = arith.subf %56, %53 : vector<128x1xf32>
    %cst_22 = arith.constant 6.250000e-02 : f32
    %58 = vector.broadcast %cst_22 : f32 to vector<8x128xf32>
    %59 = arith.mulf %13, %58 : vector<8x128xf32>
    %60 = arith.truncf %59 : vector<8x128xf32> to vector<8x128xbf16>
    %c0 = arith.constant 0 : index
    %c0_23 = arith.constant 0 : index
    %c0_24 = arith.constant 0 : index
    %61 = vector.load %arg1[%c0, %c0_23, %c0_24] : memref<8x16x5xf32, #tpu.memory_space<vmem>>, vector<8x16x5xf32>
    %62 = vector.shape_cast %61 : vector<8x16x5xf32> to vector<128x5xf32>
    %63 = arith.truncf %62 : vector<128x5xf32> to vector<128x5xbf16>
    %c0_25 = arith.constant 0 : index
    %c0_26 = arith.constant 0 : index
    %64 = vector.load %arg3[%c0_25, %c0_26] : memref<5x96xbf16, #tpu.memory_space<vmem>>, vector<5x96xbf16>
    %cst_27 = arith.constant dense<0.000000e+00> : vector<128x96xf32>
    %65 = tpu.matmul %63, %64, %cst_27 {dimension_numbers = #tpu.dot_dimension_numbers<[1], [0], [0], [1], [0, 0, 1, 1], [], []>} : vector<128x5xbf16>, vector<5x96xbf16>, vector<128x96xf32> -> vector<128x96xf32>
    %c0_28 = arith.constant 0 : index
    %c0_29 = arith.constant 0 : index
    %66 = vector.load %arg4[%c0_28, %c0_29] : memref<128x96xf32, #tpu.memory_space<vmem>>, vector<128x96xf32>
    %67 = arith.addf %65, %66 : vector<128x96xf32>
    %c0_30 = arith.constant 0 : index
    %c0_31 = arith.constant 0 : index
    %68 = vector.load %arg5[%c0_30, %c0_31] : memref<32x32xbf16, #tpu.memory_space<vmem>>, vector<32x32xbf16>
    %c0_32 = arith.constant 0 : index
    %c0_33 = arith.constant 0 : index
    %69 = vector.load %arg7[%c0_32, %c0_33] : memref<5x32xf32, #tpu.memory_space<vmem>>, vector<5x32xf32>
    %70 = vector.extract_strided_slice %69 {offsets = [4, 0], sizes = [1, 32], strides = [1, 1]} : vector<5x32xf32> to vector<1x32xf32>
    %71 = vector.extract_strided_slice %67 {offsets = [0, 0], sizes = [128, 16], strides = [1, 1]} : vector<128x96xf32> to vector<128x16xf32>
    %72 = arith.truncf %71 : vector<128x16xf32> to vector<128x16xbf16>
    %73 = vector.extract_strided_slice %67 {offsets = [0, 32], sizes = [128, 16], strides = [1, 1]} : vector<128x96xf32> to vector<128x16xf32>
    %74 = arith.truncf %73 : vector<128x16xf32> to vector<128x16xbf16>
    %75 = vector.extract_strided_slice %67 {offsets = [0, 64], sizes = [128, 16], strides = [1, 1]} : vector<128x96xf32> to vector<128x16xf32>
    %76 = arith.truncf %75 : vector<128x16xf32> to vector<128x16xbf16>
    %cst_34 = arith.constant dense<0.000000e+00> : vector<128x128xf32>
    %77 = tpu.matmul %72, %74, %cst_34 {dimension_numbers = #tpu.dot_dimension_numbers<[1], [1], [0], [0], [0, 0, 1, 0], [], []>} : vector<128x16xbf16>, vector<128x16xbf16>, vector<128x128xf32> -> vector<128x128xf32>
    %cst_35 = arith.constant 2.500000e-01 : f32
    %78 = vector.broadcast %cst_35 : f32 to vector<128x128xf32>
    %79 = arith.mulf %77, %78 : vector<128x128xf32>
    %80 = arith.addf %79, %35 : vector<128x128xf32>
    %cst_36 = arith.constant dense<0xFF800000> : vector<128xf32>
    %81 = vector.multi_reduction <maximumf>, %80, %cst_36 [1] : vector<128x128xf32> to vector<128xf32>
    %82 = vector.shape_cast %81 : vector<128xf32> to vector<128x1xf32>
    %83 = vector.broadcast %82 : vector<128x1xf32> to vector<128x128xf32>
    %84 = arith.subf %80, %83 : vector<128x128xf32>
    %85 = math.exp %84 : vector<128x128xf32>
    %cst_37 = arith.constant dense<0.000000e+00> : vector<128xf32>
    %86 = vector.multi_reduction <add>, %85, %cst_37 [1] : vector<128x128xf32> to vector<128xf32>
    %87 = vector.shape_cast %86 : vector<128xf32> to vector<128x1xf32>
    %88 = tpu.reciprocal %87 {approx = true} : vector<128x1xf32> -> vector<128x1xf32>
    %89 = vector.broadcast %88 : vector<128x1xf32> to vector<128x128xf32>
    %90 = arith.mulf %85, %89 : vector<128x128xf32>
    %91 = arith.truncf %90 : vector<128x128xf32> to vector<128x128xbf16>
    %cst_38 = arith.constant dense<0.000000e+00> : vector<128x16xf32>
    %92 = tpu.matmul %91, %76, %cst_38 {dimension_numbers = #tpu.dot_dimension_numbers<[1], [0], [0], [1], [0, 0, 1, 1], [], []>} : vector<128x128xbf16>, vector<128x16xbf16>, vector<128x16xf32> -> vector<128x16xf32>
    %93 = arith.truncf %92 : vector<128x16xf32> to vector<128x16xbf16>
    %94 = vector.extract_strided_slice %68 {offsets = [0, 0], sizes = [16, 32], strides = [1, 1]} : vector<32x32xbf16> to vector<16x32xbf16>
    %cst_39 = arith.constant dense<0.000000e+00> : vector<128x32xf32>
    %95 = tpu.matmul %93, %94, %cst_39 {dimension_numbers = #tpu.dot_dimension_numbers<[1], [0], [0], [1], [0, 0, 1, 1], [], []>} : vector<128x16xbf16>, vector<16x32xbf16>, vector<128x32xf32> -> vector<128x32xf32>
    %96 = vector.broadcast %70 : vector<1x32xf32> to vector<128x32xf32>
    %97 = arith.addf %96, %95 : vector<128x32xf32>
    %98 = vector.extract_strided_slice %67 {offsets = [0, 16], sizes = [128, 16], strides = [1, 1]} : vector<128x96xf32> to vector<128x16xf32>
    %99 = arith.truncf %98 : vector<128x16xf32> to vector<128x16xbf16>
    %100 = vector.extract_strided_slice %67 {offsets = [0, 48], sizes = [128, 16], strides = [1, 1]} : vector<128x96xf32> to vector<128x16xf32>
    %101 = arith.truncf %100 : vector<128x16xf32> to vector<128x16xbf16>
    %102 = vector.extract_strided_slice %67 {offsets = [0, 80], sizes = [128, 16], strides = [1, 1]} : vector<128x96xf32> to vector<128x16xf32>
    %103 = arith.truncf %102 : vector<128x16xf32> to vector<128x16xbf16>
    %cst_40 = arith.constant dense<0.000000e+00> : vector<128x128xf32>
    %104 = tpu.matmul %99, %101, %cst_40 {dimension_numbers = #tpu.dot_dimension_numbers<[1], [1], [0], [0], [0, 0, 1, 0], [], []>} : vector<128x16xbf16>, vector<128x16xbf16>, vector<128x128xf32> -> vector<128x128xf32>
    %cst_41 = arith.constant 2.500000e-01 : f32
    %105 = vector.broadcast %cst_41 : f32 to vector<128x128xf32>
    %106 = arith.mulf %104, %105 : vector<128x128xf32>
    %107 = arith.addf %106, %35 : vector<128x128xf32>
    %cst_42 = arith.constant dense<0xFF800000> : vector<128xf32>
    %108 = vector.multi_reduction <maximumf>, %107, %cst_42 [1] : vector<128x128xf32> to vector<128xf32>
    %109 = vector.shape_cast %108 : vector<128xf32> to vector<128x1xf32>
    %110 = vector.broadcast %109 : vector<128x1xf32> to vector<128x128xf32>
    %111 = arith.subf %107, %110 : vector<128x128xf32>
    %112 = math.exp %111 : vector<128x128xf32>
    %cst_43 = arith.constant dense<0.000000e+00> : vector<128xf32>
    %113 = vector.multi_reduction <add>, %112, %cst_43 [1] : vector<128x128xf32> to vector<128xf32>
    %114 = vector.shape_cast %113 : vector<128xf32> to vector<128x1xf32>
    %115 = tpu.reciprocal %114 {approx = true} : vector<128x1xf32> -> vector<128x1xf32>
    %116 = vector.broadcast %115 : vector<128x1xf32> to vector<128x128xf32>
    %117 = arith.mulf %112, %116 : vector<128x128xf32>
    %118 = arith.truncf %117 : vector<128x128xf32> to vector<128x128xbf16>
    %cst_44 = arith.constant dense<0.000000e+00> : vector<128x16xf32>
    %119 = tpu.matmul %118, %103, %cst_44 {dimension_numbers = #tpu.dot_dimension_numbers<[1], [0], [0], [1], [0, 0, 1, 1], [], []>} : vector<128x128xbf16>, vector<128x16xbf16>, vector<128x16xf32> -> vector<128x16xf32>
    %120 = arith.truncf %119 : vector<128x16xf32> to vector<128x16xbf16>
    %121 = vector.extract_strided_slice %68 {offsets = [16, 0], sizes = [16, 32], strides = [1, 1]} : vector<32x32xbf16> to vector<16x32xbf16>
    %cst_45 = arith.constant dense<0.000000e+00> : vector<128x32xf32>
    %122 = tpu.matmul %120, %121, %cst_45 {dimension_numbers = #tpu.dot_dimension_numbers<[1], [0], [0], [1], [0, 0, 1, 1], [], []>} : vector<128x16xbf16>, vector<16x32xbf16>, vector<128x32xf32> -> vector<128x32xf32>
    %123 = arith.addf %97, %122 : vector<128x32xf32>
    %c0_46 = arith.constant 0 : index
    %c0_47 = arith.constant 0 : index
    %124 = vector.load %arg2[%c0_46, %c0_47] : memref<128x128xbf16, #tpu.memory_space<vmem>>, vector<128x128xbf16>
    %125 = arith.truncf %123 : vector<128x32xf32> to vector<128x32xbf16>
    %cst_48 = arith.constant dense<0.000000e+00> : vector<128x32xf32>
    %126 = tpu.matmul %124, %125, %cst_48 {dimension_numbers = #tpu.dot_dimension_numbers<[1], [0], [0], [1], [0, 0, 1, 1], [], []>} : vector<128x128xbf16>, vector<128x32xbf16>, vector<128x32xf32> -> vector<128x32xf32>
    %c0_49 = arith.constant 0 : index
    %c0_50 = arith.constant 0 : index
    %c0_51 = arith.constant 0 : index
    %127 = vector.load %arg6[%c0_49, %c0_50, %c0_51] : memref<4x96x32xbf16, #tpu.memory_space<vmem>>, vector<4x96x32xbf16>
    %128 = vector.extract_strided_slice %127 {offsets = [0, 0, 0], sizes = [1, 96, 32], strides = [1, 1, 1]} : vector<4x96x32xbf16> to vector<1x96x32xbf16>
    %129 = vector.shape_cast %128 : vector<1x96x32xbf16> to vector<96x32xbf16>
    %130 = vector.extract_strided_slice %69 {offsets = [0, 0], sizes = [1, 32], strides = [1, 1]} : vector<5x32xf32> to vector<1x32xf32>
    %c1_i32 = arith.constant 1 : i32
    %131 = tpu.dynamic_rotate %126 by %c1_i32 dim 0 : vector<128x32xf32>, i32 -> vector<128x32xf32>
    %132 = vector.broadcast %55 : vector<128x1xf32> to vector<128x32xf32>
    %133 = arith.mulf %131, %132 : vector<128x32xf32>
    %c127_i32 = arith.constant 127 : i32
    %134 = tpu.dynamic_rotate %126 by %c127_i32 dim 0 : vector<128x32xf32>, i32 -> vector<128x32xf32>
    %135 = vector.broadcast %57 : vector<128x1xf32> to vector<128x32xf32>
    %136 = arith.mulf %134, %135 : vector<128x32xf32>
    %137 = tpu.concatenate %133, %126, %136 in 1 : vector<128x32xf32>, vector<128x32xf32>, vector<128x32xf32> -> vector<128x96xf32>
    %138 = arith.truncf %137 : vector<128x96xf32> to vector<128x96xbf16>
    %cst_52 = arith.constant dense<0.000000e+00> : vector<128x32xf32>
    %139 = tpu.matmul %138, %129, %cst_52 {dimension_numbers = #tpu.dot_dimension_numbers<[1], [0], [0], [1], [0, 0, 1, 1], [], []>} : vector<128x96xbf16>, vector<96x32xbf16>, vector<128x32xf32> -> vector<128x32xf32>
    %140 = vector.broadcast %130 : vector<1x32xf32> to vector<128x32xf32>
    %141 = arith.addf %139, %140 : vector<128x32xf32>
    %cst_53 = arith.constant 0.000000e+00 : f32
    %142 = vector.broadcast %cst_53 : f32 to vector<128x32xf32>
    %143 = arith.cmpf ogt, %141, %142 : vector<128x32xf32>
    %cst_54 = arith.constant 2.000000e-01 : f32
    %144 = vector.broadcast %cst_54 : f32 to vector<128x32xf32>
    %145 = arith.mulf %144, %141 : vector<128x32xf32>
    %146 = arith.select %143, %141, %145 : vector<128x32xi1>, vector<128x32xf32>
    %147 = vector.extract_strided_slice %127 {offsets = [1, 0, 0], sizes = [1, 96, 32], strides = [1, 1, 1]} : vector<4x96x32xbf16> to vector<1x96x32xbf16>
    %148 = vector.shape_cast %147 : vector<1x96x32xbf16> to vector<96x32xbf16>
    %149 = vector.extract_strided_slice %69 {offsets = [1, 0], sizes = [1, 32], strides = [1, 1]} : vector<5x32xf32> to vector<1x32xf32>
    %c1_i32_55 = arith.constant 1 : i32
    %150 = tpu.dynamic_rotate %146 by %c1_i32_55 dim 0 : vector<128x32xf32>, i32 -> vector<128x32xf32>
    %151 = vector.broadcast %55 : vector<128x1xf32> to vector<128x32xf32>
    %152 = arith.mulf %150, %151 : vector<128x32xf32>
    %c127_i32_56 = arith.constant 127 : i32
    %153 = tpu.dynamic_rotate %146 by %c127_i32_56 dim 0 : vector<128x32xf32>, i32 -> vector<128x32xf32>
    %154 = vector.broadcast %57 : vector<128x1xf32> to vector<128x32xf32>
    %155 = arith.mulf %153, %154 : vector<128x32xf32>
    %156 = tpu.concatenate %152, %146, %155 in 1 : vector<128x32xf32>, vector<128x32xf32>, vector<128x32xf32> -> vector<128x96xf32>
    %157 = arith.truncf %156 : vector<128x96xf32> to vector<128x96xbf16>
    %cst_57 = arith.constant dense<0.000000e+00> : vector<128x32xf32>
    %158 = tpu.matmul %157, %148, %cst_57 {dimension_numbers = #tpu.dot_dimension_numbers<[1], [0], [0], [1], [0, 0, 1, 1], [], []>} : vector<128x96xbf16>, vector<96x32xbf16>, vector<128x32xf32> -> vector<128x32xf32>
    %159 = vector.broadcast %149 : vector<1x32xf32> to vector<128x32xf32>
    %160 = arith.addf %158, %159 : vector<128x32xf32>
    %cst_58 = arith.constant 0.000000e+00 : f32
    %161 = vector.broadcast %cst_58 : f32 to vector<128x32xf32>
    %162 = arith.cmpf ogt, %160, %161 : vector<128x32xf32>
    %cst_59 = arith.constant 2.000000e-01 : f32
    %163 = vector.broadcast %cst_59 : f32 to vector<128x32xf32>
    %164 = arith.mulf %163, %160 : vector<128x32xf32>
    %165 = arith.select %162, %160, %164 : vector<128x32xi1>, vector<128x32xf32>
    %166 = vector.extract_strided_slice %127 {offsets = [2, 0, 0], sizes = [1, 96, 32], strides = [1, 1, 1]} : vector<4x96x32xbf16> to vector<1x96x32xbf16>
    %167 = vector.shape_cast %166 : vector<1x96x32xbf16> to vector<96x32xbf16>
    %168 = vector.extract_strided_slice %69 {offsets = [2, 0], sizes = [1, 32], strides = [1, 1]} : vector<5x32xf32> to vector<1x32xf32>
    %c1_i32_60 = arith.constant 1 : i32
    %169 = tpu.dynamic_rotate %123 by %c1_i32_60 dim 0 : vector<128x32xf32>, i32 -> vector<128x32xf32>
    %170 = vector.broadcast %55 : vector<128x1xf32> to vector<128x32xf32>
    %171 = arith.mulf %169, %170 : vector<128x32xf32>
    %c127_i32_61 = arith.constant 127 : i32
    %172 = tpu.dynamic_rotate %123 by %c127_i32_61 dim 0 : vector<128x32xf32>, i32 -> vector<128x32xf32>
    %173 = vector.broadcast %57 : vector<128x1xf32> to vector<128x32xf32>
    %174 = arith.mulf %172, %173 : vector<128x32xf32>
    %175 = tpu.concatenate %171, %123, %174 in 1 : vector<128x32xf32>, vector<128x32xf32>, vector<128x32xf32> -> vector<128x96xf32>
    %176 = arith.truncf %175 : vector<128x96xf32> to vector<128x96xbf16>
    %cst_62 = arith.constant dense<0.000000e+00> : vector<128x32xf32>
    %177 = tpu.matmul %176, %167, %cst_62 {dimension_numbers = #tpu.dot_dimension_numbers<[1], [0], [0], [1], [0, 0, 1, 1], [], []>} : vector<128x96xbf16>, vector<96x32xbf16>, vector<128x32xf32> -> vector<128x32xf32>
    %178 = vector.broadcast %168 : vector<1x32xf32> to vector<128x32xf32>
    %179 = arith.addf %177, %178 : vector<128x32xf32>
    %cst_63 = arith.constant 0.000000e+00 : f32
    %180 = vector.broadcast %cst_63 : f32 to vector<128x32xf32>
    %181 = arith.cmpf ogt, %179, %180 : vector<128x32xf32>
    %cst_64 = arith.constant 2.000000e-01 : f32
    %182 = vector.broadcast %cst_64 : f32 to vector<128x32xf32>
    %183 = arith.mulf %182, %179 : vector<128x32xf32>
    %184 = arith.select %181, %179, %183 : vector<128x32xi1>, vector<128x32xf32>
    %185 = vector.extract_strided_slice %127 {offsets = [3, 0, 0], sizes = [1, 96, 32], strides = [1, 1, 1]} : vector<4x96x32xbf16> to vector<1x96x32xbf16>
    %186 = vector.shape_cast %185 : vector<1x96x32xbf16> to vector<96x32xbf16>
    %187 = vector.extract_strided_slice %69 {offsets = [3, 0], sizes = [1, 32], strides = [1, 1]} : vector<5x32xf32> to vector<1x32xf32>
    %c1_i32_65 = arith.constant 1 : i32
    %188 = tpu.dynamic_rotate %184 by %c1_i32_65 dim 0 : vector<128x32xf32>, i32 -> vector<128x32xf32>
    %189 = vector.broadcast %55 : vector<128x1xf32> to vector<128x32xf32>
    %190 = arith.mulf %188, %189 : vector<128x32xf32>
    %c127_i32_66 = arith.constant 127 : i32
    %191 = tpu.dynamic_rotate %184 by %c127_i32_66 dim 0 : vector<128x32xf32>, i32 -> vector<128x32xf32>
    %192 = vector.broadcast %57 : vector<128x1xf32> to vector<128x32xf32>
    %193 = arith.mulf %191, %192 : vector<128x32xf32>
    %194 = tpu.concatenate %190, %184, %193 in 1 : vector<128x32xf32>, vector<128x32xf32>, vector<128x32xf32> -> vector<128x96xf32>
    %195 = arith.truncf %194 : vector<128x96xf32> to vector<128x96xbf16>
    %cst_67 = arith.constant dense<0.000000e+00> : vector<128x32xf32>
    %196 = tpu.matmul %195, %186, %cst_67 {dimension_numbers = #tpu.dot_dimension_numbers<[1], [0], [0], [1], [0, 0, 1, 1], [], []>} : vector<128x96xbf16>, vector<96x32xbf16>, vector<128x32xf32> -> vector<128x32xf32>
    %197 = vector.broadcast %187 : vector<1x32xf32> to vector<128x32xf32>
    %198 = arith.addf %196, %197 : vector<128x32xf32>
    %cst_68 = arith.constant 0.000000e+00 : f32
    %199 = vector.broadcast %cst_68 : f32 to vector<128x32xf32>
    %200 = arith.cmpf ogt, %198, %199 : vector<128x32xf32>
    %cst_69 = arith.constant 2.000000e-01 : f32
    %201 = vector.broadcast %cst_69 : f32 to vector<128x32xf32>
    %202 = arith.mulf %201, %198 : vector<128x32xf32>
    %203 = arith.select %200, %198, %202 : vector<128x32xi1>, vector<128x32xf32>
    %204 = tpu.concatenate %165, %203 in 1 : vector<128x32xf32>, vector<128x32xf32> -> vector<128x64xf32>
    %205 = arith.truncf %204 : vector<128x64xf32> to vector<128x64xbf16>
    %cst_70 = arith.constant dense<0.000000e+00> : vector<8x64xf32>
    %206 = tpu.matmul %60, %205, %cst_70 {dimension_numbers = #tpu.dot_dimension_numbers<[1], [0], [0], [1], [0, 0, 1, 1], [], []>} : vector<8x128xbf16>, vector<128x64xbf16>, vector<8x64xf32> -> vector<8x64xf32>
    %c0_71 = arith.constant 0 : index
    %c0_72 = arith.constant 0 : index
    %c0_73 = arith.constant 0 : index
    %207 = vector.load %arg8[%c0_71, %c0_72, %c0_73] : memref<3x64x64xbf16, #tpu.memory_space<vmem>>, vector<3x64x64xbf16>
    %c0_74 = arith.constant 0 : index
    %c0_75 = arith.constant 0 : index
    %208 = vector.load %arg9[%c0_74, %c0_75] : memref<3x64xf32, #tpu.memory_space<vmem>>, vector<3x64xf32>
    %209 = arith.truncf %206 : vector<8x64xf32> to vector<8x64xbf16>
    %210 = vector.extract_strided_slice %207 {offsets = [0, 0, 0], sizes = [1, 64, 64], strides = [1, 1, 1]} : vector<3x64x64xbf16> to vector<1x64x64xbf16>
    %211 = vector.shape_cast %210 : vector<1x64x64xbf16> to vector<64x64xbf16>
    %cst_76 = arith.constant dense<0.000000e+00> : vector<8x64xf32>
    %212 = tpu.matmul %209, %211, %cst_76 {dimension_numbers = #tpu.dot_dimension_numbers<[1], [0], [0], [1], [0, 0, 1, 1], [], []>} : vector<8x64xbf16>, vector<64x64xbf16>, vector<8x64xf32> -> vector<8x64xf32>
    %213 = vector.extract_strided_slice %208 {offsets = [0, 0], sizes = [1, 64], strides = [1, 1]} : vector<3x64xf32> to vector<1x64xf32>
    %214 = vector.broadcast %213 : vector<1x64xf32> to vector<8x64xf32>
    %215 = arith.addf %212, %214 : vector<8x64xf32>
    %cst_77 = arith.constant 0.000000e+00 : f32
    %216 = vector.broadcast %cst_77 : f32 to vector<8x64xf32>
    %217 = arith.cmpf ogt, %215, %216 : vector<8x64xf32>
    %cst_78 = arith.constant 2.000000e-01 : f32
    %218 = vector.broadcast %cst_78 : f32 to vector<8x64xf32>
    %219 = arith.mulf %218, %215 : vector<8x64xf32>
    %220 = arith.select %217, %215, %219 : vector<8x64xi1>, vector<8x64xf32>
    %221 = arith.truncf %220 : vector<8x64xf32> to vector<8x64xbf16>
    %222 = vector.extract_strided_slice %207 {offsets = [1, 0, 0], sizes = [1, 64, 64], strides = [1, 1, 1]} : vector<3x64x64xbf16> to vector<1x64x64xbf16>
    %223 = vector.shape_cast %222 : vector<1x64x64xbf16> to vector<64x64xbf16>
    %cst_79 = arith.constant dense<0.000000e+00> : vector<8x64xf32>
    %224 = tpu.matmul %221, %223, %cst_79 {dimension_numbers = #tpu.dot_dimension_numbers<[1], [0], [0], [1], [0, 0, 1, 1], [], []>} : vector<8x64xbf16>, vector<64x64xbf16>, vector<8x64xf32> -> vector<8x64xf32>
    %225 = vector.extract_strided_slice %208 {offsets = [1, 0], sizes = [1, 64], strides = [1, 1]} : vector<3x64xf32> to vector<1x64xf32>
    %226 = vector.broadcast %225 : vector<1x64xf32> to vector<8x64xf32>
    %227 = arith.addf %224, %226 : vector<8x64xf32>
    %cst_80 = arith.constant 0.000000e+00 : f32
    %228 = vector.broadcast %cst_80 : f32 to vector<8x64xf32>
    %229 = arith.cmpf ogt, %227, %228 : vector<8x64xf32>
    %cst_81 = arith.constant 2.000000e-01 : f32
    %230 = vector.broadcast %cst_81 : f32 to vector<8x64xf32>
    %231 = arith.mulf %230, %227 : vector<8x64xf32>
    %232 = arith.select %229, %227, %231 : vector<8x64xi1>, vector<8x64xf32>
    %233 = arith.truncf %232 : vector<8x64xf32> to vector<8x64xbf16>
    %234 = vector.extract_strided_slice %207 {offsets = [2, 0, 0], sizes = [1, 64, 64], strides = [1, 1, 1]} : vector<3x64x64xbf16> to vector<1x64x64xbf16>
    %235 = vector.shape_cast %234 : vector<1x64x64xbf16> to vector<64x64xbf16>
    %cst_82 = arith.constant dense<0.000000e+00> : vector<8x64xf32>
    %236 = tpu.matmul %233, %235, %cst_82 {dimension_numbers = #tpu.dot_dimension_numbers<[1], [0], [0], [1], [0, 0, 1, 1], [], []>} : vector<8x64xbf16>, vector<64x64xbf16>, vector<8x64xf32> -> vector<8x64xf32>
    %237 = vector.extract_strided_slice %208 {offsets = [2, 0], sizes = [1, 64], strides = [1, 1]} : vector<3x64xf32> to vector<1x64xf32>
    %238 = vector.broadcast %237 : vector<1x64xf32> to vector<8x64xf32>
    %239 = arith.addf %236, %238 : vector<8x64xf32>
    %240 = vector.extract_strided_slice %239 {offsets = [0, 0], sizes = [8, 1], strides = [1, 1]} : vector<8x64xf32> to vector<8x1xf32>
    %cst_83 = arith.constant 0.000000e+00 : f32
    %241 = vector.broadcast %cst_83 : f32 to vector<8x1xf32>
    %242 = arith.subf %241, %240 : vector<8x1xf32>
    %243 = math.exp %242 : vector<8x1xf32>
    %cst_84 = arith.constant 1.000000e+00 : f32
    %244 = vector.broadcast %cst_84 : f32 to vector<8x1xf32>
    %245 = arith.addf %244, %243 : vector<8x1xf32>
    %cst_85 = arith.constant 1.000000e+00 : f32
    %246 = vector.broadcast %cst_85 : f32 to vector<8x1xf32>
    %247 = arith.divf %246, %245 : vector<8x1xf32>
    %c0_86 = arith.constant 0 : index
    %c0_87 = arith.constant 0 : index
    %248 = vector.load %arg10[%c0_86, %c0_87] : memref<8x1xf32, #tpu.memory_space<vmem>>, vector<8x1xf32>
    tpu.vector_store %arg10[%c0_86, %c0_87], %247 {strides = array<i32>} : memref<8x1xf32, #tpu.memory_space<vmem>>, vector<8x1xf32>,
    return
  }
  func.func @transform_0(%arg0: i32) -> (i32, i32, i32) {
    %c0_i32 = arith.constant 0 : i32
    %c0_i32_0 = arith.constant 0 : i32
    %c0_i32_1 = arith.constant 0 : i32
    return %arg0, %c0_i32, %c0_i32_0 : i32, i32, i32
  }
  func.func @transform_1(%arg0: i32) -> (i32, i32) {
    %c0_i32 = arith.constant 0 : i32
    %c0_i32_0 = arith.constant 0 : i32
    %c0_i32_1 = arith.constant 0 : i32
    return %c0_i32, %c0_i32_0 : i32, i32
  }
  func.func @transform_2(%arg0: i32) -> (i32, i32) {
    %c0_i32 = arith.constant 0 : i32
    %c0_i32_0 = arith.constant 0 : i32
    %c0_i32_1 = arith.constant 0 : i32
    return %c0_i32, %c0_i32_0 : i32, i32
  }
  func.func @transform_3(%arg0: i32) -> (i32, i32) {
    %c0_i32 = arith.constant 0 : i32
    %c0_i32_0 = arith.constant 0 : i32
    %c0_i32_1 = arith.constant 0 : i32
    return %c0_i32, %c0_i32_0 : i32, i32
  }
  func.func @transform_4(%arg0: i32) -> (i32, i32) {
    %c0_i32 = arith.constant 0 : i32
    %c0_i32_0 = arith.constant 0 : i32
    %c0_i32_1 = arith.constant 0 : i32
    return %c0_i32, %c0_i32_0 : i32, i32
  }
  func.func @transform_5(%arg0: i32) -> (i32, i32, i32) {
    %c0_i32 = arith.constant 0 : i32
    %c0_i32_0 = arith.constant 0 : i32
    %c0_i32_1 = arith.constant 0 : i32
    %c0_i32_2 = arith.constant 0 : i32
    return %c0_i32, %c0_i32_0, %c0_i32_1 : i32, i32, i32
  }
  func.func @transform_6(%arg0: i32) -> (i32, i32) {
    %c0_i32 = arith.constant 0 : i32
    %c0_i32_0 = arith.constant 0 : i32
    %c0_i32_1 = arith.constant 0 : i32
    return %c0_i32, %c0_i32_0 : i32, i32
  }
  func.func @transform_7(%arg0: i32) -> (i32, i32, i32) {
    %c0_i32 = arith.constant 0 : i32
    %c0_i32_0 = arith.constant 0 : i32
    %c0_i32_1 = arith.constant 0 : i32
    %c0_i32_2 = arith.constant 0 : i32
    return %c0_i32, %c0_i32_0, %c0_i32_1 : i32, i32, i32
  }
  func.func @transform_8(%arg0: i32) -> (i32, i32) {
    %c0_i32 = arith.constant 0 : i32
    %c0_i32_0 = arith.constant 0 : i32
    %c0_i32_1 = arith.constant 0 : i32
    return %c0_i32, %c0_i32_0 : i32, i32
  }
  func.func @transform_9(%arg0: i32) -> (i32, i32) {
    %c0_i32 = arith.constant 0 : i32
    %c0_i32_0 = arith.constant 0 : i32
    return %arg0, %c0_i32 : i32, i32
  }
}

</mosaic_0001>

<bundles_post_ra>
// kernel: frequency_discriminator.1
= control target key start
LH: loop header
LB: loop body
LE: loop exit
PB: predicated region body
PF: predicated region fallthrough
CT: control target
= control target key end

     0   :  { %s4948_s30 = smov 0   ;;  %s7502_s0 = inlined_call_operand.vmem [shape: f32[16,16,5], index: 0, kind: input, shape index: {}]   ;;  %s7503_s1 = inlined_call_operand.vmem [shape: bf16[128,128], index: 1, kind: input, shape index: {}]   ;;  %s7504_s2 = inlined_call_operand.vmem [shape: bf16[5,96], index: 2, kind: input, shape index: {}]   ;;  %s7505_s3 = inlined_call_operand.vmem [shape: f32[128,96], index: 3, kind: input, shape index: {}]   ;;  %s7506_s4 = inlined_call_operand.vmem [shape: bf16[32,32], index: 4, kind: input, shape index: {}]   ;;  %s7507_s5 = inlined_call_operand.vmem [shape: bf16[4,96,32], index: 5, kind: input, shape index: {}]   ;;  %s7508_s6 = inlined_call_operand.vmem [shape: f32[5,32], index: 6, kind: input, shape index: {}]   ;;  %s7509_s7 = inlined_call_operand.vmem [shape: bf16[3,64,64], index: 7, kind: input, shape index: {}]   ;;  %s7510_s8 = inlined_call_operand.vmem [shape: f32[3,64], index: 8, kind: input, shape index: {}]   ;;  %s7511_s9 = inlined_call_operand.vmem [shape: f32[16,1], index: 9, kind: output, shape index: {}]  }
   0x1 LB: > { %s4954_s10 = sadd.s32 4294967295, %s4887_s30   ;;  %p4047_p0 = scmp.ge.s32.totalorder %s4887_s30, 1  ;;  %s4887_s30 = sphi %s4948_s30, %s19_s30  }
   0x2   : > { %p289_p1 = scmp.lt.s32.totalorder %s4887_s30, 3 }
   0x4   : > { %p290_p2 = pnand %p4047_p0, %p289_p1 }
   0x6   : > { %293 = sbr.rel (%p290_p2) target bundleno = 3071 (0xbff), region = 56 }
   0xb   : > { %v337_v0 = vlaneseq  ;;  %vm808_vm0 = vcmask 1041408   ;;  %vm809_vm1 = vcmask 1042432   ;;  %v4889_v5 = vmov 65535   ;;  %v766_v12 = vld [vmem:[%s7504_s2] sm:$0x7]  ;;  %s4048_s13 = sshll.u32 %s4954_s10, 3 }
   0xc   : > { %v810_v6 = vsel %vm808_vm0, 4294967295, %v4889_v5  ;;  %v7512_v13 = vmov 0.0   ;;  %vm462_vm9 = vcmask 1043456   ;;  %p326_p3 = scmp.lt.s32.totalorder %s4048_s13, 15  ;;  %vm437_vm12 = vcmask 64512   ;;  %v773_v54 = vld [vmem:[%s7505_s3 + $0x30] sm:$0xff] }
   0xd   : > { %v4958_v1 = vshrl.u32 %v337_v0, 7  ;;  %v340_v2 = vand.u32 127, %v337_v0  ;;  %v811_v11 = vsel %vm809_vm1, %v810_v6, 0  ;;  %vm783_vm13 = vcmask 39936   ;;  %v774_v55 = vld [vmem:[%s7505_s3 + $0x38] sm:$0xff]  ;;  %v772_v60 = vld [vmem:[%s7505_s3 + $0x28] sm:$0xff] }
   0xe   : > { %v813_v17 = vand.u32 %v811_v11, %v766_v12  ;;  %s7757_s13 = smov (!%p326_p3, %s4048_s13), 15  ;;  %s4891_s24 = smov 96   ;;  %v771_v61 = vld [vmem:[%s7505_s3 + $0x20] sm:$0xff]  ;;  %v776_v5 = vld [vmem:[%s7505_s3 + $0x48] sm:$0xff]  ;;  %vm901_vm14 = vcmask 130048  }
   0xf   : > { %v341_v3 = vmul.u32 16, %v4958_v1  ;;  %v4961_v4 = vmul.u32 16, %v340_v2  ;;  %v4964_v7 = vadd.s32 64, %v4958_v1  ;;  %v4967_v8 = vadd.s32 72, %v4958_v1  ;;  %s4321_s14 = sshll.u32 %s7757_s13, 4  ;;  %s4893_s21 = smov 112  }
  0x10   : > { %s4995_s17 = scalar_lea.vmem %s7502_s0, %s4321_s14  ;;  %s4892_s14 = smov 80  }
  0x11   : > { %7592 = vst [vmem:[#allocation2_spill] sm:$0xff] %v4964_v7  ;;  %vm342_vm2 = vcmp.ge.s32.totalorder %v340_v2, %v341_v3  ;;  %v343_v9 = vadd.s32 16, %v341_v3  ;;  %v4970_v10 = vadd.s32 16, %v4961_v4  ;;  %vm371_vm3 = vcmp.ge.s32.totalorder %v4964_v7, %v4961_v4  ;;  %v742_v21 = vld [vmem:[%s4995_s17] sm:$0xff]  ;;  %v743_v22 = vld [vmem:[%s4995_s17 + $0x8] sm:$0xff]  ;;  %v744_v24 = vld [vmem:[%s4995_s17 + $0x10] sm:$0xff] }
  0x12   : > { %vm372_vm5 = vcmp.ge.s32.totalorder %v4967_v8, %v4961_v4  ;;  %v758_v23 = vpack.c.bf16 %v743_v22, %v742_v21  ;;  %v745_v25 = vld [vmem:[%s4995_s17 + $0x18] sm:$0xff]  ;;  %v746_v27 = vld [vmem:[%s4995_s17 + $0x20] sm:$0xff]  ;;  %v747_v28 = vld [vmem:[%s4995_s17 + $0x28] sm:$0xff]  ;;  %s4894_s27 = smov 64   ;;  %vm363_vm15 = vcmp.ge.s32.totalorder %v4958_v1, %v4961_v4  ;;  %s4897_s23 = smov 32  }
  0x13   : > { %vm344_vm4 = vcmp.lt.s32.totalorder %v340_v2, %v343_v9  ;;  %vm388_vm6 = vcmp.lt.s32.totalorder %v4964_v7, %v4970_v10  ;;  %vm389_vm7 = vcmp.lt.s32.totalorder %v4967_v8, %v4970_v10  ;;  %v759_v26 = vpack.c.bf16 %v745_v25, %v744_v24  ;;  %v748_v30 = vld [vmem:[%s4995_s17 + $0x30] sm:$0xff]  ;;  %v749_v31 = vld [vmem:[%s4995_s17 + $0x38] sm:$0xff]  ;;  %v750_v33 = vld [vmem:[%s4995_s17 + $0x40] sm:$0xff]  ;;  %p332_p4 = scmp.lt.s32.totalorder %s4954_s10, 1 }
  0x14   : > { %vm345_vm8 = vmand %vm342_vm2, %vm344_vm4  ;;  %v760_v29 = vpack.c.bf16 %v747_v28, %v746_v27  ;;  %v761_v32 = vpack.c.bf16 %v749_v31, %v748_v30  ;;  %v751_v34 = vld [vmem:[%s4995_s17 + $0x48] sm:$0xff]  ;;  %v752_v36 = vld [vmem:[%s4995_s17 + $0x50] sm:$0xff]  ;;  %vm380_vm1 = vcmp.lt.s32.totalorder %v4958_v1, %v4970_v10 }
  0x15   : > { %v4985_v14 = vsel %vm345_vm8, 1.0, %v7512_v13  ;;  %vm404_vm10 = vmand %vm371_vm3, %vm388_vm6  ;;  %v762_v35 = vpack.c.bf16 %v751_v34, %v750_v33  ;;  %v753_v37 = vld [vmem:[%s4995_s17 + $0x58] sm:$0xff]  ;;  %v754_v39 = vld [vmem:[%s4995_s17 + $0x60] sm:$0xff]  ;;  %s7759_s10 = smov (!%p332_p4, %s4954_s10), 1 }
  0x16   : > { %7593 = vst [vmem:[#allocation3_spill] sm:$0xff] %v4985_v14  ;;  %v436_v15 = vpack.c.bf16 %v4985_v14, %v4985_v14  ;;  %vm405_vm11 = vmand %vm372_vm5, %vm389_vm7  ;;  %v420_v16 = vsel %vm404_vm10, 1.0, %v7512_v13  ;;  %v763_v38 = vpack.c.bf16 %v753_v37, %v752_v36  ;;  %v755_v40 = vld [vmem:[%s4995_s17 + $0x68] sm:$0xff]  ;;  %v756_v42 = vld [vmem:[%s4995_s17 + $0x70] sm:$0xff]  ;;  %s4051_s12 = sshll.u32 %s7759_s10, 3 }
  0x17   : > { %v421_v18 = vsel %vm405_vm11, 1.0, %v7512_v13  ;;  %v764_v41 = vpack.c.bf16 %v755_v40, %v754_v39  ;;  %v757_v43 = vld [vmem:[%s4995_s17 + $0x78] sm:$0xff]  ;;  %v775_v3 = vld [vmem:[%s7505_s3 + $0x40] sm:$0xff]  ;;  %v777_v21 = vld [vmem:[%s7505_s3 + $0x50] sm:$0xff]  ;;  %s335_s16 = scalar_lea.vmem %s7511_s9, %s4051_s12 }
  0x18   : > { %v464_v19 = vsel %vm462_vm9, %v436_v15, 0  ;;  %v432_v20 = vpack.c.bf16 %v421_v18, %v420_v16  ;;  %v765_v44 = vpack.c.bf16 %v757_v43, %v756_v42  ;;  %v770_v15 = vld [vmem:[%s7505_s3 + $0x18] sm:$0xff]  ;;  %v769_v16 = vld [vmem:[%s7505_s3 + $0x10] sm:$0xff]  ;;  %v768_v28 = vld [vmem:[%s7505_s3 + $0x8] sm:$0xff] }
  0x19   : > { %4368 = vmatpush.bf16.msra.mxu1 %v464_v19  ;;  %4369 = vmatpush.bf16.msra.mxu3 %v464_v19  ;;  %v778_v22 = vld [vmem:[%s7505_s3 + $0x58] sm:$0xff]  ;;  %v779_v42 = vld [vmem:[%s7505_s3 + $0x60] sm:$0xff]  ;;  %vm396_vm3 = vmand %vm363_vm15, %vm380_vm1 }
  0x1a   : > { %473 = vmatpush.bf16.msra.mxu0 %v464_v19  ;;  %v782_v36 = vld [vmem:[%s7505_s3 + $0x78] sm:$0xff] }
  0x1c   : > { %4056 = vmatmul.msk.bf16.vlgmr.msra.gmra.mxu1 %vm437_vm12, %v432_v20 }
  0x1d   : > { %822 = vmatpush.bf16.msrb.mxu1 %v813_v17 }
  0x2c   : > { %4060 = vmatmul.msk.bf16.vlgmr.msrb.gmra.mxu1 %vm783_vm13, %v758_v23 }
  0x3c   : > { %4061 = vmatmul.msk.bf16.gmra.mxu1 %vm783_vm13, %v759_v26 }
  0x4c   : > { %4062 = vmatmul.msk.bf16.gmra.mxu1 %vm783_vm13, %v760_v29  ;;  %v767_v29 = vld [vmem:[%s7505_s3] sm:$0xff] }
  0x5c   : > { %4063 = vmatmul.msk.bf16.gmra.mxu1 %vm783_vm13, %v761_v32 }
  0x6c   : > { %4064 = vmatmul.msk.bf16.gmra.mxu1 %vm783_vm13, %v762_v35  ;;  %v781_v35 = vld [vmem:[%s7505_s3 + $0x70] sm:$0xff] }
  0x7c   : > { %4065 = vmatmul.msk.bf16.gmra.mxu1 %vm783_vm13, %v763_v38 }
  0x8c   : > { %4066 = vmatmul.msk.bf16.gmra.mxu1 %vm783_vm13, %v764_v41  ;;  %v780_v41 = vld [vmem:[%s7505_s3 + $0x68] sm:$0xff] }
  0x99   : > { %v5020_v45 = vpop.f32.mrf.mxu1 }
  0x9c   : > { %4067 = vmatmul.msk.bf16.gmra.mxu1 %vm783_vm13, %v765_v44 }
  0xa1   : > { %v5023_v46 = vpop.f32.mrf.mxu1 }
  0xa9   : > { %v824_v47 = vpop.f32.mrf.mxu1 }
  0xaa   : > { %v825_v32 = vadd.f32 %v824_v47, %v767_v29  ;;  %v412_v29 = vsel %vm396_vm3, 1.0, %v7512_v13 }
  0xb1   : > { %v826_v48 = vpop.f32.mrf.mxu1 }
  0xb2   : > { %v827_v30 = vadd.f32 %v826_v48, %v768_v28  ;;  %v5188_v28 = vadd.s32 8, %v4958_v1 }
  0xb4   : > { %v5087_v33 = vpack.c.bf16 %v827_v30, %v825_v32  ;;  %vm364_vm0 = vcmp.ge.s32.totalorder %v5188_v28, %v4961_v4  ;;  %vm381_vm2 = vcmp.lt.s32.totalorder %v5188_v28, %v4970_v10 }
  0xb5   : > { %vm397_vm4 = vmand %vm364_vm0, %vm381_vm2 }
  0xb6   : > { %v413_v30 = vsel %vm397_vm4, 1.0, %v7512_v13 }
  0xb9   : > { %v829_v49 = vpop.f32.mrf.mxu1 }
  0xba   : > { %v830_v19 = vadd.f32 %v829_v49, %v769_v16 }
  0xc1   : > { %v831_v50 = vpop.f32.mrf.mxu1 }
  0xc2   : > { %v832_v17 = vadd.f32 %v831_v50, %v770_v15 }
  0xc4   : > { %v5061_v20 = vpack.c.bf16 %v832_v17, %v830_v19 }
  0xc9   : > { %v834_v51 = vpop.f32.mrf.mxu1 }
  0xca   : > { %v835_v0 = vadd.f32 %v834_v51, %v771_v61 }
  0xd1   : > { %v836_v52 = vpop.f32.mrf.mxu1 }
  0xd2   : > { %v837_v62 = vadd.f32 %v836_v52, %v772_v60 }
  0xd4   : > { %v5041_v2 = vpack.c.bf16 %v837_v62, %v835_v0 }
  0xd9   : > { %v839_v53 = vpop.f32.mrf.mxu1 }
  0xda   : > { %v840_v57 = vadd.f32 %v839_v53, %v773_v54 }
  0xe1   : > { %v841_v56 = vpop.f32.mrf.mxu1 }
  0xe2   : > { %v842_v58 = vadd.f32 %v841_v56, %v774_v55 }
  0xe4   : > { %v5031_v59 = vpack.c.bf16 %v842_v58, %v840_v57 }
  0xe6   : > { %891 = vrot.lane.b32.xlu2 %v5031_v59, %s4891_s24 }
  0xe9   : > { %v844_v63 = vpop.f32.mrf.mxu1 }
  0xea   : > { %v845_v9 = vadd.f32 %v844_v63, %v775_v3 }
  0xee   : > { %889 = vrot.lane.b32.xlu2 %v5041_v2, %s4891_s24 }
  0xf1   : > { %v846_v6 = vpop.f32.mrf.mxu1 }
  0xf2   : > { %v847_v11 = vadd.f32 %v846_v6, %v776_v5 }
  0xf4   : > { %v5051_v12 = vpack.c.bf16 %v847_v11, %v845_v9 }
  0xf6   : > { %1384 = vrot.lane.b32.xlu2 %v5051_v12, %s4892_s14 }
  0xf9   : > { %v849_v18 = vpop.f32.mrf.mxu1 }
  0xfa   : > { %v850_v24 = vadd.f32 %v849_v18, %v777_v21 }
  0xfe   : > { %1378 = vrot.lane.b32.xlu2 %v5061_v20, %s4892_s14 }
 0x101   : > { %v851_v23 = vpop.f32.mrf.mxu1 }
 0x102   : > { %v852_v25 = vadd.f32 %v851_v23, %v778_v22 }
 0x104   : > { %v5071_v26 = vpack.c.bf16 %v852_v25, %v850_v24 }
 0x106   : > { %895 = vrot.lane.b32.xlu1 %v5071_v26, %s4891_s24  ;;  %1362 = vrot.lane.b32.xlu2 %v5061_v20, %s4893_s21 }
 0x109   : > { %v854_v27 = vpop.f32.mrf.mxu1 }
 0x10a   : > { %v855_v44 = vadd.f32 %v854_v27, %v779_v42 }
 0x10e   : > { %893 = vrot.lane.b32.xlu1 %v5051_v12, %s4891_s24  ;;  %1370 = vrot.lane.b32.xlu2 %v5071_v26, %s4893_s21 }
 0x111   : > { %v856_v31 = vpop.f32.mrf.mxu1 }
 0x112   : > { %v857_v43 = vadd.f32 %v856_v31, %v780_v41  ;;  %v428_v31 = vpack.c.bf16 %v413_v30, %v412_v29 }
 0x114   : > { %v5117_v47 = vpack.c.bf16 %v857_v43, %v855_v44  ;;  %4052 = vmatmul.msk.bf16.vlgmr.msra.gmra.mxu0 %vm437_vm12, %v428_v31  ;;  %v5214_v43 = vadd.s32 16, %v4958_v1  ;;  %v5217_v44 = vadd.s32 24, %v4958_v1  ;;  %v5324_v31 = vadd.s32 112, %v4958_v1 }
 0x116   : > { %1193 = vrot.lane.b32.xlu2 %v5071_v26, %s4894_s27  ;;  %885 = vrot.lane.b32.xlu1 %v5087_v33, %s4891_s24  ;;  %7596 = vst [vmem:[#allocation6_spill] sm:$0xff] %v5217_v44  ;;  %vm365_vm10 = vcmp.ge.s32.totalorder %v5214_v43, %v4961_v4  ;;  %vm366_vm11 = vcmp.ge.s32.totalorder %v5217_v44, %v4961_v4 }
 0x117   : > { %vm382_vm13 = vcmp.lt.s32.totalorder %v5214_v43, %v4970_v10  ;;  %vm383_vm0 = vcmp.lt.s32.totalorder %v5217_v44, %v4970_v10  ;;  %7599 = vst [vmem:[#allocation9_spill] sm:$0xff] %v5324_v31 }
 0x118   : > { %vm398_vm1 = vmand %vm365_vm10, %vm382_vm13 }
 0x119   : > { %v859_v34 = vpop.f32.mrf.mxu1  ;;  %vm399_vm2 = vmand %vm366_vm11, %vm383_vm0 }
 0x11a   : > { %v860_v38 = vadd.f32 %v859_v34, %v781_v35 }
 0x11e   : > { %1191 = vrot.lane.b32.xlu2 %v5051_v12, %s4894_s27  ;;  %1386 = vrot.lane.b32.xlu1 %v5071_v26, %s4892_s14 }
 0x121   : > { %v861_v37 = vpop.f32.mrf.mxu1 }
 0x122   : > { %v862_v39 = vadd.f32 %v861_v37, %v782_v36  ;;  %v5204_v37 = vadd.s32 80, %v4958_v1 }
 0x124   : > { %v5103_v40 = vpack.c.bf16 %v862_v39, %v860_v38  ;;  %7594 = vst [vmem:[#allocation4_spill] sm:$0xff] %v5204_v37  ;;  %v5207_v38 = vadd.s32 88, %v4958_v1  ;;  %vm373_vm5 = vcmp.ge.s32.totalorder %v5204_v37, %v4961_v4  ;;  %vm390_vm7 = vcmp.lt.s32.totalorder %v5204_v37, %v4970_v10 }
 0x125   : > { %vm406_vm9 = vmand %vm373_vm5, %vm390_vm7 }
 0x126   : > { %899 = vrot.lane.b32.xlu0 %v5103_v40, %s4891_s24  ;;  %1187 = vrot.lane.b32.xlu2 %v5041_v2, %s4894_s27  ;;  %7595 = vst [vmem:[#allocation5_spill] sm:$0xff] %v5207_v38  ;;  %vm374_vm6 = vcmp.ge.s32.totalorder %v5207_v38, %v4961_v4  ;;  %vm391_vm8 = vcmp.lt.s32.totalorder %v5207_v38, %v4970_v10 }
 0x127   : > { %1380 = vrot.lane.b32.xlu1 %v5041_v2, %s4892_s14  ;;  %vm407_vm15 = vmand %vm374_vm6, %vm391_vm8 }
 0x12e   : > { %897 = vrot.lane.b32.xlu0 %v5117_v47, %s4891_s24  ;;  %1390 = vrot.lane.b32.xlu2 %v5103_v40, %s4892_s14 }
 0x12f   : > { %1360 = vrot.lane.b32.xlu1 %v5087_v33, %s4893_s21 }
 0x136   : > { %1374 = vrot.lane.b32.xlu2 %v5103_v40, %s4893_s21  ;;  %887 = vrot.lane.b32.xlu0 %v5061_v20, %s4891_s24  ;;  %s4895_s24 = smov 48  }
 0x137   : > { %1366 = vrot.lane.b32.xlu1 %v5031_v59, %s4893_s21 }
 0x13e   : > { %1388 = vrot.lane.b32.xlu0 %v5117_v47, %s4892_s14 }
 0x13f   : > { %1368 = vrot.lane.b32.xlu1 %v5051_v12, %s4893_s21 }
 0x140   : > { %v892_v48 = vpop.permute.xlu2 %891 }
 0x141   : > { %v936_v25 = vsel %vm901_vm14, %v892_v48, 0 }
 0x146   : > { %1382 = vrot.lane.b32.xlu0 %v5031_v59, %s4892_s14 }
 0x147   : > { %1372 = vrot.lane.b32.xlu1 %v5117_v47, %s4893_s21 }
 0x148   : > { %v890_v49 = vpop.permute.xlu2 %889 }
 0x149   : > { %v933_v35 = vsel %vm901_vm14, %v890_v49, 0  ;;  %v422_v49 = vsel %vm406_vm9, 1.0, %v7512_v13 }
 0x14e   : > { %1376 = vrot.lane.b32.xlu0 %v5087_v33, %s4892_s14 }
 0x14f   : > { %1189 = vrot.lane.b32.xlu1 %v5031_v59, %s4894_s27 }
 0x150   : > { %v1385_v50 = vpop.permute.xlu2 %1384 }
 0x151   : > { %v1429_v36 = vsel %vm901_vm14, %v1385_v50, 0  ;;  %v423_v50 = vsel %vm407_vm15, 1.0, %v7512_v13 }
 0x156   : > { %1364 = vrot.lane.b32.xlu0 %v5041_v2, %s4893_s21 }
 0x157   : > { %1183 = vrot.lane.b32.xlu1 %v5087_v33, %s4894_s27 }
 0x158   : > { %v5147_v51 = vpop.permute.xlu2 %1378 }
 0x15e   : > { %1195 = vrot.lane.b32.xlu0 %v5117_v47, %s4894_s27 }
 0x15f   : > { %1197 = vrot.lane.b32.xlu1 %v5103_v40, %s4894_s27 }
 0x160   : > { %v5153_v52 = vpop.permute.xlu2 %1362 }
 0x166   : > { %1185 = vrot.lane.b32.xlu0 %v5061_v20, %s4894_s27 }
 0x168   : > { %v5157_v53 = vpop.permute.xlu2 %1370 }
 0x16e   : > { %1687 = vrot.lane.b32.xlu0 %v5103_v40, %s4895_s24 }
 0x170   : > { %v5161_v54 = vpop.permute.xlu2 %1193 }
 0x178   : > { %v896_v55 = vpop.permute.xlu1 %895  ;;  %v5163_v56 = vpop.permute.xlu2 %1191 }
 0x179   : > { %v942_v17 = vsel %vm901_vm14, %v896_v55, 0  ;;  %v433_v55 = vpack.c.bf16 %v423_v50, %v422_v49  ;;  %v4896_v50 = vmov -1e+30  }
 0x17b   : > { %4057 = vmatmul.msk.bf16.vlgmr.msra.gmra.mxu3 %vm437_vm12, %v433_v55 }
 0x180   : > { %v894_v57 = vpop.permute.xlu1 %893  ;;  %v5165_v58 = vpop.permute.xlu2 %1187 }
 0x181   : > { %v939_v21 = vsel %vm901_vm14, %v894_v57, 0  ;;  %v414_v57 = vsel %vm398_vm1, 1.0, %v7512_v13 }
 0x188   : > { %v1391_v60 = vpop.permute.xlu2 %1390  ;;  %v5167_v61 = vpop.permute.xlu1 %885 }
 0x189   : > { %v1438_v62 = vsel %vm901_vm14, %v1391_v60, 0  ;;  %v415_v60 = vsel %vm399_vm2, 1.0, %v7512_v13 }
 0x18a   : > { %1440 = vmatpush.bf16.xpose.msra.mxu1 %v1438_v62  ;;  %v429_v62 = vpack.c.bf16 %v415_v60, %v414_v57 }
 0x18c   : > { %4053 = vmatmul.msk.bf16.gmra.mxu0 %vm437_vm12, %v429_v62 }
 0x190   : > { %v1387_v63 = vpop.permute.xlu1 %1386 }
 0x191   : > { %v1432_v27 = vsel %vm901_vm14, %v1387_v63, 0 }
 0x198   : > { %v900_v0 = vpop.permute.xlu0 %899 }
 0x199   : > { %v5170_v3 = vpop.permute.xlu1 %1380  ;;  %v948_v5 = vsel %vm901_vm14, %v900_v0, 0  ;;  %v927_v0 = vsel %vm901_vm14, %v5167_v61, 0  ;;  %v1420_v61 = vsel %vm901_vm14, %v5147_v51, 0 }
 0x19a   : > { %950 = vmatpush.bf16.xpose.msra.mxu2 %v948_v5  ;;  %v1423_v5 = vsel %vm901_vm14, %v5170_v3, 0 }
 0x1a0   : > { %v898_v6 = vpop.permute.xlu0 %897 }
 0x1a1   : > { %v5173_v9 = vpop.permute.xlu1 %1360  ;;  %v945_v11 = vsel %vm901_vm14, %v898_v6, 0 }
 0x1a2   : > { %951 = vmatpush.bf16.xpose.msra.mxu2 %v945_v11  ;;  %v5250_v11 = vadd.s32 32, %v4958_v1 }
 0x1a4   : > { %vm367_vm3 = vcmp.ge.s32.totalorder %v5250_v11, %v4961_v4  ;;  %vm384_vm5 = vcmp.lt.s32.totalorder %v5250_v11, %v4970_v10 }
 0x1a5   : > { %vm400_vm7 = vmand %vm367_vm3, %vm384_vm5 }
 0x1a8   : > { %v888_v15 = vpop.permute.xlu0 %887 }
 0x1a9   : > { %v5176_v16 = vpop.permute.xlu1 %1366  ;;  %v930_v41 = vsel %vm901_vm14, %v888_v15, 0  ;;  %v5253_v15 = vadd.s32 40, %v4958_v1 }
 0x1aa   : > { %952 = vmatpush.bf16.xpose.msra.mxu2 %v942_v17 }
 0x1ab   : > { %vm368_vm4 = vcmp.ge.s32.totalorder %v5253_v15, %v4961_v4  ;;  %vm385_vm6 = vcmp.lt.s32.totalorder %v5253_v15, %v4970_v10 }
 0x1ac   : > { %vm401_vm8 = vmand %vm368_vm4, %vm385_vm6 }
 0x1ad   : > { %v417_v51 = vsel %vm401_vm8, 1.0, %v7512_v13 }
 0x1b0   : > { %v1389_v18 = vpop.permute.xlu0 %1388 }
 0x1b1   : > { %v5179_v19 = vpop.permute.xlu1 %1368  ;;  %v1435_v22 = vsel %vm901_vm14, %v1389_v18, 0 }
 0x1b2   : > { %953 = vmatpush.bf16.xpose.msra.mxu2 %v939_v21  ;;  %1441 = vmatpush.bf16.xpose.msra.mxu1 %v1435_v22  ;;  %v5275_v21 = vadd.s32 48, %v4958_v1 }
 0x1b4   : > { %vm369_vm9 = vcmp.ge.s32.totalorder %v5275_v21, %v4961_v4  ;;  %vm386_vm11 = vcmp.lt.s32.totalorder %v5275_v21, %v4970_v10 }
 0x1b5   : > { %vm402_vm15 = vmand %vm369_vm9, %vm386_vm11  ;;  %vm394_vm9 = vcmp.lt.s32.totalorder %v5324_v31, %v4970_v10 }
 0x1b8   : > { %v1383_v23 = vpop.permute.xlu0 %1382 }
 0x1b9   : > { %v5183_v24 = vpop.permute.xlu1 %1372  ;;  %v1426_v42 = vsel %vm901_vm14, %v1383_v23, 0 }
 0x1ba   : > { %954 = vmatpush.bf16.xpose.msra.mxu2 %v936_v25  ;;  %1442 = vmatpush.bf16.xpose.msra.mxu1 %v1432_v27  ;;  %v5303_v25 = vadd.s32 96, %v4958_v1  ;;  %v5306_v27 = vadd.s32 104, %v4958_v1 }
 0x1bc   : > { %7597 = vst [vmem:[#allocation7_spill] sm:$0xff] %v5303_v25  ;;  %vm375_vm1 = vcmp.ge.s32.totalorder %v5303_v25, %v4961_v4  ;;  %vm376_vm2 = vcmp.ge.s32.totalorder %v5306_v27, %v4961_v4  ;;  %vm392_vm3 = vcmp.lt.s32.totalorder %v5303_v25, %v4970_v10  ;;  %vm393_vm4 = vcmp.lt.s32.totalorder %v5306_v27, %v4970_v10 }
 0x1bd   : > { %7598 = vst [vmem:[#allocation8_spill] sm:$0xff] %v5306_v27  ;;  %vm408_vm5 = vmand %vm375_vm1, %vm392_vm3 }
 0x1be   : > { %vm409_vm6 = vmand %vm376_vm2, %vm393_vm4 }
 0x1bf   : > { %v425_v29 = vsel %vm409_vm6, 1.0, %v7512_v13 }
 0x1c0   : > { %v1377_v32 = vpop.permute.xlu0 %1376 }
 0x1c1   : > { %v1190_v34 = vpop.permute.xlu1 %1189  ;;  %v1417_v17 = vsel %vm901_vm14, %v1377_v32, 0  ;;  %v5327_v32 = vadd.s32 120, %v4958_v1 }
 0x1c2   : > { %955 = vmatpush.bf16.xpose.msra.mxu2 %v933_v35  ;;  %1443 = vmatpush.bf16.xpose.msra.mxu1 %v1429_v36 }
 0x1c3   : > { %7600 = vst [vmem:[#allocation10_spill] sm:$0xff] %v5327_v32  ;;  %vm378_vm8 = vcmp.ge.s32.totalorder %v5327_v32, %v4961_v4 }
 0x1c8   : > { %v5225_v48 = vpop.permute.xlu0 %1364 }
 0x1c9   : > { %v5209_v39 = vpop.permute.xlu1 %1183 }
 0x1ca   : > { %956 = vmatpush.bf16.xpose.msra.mxu2 %v930_v41  ;;  %1444 = vmatpush.bf16.xpose.msra.mxu1 %v1426_v42 }
 0x1d0   : > { %v1196_v6 = vpop.permute.xlu0 %1195 }
 0x1d1   : > { %v1198_v63 = vpop.permute.xlu1 %1197 }
 0x1d2   : > { %1207 = vmatpush.bf16.msrb.mxu3 %v1198_v63  ;;  %957 = vmatpush.bf16.xpose.msra.mxu2 %v927_v0 }
 0x1d3   : > { %1445 = vmatpush.bf16.xpose.msra.mxu1 %v1423_v5 }
 0x1d6   : > { %1208 = vmatpush.bf16.msrb.mxu3 %v1196_v6 }
 0x1d8   : > { %v1186_v18 = vpop.permute.xlu0 %1185 }
 0x1d9   : > { %4068 = vmatmul.msk.bf16.vlgmr.msra.gmra.mxu2 %vm901_vm14, %v5087_v33 }
 0x1da   : > { %1209 = vmatpush.bf16.msrb.mxu3 %v5161_v54  ;;  %v416_v54 = vsel %vm400_vm7, 1.0, %v7512_v13  ;;  %vm377_vm7 = vcmp.ge.s32.totalorder %v5324_v31, %v4961_v4 }
 0x1db   : > { %1446 = vmatpush.bf16.xpose.msra.mxu1 %v1420_v61  ;;  %v430_v3 = vpack.c.bf16 %v417_v51, %v416_v54  ;;  %vm410_vm11 = vmand %vm377_vm7, %vm394_vm9  ;;  %vm523_vm7 = vcmp.gt.f32.partialorder %v5020_v45, 0.5 }
 0x1dd   : > { %4054 = vmatmul.msk.bf16.gmra.mxu0 %vm437_vm12, %v430_v3 }
 0x1de   : > { %1210 = vmatpush.bf16.msrb.mxu3 %v5163_v56  ;;  %v5278_v56 = vadd.s32 56, %v4958_v1 }
 0x1e0   : > { %vm370_vm10 = vcmp.ge.s32.totalorder %v5278_v56, %v4961_v4  ;;  %vm387_vm13 = vcmp.lt.s32.totalorder %v5278_v56, %v4970_v10  ;;  %v1688_v22 = vpop.permute.xlu0 %1687 }
 0x1e1   : > { %vm403_vm0 = vmand %vm370_vm10, %vm387_vm13  ;;  %vm395_vm10 = vcmp.lt.s32.totalorder %v5327_v32, %v4970_v10  ;;  %v475_v10 = vpop.f32.mrf.mxu0 }
 0x1e2   : > { %1211 = vmatpush.bf16.msrb.mxu3 %v1190_v34  ;;  %vm411_vm13 = vmand %vm378_vm8, %vm395_vm10  ;;  %vm524_vm8 = vcmp.gt.f32.partialorder %v5023_v46, 0.5 }
 0x1e3   : > { %1447 = vmatpush.bf16.xpose.msra.mxu1 %v1417_v17  ;;  %v427_v34 = vsel %vm411_vm13, 1.0, %v7512_v13 }
 0x1e6   : > { %1212 = vmatpush.bf16.msrb.mxu3 %v5165_v58  ;;  %v418_v58 = vsel %vm402_vm15, 1.0, %v7512_v13  ;;  %vm515_vm15 = vcmp.gt.f32.partialorder %v475_v10, 0.5 }
 0x1e9   : > { %4069 = vmatmul.msk.bf16.gmra.mxu2 %vm901_vm14, %v5061_v20  ;;  %v477_v36 = vpop.f32.mrf.mxu0 }
 0x1ea   : > { %1213 = vmatpush.bf16.msrb.mxu3 %v1186_v18  ;;  %4088 = vmatmul.msk.bf16.vlgmr.msra.gmra.mxu1 %vm901_vm14, %v5173_v9  ;;  %v419_v9 = vsel %vm403_vm0, 1.0, %v7512_v13  ;;  %vm516_vm1 = vcmp.gt.f32.partialorder %v477_v36, 0.5 }
 0x1eb   : > { %v431_v23 = vpack.c.bf16 %v419_v9, %v418_v58  ;;  %v532_v6 = vsel %vm516_vm1, 0.0, %v4896_v50 }
 0x1ed   : > { %4055 = vmatmul.msk.bf16.gmra.mxu0 %vm437_vm12, %v431_v23 }
 0x1ee   : > { %1214 = vmatpush.bf16.msrb.mxu3 %v5209_v39  ;;  %v1375_v39 = vpop.permute.xlu2 %1374 }
 0x1f2   : > { %1697 = vmatpush.bf16.msra.mxu3 %v1688_v22 }
 0x1f9   : > { %4070 = vmatmul.msk.bf16.gmra.mxu2 %vm901_vm14, %v5041_v2 }
 0x1fa   : > { %4089 = vmatmul.msk.bf16.gmra.mxu1 %vm901_vm14, %v5153_v52  ;;  %v424_v52 = vsel %vm408_vm5, 1.0, %v7512_v13 }
 0x1fb   : > { %v434_v30 = vpack.c.bf16 %v425_v29, %v424_v52 }
 0x1fd   : > { %4058 = vmatmul.msk.bf16.gmra.mxu3 %vm437_vm12, %v434_v30 }
 0x209   : > { %4071 = vmatmul.msk.bf16.gmra.mxu2 %vm901_vm14, %v5031_v59  ;;  %v480_v42 = vpop.f32.mrf.mxu0 }
 0x20a   : > { %4090 = vmatmul.msk.bf16.gmra.mxu1 %vm901_vm14, %v5225_v48  ;;  %vm517_vm0 = vcmp.gt.f32.partialorder %v480_v42, 0.5 }
 0x211   : > { %v482_v55 = vpop.f32.mrf.mxu0 }
 0x212   : > { %vm518_vm2 = vcmp.gt.f32.partialorder %v482_v55, 0.5 }
 0x213   : > { %v534_v22 = vsel %vm518_vm2, 0.0, %v4896_v50 }
 0x219   : > { %4072 = vmatmul.msk.bf16.gmra.mxu2 %vm901_vm14, %v5051_v12 }
 0x21a   : > { %4091 = vmatmul.msk.bf16.gmra.mxu1 %vm901_vm14, %v5176_v16  ;;  %v426_v16 = vsel %vm410_vm11, 1.0, %v7512_v13 }
 0x21b   : > { %v435_v35 = vpack.c.bf16 %v427_v34, %v426_v16 }
 0x21d   : > { %4059 = vmatmul.msk.bf16.gmra.mxu3 %vm437_vm12, %v435_v35 }
 0x229   : > { %4073 = vmatmul.msk.bf16.gmra.mxu2 %vm901_vm14, %v5071_v26 }
 0x22a   : > { %4092 = vmatmul.msk.bf16.gmra.mxu1 %vm901_vm14, %v5179_v19 }
 0x239   : > { %4074 = vmatmul.msk.bf16.gmra.mxu2 %vm901_vm14, %v5117_v47 }
 0x23a   : > { %4093 = vmatmul.msk.bf16.gmra.mxu1 %vm901_vm14, %v5157_v53  ;;  %v531_v53 = vsel %vm515_vm15, 0.0, %v4896_v50 }
 0x249   : > { %4075 = vmatmul.msk.bf16.gmra.mxu2 %vm901_vm14, %v5103_v40 }
 0x24a   : > { %4094 = vmatmul.msk.bf16.gmra.mxu1 %vm901_vm14, %v5183_v24  ;;  %v533_v24 = vsel %vm517_vm0, 0.0, %v4896_v50 }
 0x25a   : > { %4095 = vmatmul.msk.bf16.gmra.mxu1 %vm901_vm14, %v1375_v39  ;;  %v485_v51 = vpop.f32.mrf.mxu0 }
 0x25b   : > { %vm519_vm3 = vcmp.gt.f32.partialorder %v485_v51, 0.5 }
 0x25c   : > { %v959_v41 = vpop.f32.mrf.mxu2 }
 0x25d   : > { %v999_v62 = vmul.f32 0.25, %v959_v41  ;;  %v535_v41 = vsel %vm519_vm3, 0.0, %v4896_v50  ;;  %vm548_vm3 = vcmp.eq.s32.totalorder %v5188_v28, %v4961_v4 }
 0x25f   : > { %v5362_v61 = vadd.f32 %v999_v62, %v531_v53 }
 0x262   : > { %v487_v29 = vpop.f32.mrf.mxu0 }
 0x263   : > { %vm520_vm4 = vcmp.gt.f32.partialorder %v487_v29, 0.5 }
 0x264   : > { %v961_v19 = vpop.f32.mrf.mxu2 }
 0x265   : > { %v1000_v17 = vmul.f32 0.25, %v961_v19 }
 0x267   : > { %v1449_v48 = vpop.f32.mrf.mxu1  ;;  %v5371_v23 = vadd.f32 %v1000_v17, %v532_v6 }
 0x268   : > { %v1489_v49 = vmul.f32 0.25, %v1449_v48 }
 0x26a   : > { %v5354_v40 = vadd.f32 %v1489_v49, %v531_v53  ;;  %v490_v19 = vpop.f32.mrf.mxu0 }
 0x26b   : > { %vm521_vm5 = vcmp.gt.f32.partialorder %v490_v19, 0.5 }
 0x26c   : > { %1521 = vmax.xlane.f32.xlu2 %v5354_v40  ;;  %v964_v57 = vpop.f32.mrf.mxu2 }
 0x26d   : > { %v1001_v60 = vmul.f32 0.25, %v964_v57 }
 0x26f   : > { %v1451_v63 = vpop.f32.mrf.mxu1  ;;  %v5358_v0 = vadd.f32 %v1001_v60, %v533_v24  ;;  %v536_v60 = vsel %vm520_vm4, 0.0, %v4896_v50 }
 0x270   : > { %v1490_v5 = vmul.f32 0.25, %v1451_v63 }
 0x271   : > { %1035 = vmax.xlane.f32.xlu1 %v5358_v0 }
 0x272   : > { %v5364_v54 = vadd.f32 %v1490_v5, %v532_v6  ;;  %v492_v63 = vpop.f32.mrf.mxu0 }
 0x273   : > { %vm522_vm6 = vcmp.gt.f32.partialorder %v492_v63, 0.5 }
 0x274   : > { %1031 = vmax.xlane.f32.xlu2 %v5362_v61  ;;  %1523 = vmax.xlane.f32.xlu0 %v5364_v54  ;;  %v966_v3 = vpop.f32.mrf.mxu2 }
 0x275   : > { %v1002_v18 = vmul.f32 0.25, %v966_v3 }
 0x277   : > { %v1454_v58 = vpop.f32.mrf.mxu1  ;;  %v5369_v9 = vadd.f32 %v1002_v18, %v534_v22  ;;  %v5396_v18 = vsel %vm521_vm5, 0.0, %v4896_v50 }
 0x278   : > { %v1491_v30 = vmul.f32 0.25, %v1454_v58  ;;  %v5399_v58 = vsel %vm522_vm6, 0.0, %v4896_v50 }
 0x27a   : > { %v5375_v35 = vadd.f32 %v1491_v30, %v533_v24 }
 0x27c   : > { %1037 = vmax.xlane.f32.xlu2 %v5369_v9  ;;  %1033 = vmax.xlane.f32.xlu0 %v5371_v23  ;;  %v969_v52 = vpop.f32.mrf.mxu2 }
 0x27d   : > { %v1003_v39 = vmul.f32 0.25, %v969_v52 }
 0x27f   : > { %v1456_v16 = vpop.f32.mrf.mxu1  ;;  %v5382_v49 = vadd.f32 %v1003_v39, %v535_v41 }
 0x280   : > { %v1492_v34 = vmul.f32 0.25, %v1456_v16  ;;  %v500_v16 = vpop.f32.mrf.mxu3 }
 0x281   : > { %vm525_vm9 = vcmp.gt.f32.partialorder %v500_v16, 0.5 }
 0x282   : > { %v5377_v10 = vadd.f32 %v1492_v34, %v534_v22  ;;  %v5411_v34 = vsel %vm523_vm7, 0.0, %v4896_v50 }
 0x284   : > { %1525 = vmax.xlane.f32.xlu0 %v5375_v35  ;;  %1527 = vmax.xlane.f32.xlu1 %v5377_v10  ;;  %v971_v36 = vpop.f32.mrf.mxu2 }
 0x285   : > { %v1004_v24 = vmul.f32 0.25, %v971_v36 }
 0x287   : > { %v1459_v42 = vpop.f32.mrf.mxu1  ;;  %v5389_v5 = vadd.f32 %v1004_v24, %v536_v60 }
 0x288   : > { %v1493_v48 = vmul.f32 0.25, %v1459_v42  ;;  %v5419_v42 = vsel %vm524_vm8, 0.0, %v4896_v50  ;;  %v502_v45 = vpop.f32.mrf.mxu3  ;;  %vm549_vm8 = vcmp.eq.s32.totalorder %v5214_v43, %v4961_v4 }
 0x289   : > { %vm526_vm10 = vcmp.gt.f32.partialorder %v502_v45, 0.5 }
 0x28a   : > { %v5384_v53 = vadd.f32 %v1493_v48, %v535_v41  ;;  %v5426_v48 = vsel %vm525_vm9, 0.0, %v4896_v50  ;;  %v5433_v63 = vsel %vm526_vm10, 0.0, %v4896_v50 }
 0x28c   : > { %1039 = vmax.xlane.f32.xlu0 %v5382_v49  ;;  %1529 = vmax.xlane.f32.xlu1 %v5384_v53  ;;  %v974_v55 = vpop.f32.mrf.mxu2 }
 0x28d   : > { %v1005_v3 = vmul.f32 0.25, %v974_v55 }
 0x28f   : > { %v1461_v57 = vpop.f32.mrf.mxu1  ;;  %v5402_v22 = vadd.f32 %v1005_v3, %v5396_v18 }
 0x290   : > { %v1494_v62 = vmul.f32 0.25, %v1461_v57  ;;  %v505_v57 = vpop.f32.mrf.mxu3 }
 0x291   : > { %vm527_vm11 = vcmp.gt.f32.partialorder %v505_v57, 0.5 }
 0x292   : > { %v5391_v6 = vadd.f32 %v1494_v62, %v536_v60  ;;  %v5440_v3 = vsel %vm527_vm11, 0.0, %v4896_v50 }
 0x294   : > { %1041 = vmax.xlane.f32.xlu0 %v5389_v5  ;;  %1531 = vmax.xlane.f32.xlu2 %v5391_v6  ;;  %v976_v51 = vpop.f32.mrf.mxu2 }
 0x295   : > { %v1006_v17 = vmul.f32 0.25, %v976_v51 }
 0x297   : > { %v5405_v52 = vadd.f32 %v1006_v17, %v5399_v58 }
 0x298   : > { %v507_v17 = vpop.f32.mrf.mxu3 }
 0x299   : > { %vm528_vm13 = vcmp.gt.f32.partialorder %v507_v17, 0.5 }
 0x29c   : > { %1043 = vmax.xlane.f32.xlu0 %v5402_v22  ;;  %1045 = vmax.xlane.f32.xlu2 %v5405_v52  ;;  %v979_v29 = vpop.f32.mrf.mxu2 }
 0x29d   : > { %v1007_v30 = vmul.f32 0.25, %v979_v29 }
 0x29f   : > { %v5414_v36 = vadd.f32 %v1007_v30, %v5411_v34 }
 0x2a0   : > { %v510_v45 = vpop.f32.mrf.mxu3 }
 0x2a1   : > { %vm529_vm15 = vcmp.gt.f32.partialorder %v510_v45, 0.5 }
 0x2a2   : > { %v5454_v57 = vsel %vm529_vm15, 0.0, %v4896_v50 }
 0x2a4   : > { %1047 = vmax.xlane.f32.xlu0 %v5414_v36  ;;  %v981_v39 = vpop.f32.mrf.mxu2 }
 0x2a5   : > { %v1008_v41 = vmul.f32 0.25, %v981_v39 }
 0x2a7   : > { %v5422_v19 = vadd.f32 %v1008_v41, %v5419_v42 }
 0x2a8   : > { %v512_v17 = vpop.f32.mrf.mxu3 }
 0x2a9   : > { %1049 = vmax.xlane.f32.xlu2 %v5422_v19  ;;  %vm530_vm0 = vcmp.gt.f32.partialorder %v512_v17, 0.5 }
 0x2ac   : > { %v984_v55 = vpop.f32.mrf.mxu2 }
 0x2ad   : > { %v1009_v24 = vmul.f32 0.25, %v984_v55  ;;  %v5447_v55 = vsel %vm528_vm13, 0.0, %v4896_v50 }
 0x2af   : > { %v5429_v46 = vadd.f32 %v1009_v24, %v5426_v48 }
 0x2b1   : > { %1051 = vmax.xlane.f32.xlu2 %v5429_v46 }
 0x2b4   : > { %v986_v60 = vpop.f32.mrf.mxu2 }
 0x2b5   : > { %v1010_v62 = vmul.f32 0.25, %v986_v60 }
 0x2b7   : > { %v5436_v51 = vadd.f32 %v1010_v62, %v5433_v63 }
 0x2b9   : > { %1053 = vmax.xlane.f32.xlu0 %v5436_v51 }
 0x2bc   : > { %v989_v29 = vpop.f32.mrf.mxu2 }
 0x2bd   : > { %v1011_v30 = vmul.f32 0.25, %v989_v29 }
 0x2bf   : > { %v5443_v16 = vadd.f32 %v1011_v30, %v5440_v3 }
 0x2c1   : > { %1055 = vmax.xlane.f32.xlu0 %v5443_v16 }
 0x2c4   : > { %v991_v39 = vpop.f32.mrf.mxu2 }
 0x2c5   : > { %v1012_v41 = vmul.f32 0.25, %v991_v39 }
 0x2c7   : > { %v5450_v24 = vadd.f32 %v1012_v41, %v5447_v55  ;;  %v5461_v41 = vsel %vm530_vm0, 0.0, %v4896_v50  ;;  %vm551_vm0 = vcmp.eq.s32.totalorder %v5250_v11, %v4961_v4 }
 0x2c9   : > { %1057 = vmax.xlane.f32.xlu1 %v5450_v24 }
 0x2cc   : > { %v994_v60 = vpop.f32.mrf.mxu2 }
 0x2cd   : > { %v1013_v62 = vmul.f32 0.25, %v994_v60 }
 0x2cf   : > { %v5457_v29 = vadd.f32 %v1013_v62, %v5454_v57 }
 0x2d1   : > { %1059 = vmax.xlane.f32.xlu1 %v5457_v29 }
 0x2d4   : > { %v996_v30 = vpop.f32.mrf.mxu2 }
 0x2d5   : > { %v1014_v39 = vmul.f32 0.25, %v996_v30 }
 0x2d7   : > { %v5464_v45 = vadd.f32 %v1014_v39, %v5461_v41 }
 0x2d9   : > { %1061 = vmax.xlane.f32.xlu2 %v5464_v45 }
 0x2df   : > { %v5467_v13 = vpop.xlane.xlu2 %1521 }
 0x2e4   : > { %v1036_v32 = vpop.xlane.xlu1 %1035 }
 0x2e5   : > { %v1065_v17 = vsub.f32 %v5358_v0, %v1036_v32 }
 0x2e7   : > { %v1032_v60 = vpop.xlane.xlu2 %1031  ;;  %v5469_v14 = vpop.xlane.xlu0 %1523  ;;  %v1083_v50 = vmul.f32 1.442695, %v1065_v17 }
 0x2e8   : > { %v1063_v62 = vsub.f32 %v5362_v61, %v1032_v60  ;;  %v1554_v38 = vsub.f32 %v5364_v54, %v5469_v14  ;;  %v1553_v54 = vsub.f32 %v5354_v40, %v5467_v13 }
 0x2ea   : > { %v1079_v27 = vmul.f32 1.442695, %v1063_v62 }
 0x2ec   : > { %4747 = vpow2.f32 %v1079_v27 }
 0x2ed   : > { %4749 = vpow2.f32 %v1083_v50 }
 0x2ef   : > { %v1034_v30 = vpop.xlane.xlu0 %1033  ;;  %v1038_v25 = vpop.xlane.xlu2 %1037 }
 0x2f0   : > { %v1064_v31 = vsub.f32 %v5371_v23, %v1034_v30  ;;  %v1066_v61 = vsub.f32 %v5369_v9, %v1038_v25 }
 0x2f1   : > { %1683 = vrot.lane.b32.xlu2 %v5071_v26, %s4895_s24 }
 0x2f2   : > { %v5476_v39 = vpop.eup %4747  ;;  %v1081_v7 = vmul.f32 1.442695, %v1064_v31  ;;  %v1085_v27 = vmul.f32 1.442695, %v1066_v61 }
 0x2f3   : > { %1111 = vadd.xlane.f32.xlu1 %v5476_v39  ;;  %v5482_v32 = vpop.eup %4749 }
 0x2f4   : > { %4751 = vpow2.f32 %v1081_v7 }
 0x2f5   : > { %4753 = vpow2.f32 %v1085_v27 }
 0x2f7   : > { %v5480_v60 = vpop.xlane.xlu0 %1525 }
 0x2fa   : > { %v5484_v0 = vpop.eup %4751 }
 0x2fb   : > { %1115 = vadd.xlane.f32.xlu1 %v5482_v32  ;;  %1113 = vadd.xlane.f32.xlu0 %v5484_v0  ;;  %v5489_v62 = vpop.eup %4753 }
 0x2ff   : > { %v1040_v26 = vpop.xlane.xlu0 %1039 }
 0x300   : > { %v1067_v31 = vsub.f32 %v5382_v49, %v1040_v26 }
 0x302   : > { %v1087_v23 = vmul.f32 1.442695, %v1067_v31 }
 0x303   : > { %1117 = vadd.xlane.f32.xlu0 %v5489_v62 }
 0x304   : > { %4755 = vpow2.f32 %v1087_v23  ;;  %v5510_v23 = vpop.xlane.xlu1 %1527 }
 0x307   : > { %v1042_v7 = vpop.xlane.xlu0 %1041 }
 0x308   : > { %v1068_v9 = vsub.f32 %v5389_v5, %v1042_v7  ;;  %v5507_v5 = vpop.xlane.xlu2 %1531 }
 0x30a   : > { %v5492_v25 = vpop.eup %4755  ;;  %v1089_v17 = vmul.f32 1.442695, %v1068_v9 }
 0x30b   : > { %1119 = vadd.xlane.f32.xlu1 %v5492_v25 }
 0x30c   : > { %4757 = vpow2.f32 %v1089_v17  ;;  %v5516_v17 = vpop.xlane.xlu1 %1529 }
 0x30f   : > { %v1044_v30 = vpop.xlane.xlu0 %1043 }
 0x310   : > { %v1069_v50 = vsub.f32 %v5402_v22, %v1044_v30  ;;  %v1046_v26 = vpop.xlane.xlu2 %1045 }
 0x311   : > { %v1070_v22 = vsub.f32 %v5405_v52, %v1046_v26 }
 0x312   : > { %v1091_v61 = vmul.f32 1.442695, %v1069_v50  ;;  %v5499_v49 = vpop.eup %4757 }
 0x313   : > { %v1093_v31 = vmul.f32 1.442695, %v1070_v22 }
 0x314   : > { %4759 = vpow2.f32 %v1091_v61 }
 0x315   : > { %4761 = vpow2.f32 %v1093_v31 }
 0x317   : > { %1681 = vrot.lane.b32.xlu0 %v5051_v12, %s4895_s24  ;;  %v1464_v12 = vpop.f32.mrf.mxu1  ;;  %v1048_v7 = vpop.xlane.xlu0 %1047 }
 0x318   : > { %v1495_v50 = vmul.f32 0.25, %v1464_v12  ;;  %v1571_v12 = vmul.f32 1.442695, %v1554_v38 }
 0x31a   : > { %1121 = vadd.xlane.f32.xlu2 %v5499_v49  ;;  %v5502_v27 = vpop.eup %4759 }
 0x31b   : > { %v5514_v9 = vpop.eup %4761 }
 0x31c   : > { %v1050_v30 = vpop.xlane.xlu2 %1049 }
 0x31d   : > { %v1072_v26 = vsub.f32 %v5422_v19, %v1050_v30 }
 0x31f   : > { %v1466_v52 = vpop.f32.mrf.mxu1  ;;  %v1097_v37 = vmul.f32 1.442695, %v1072_v26 }
 0x320   : > { %v1496_v22 = vmul.f32 0.25, %v1466_v52 }
 0x322   : > { %1123 = vadd.xlane.f32.xlu2 %v5502_v27 }
 0x324   : > { %1685 = vrot.lane.b32.xlu1 %v5117_v47, %s4895_s24  ;;  %v1071_v47 = vsub.f32 %v5414_v36, %v1048_v7  ;;  %v1052_v44 = vpop.xlane.xlu2 %1051  ;;  %v5528_v36 = vadd.f32 %v1496_v22, %v5399_v58 }
 0x325   : > { %v1073_v19 = vsub.f32 %v5429_v46, %v1052_v44  ;;  %v1569_v46 = vmul.f32 1.442695, %v1553_v54 }
 0x326   : > { %v1095_v61 = vmul.f32 1.442695, %v1071_v47 }
 0x327   : > { %v1099_v7 = vmul.f32 1.442695, %v1073_v19 }
 0x328   : > { %4763 = vpow2.f32 %v1095_v61 }
 0x329   : > { %4765 = vpow2.f32 %v1097_v37 }
 0x32a   : > { %4767 = vpow2.f32 %v1571_v12 }
 0x32b   : > { %4769 = vpow2.f32 %v1099_v7 }
 0x32c   : > { %v1054_v37 = vpop.xlane.xlu0 %1053 }
 0x32d   : > { %v1074_v13 = vsub.f32 %v5436_v51, %v1054_v37 }
 0x334   : > { %v1056_v61 = vpop.xlane.xlu0 %1055 }
 0x335   : > { %v1075_v26 = vsub.f32 %v5443_v16, %v1056_v61  ;;  %v1469_v61 = vpop.f32.mrf.mxu1 }
 0x337   : > { %v1103_v51 = vmul.f32 1.442695, %v1075_v26 }
 0x33a   : > { %1679 = vrot.lane.b32.xlu2 %v5031_v59, %s4895_s24  ;;  %v5522_v59 = vadd.f32 %v1495_v50, %v5396_v18  ;;  %v5532_v18 = vpop.eup %4763  ;;  %v1101_v50 = vmul.f32 1.442695, %v1074_v13 }
 0x33b   : > { %v5538_v58 = vpop.eup %4765 }
 0x33c   : > { %v1058_v31 = vpop.xlane.xlu1 %1057  ;;  %v5542_v47 = vpop.eup %4767 }
 0x33d   : > { %v1076_v14 = vsub.f32 %v5450_v24, %v1058_v31  ;;  %v5546_v40 = vpop.eup %4769 }
 0x33f   : > { %v1105_v38 = vmul.f32 1.442695, %v1076_v14 }
 0x341   : > { %1125 = vadd.xlane.f32.xlu0 %v5514_v9  ;;  %4771 = vpow2.f32 %v1105_v38 }
 0x342   : > { %4773 = vpow2.f32 %v1569_v46 }
 0x344   : > { %v1060_v30 = vpop.xlane.xlu1 %1059 }
 0x345   : > { %v1077_v44 = vsub.f32 %v5457_v29, %v1060_v30 }
 0x347   : > { %v1107_v24 = vmul.f32 1.442695, %v1077_v44  ;;  %v5549_v52 = vpop.eup %4771 }
 0x348   : > { %v5551_v29 = vpop.eup %4773 }
 0x349   : > { %1533 = vmax.xlane.f32.xlu0 %v5522_v59  ;;  %4775 = vpow2.f32 %v1107_v24 }
 0x34a   : > { %4777 = vpow2.f32 %v1101_v50 }
 0x34b   : > { %4779 = vpow2.f32 %v1103_v51 }
 0x34c   : > { %v1062_v31 = vpop.xlane.xlu2 %1061 }
 0x34d   : > { %v1078_v7 = vsub.f32 %v5464_v45, %v1062_v31 }
 0x34e   : > { %1535 = vmax.xlane.f32.xlu1 %v5528_v36 }
 0x34f   : > { %v5556_v22 = vpop.eup %4775  ;;  %v1109_v54 = vmul.f32 1.442695, %v1078_v7 }
 0x350   : > { %v5559_v12 = vpop.eup %4777 }
 0x351   : > { %1127 = vadd.xlane.f32.xlu0 %v5532_v18  ;;  %v5563_v30 = vpop.eup %4779 }
 0x354   : > { %v1684_v26 = vpop.permute.xlu2 %1683 }
 0x356   : > { %1129 = vadd.xlane.f32.xlu1 %v5538_v58 }
 0x359   : > { %1603 = vadd.xlane.f32.xlu0 %v5542_v47 }
 0x35e   : > { %1131 = vadd.xlane.f32.xlu1 %v5546_v40 }
 0x361   : > { %1137 = vadd.xlane.f32.xlu0 %v5549_v52 }
 0x363   : > { %1601 = vadd.xlane.f32.xlu2 %v5551_v29 }
 0x366   : > { %1139 = vadd.xlane.f32.xlu1 %v5556_v22  ;;  %v1112_v19 = vpop.xlane.xlu1 %1111 }
 0x367   : > { %4781 = vrcp.f32 %v1112_v19  ;;  %v1471_v19 = vpop.f32.mrf.mxu1 }
 0x36b   : > { %1133 = vadd.xlane.f32.xlu2 %v5559_v12 }
 0x36d   : > { %v4782_v16 = vpop.eup %4781 }
 0x36e   : > { %v1114_v14 = vpop.xlane.xlu0 %1113  ;;  %v1159_v38 = vmul.f32 %v4782_v16, %v5476_v39  ;;  %v1116_v13 = vpop.xlane.xlu1 %1115 }
 0x36f   : > { %4783 = vrcp.f32 %v1114_v14 }
 0x370   : > { %4785 = vpow2.f32 %v1109_v54 }
 0x373   : > { %1135 = vadd.xlane.f32.xlu2 %v5563_v30 }
 0x375   : > { %v4784_v37 = vpop.eup %4783  ;;  %1675 = vrot.lane.b32.xlu0 %v5061_v20, %s4895_s24 }
 0x376   : > { %v1160_v44 = vmul.f32 %v4784_v37, %v5484_v0  ;;  %v1118_v46 = vpop.xlane.xlu0 %1117  ;;  %v5570_v24 = vpop.eup %4785 }
 0x377   : > { %4787 = vrcp.f32 %v1118_v46  ;;  %v1474_v37 = vpop.f32.mrf.mxu1  ;;  %v1497_v46 = vmul.f32 0.25, %v1469_v61  ;;  %v1558_v61 = vsub.f32 %v5391_v6, %v5507_v5 }
 0x378   : > { %v1175_v45 = vpack.c.bf16 %v1160_v44, %v1159_v38  ;;  %4789 = vrcp.f32 %v1116_v13  ;;  %v1556_v38 = vsub.f32 %v5377_v10, %v5510_v23 }
 0x379   : > { %v5584_v13 = vadd.f32 %v1497_v46, %v5411_v34 }
 0x37a   : > { %1215 = vmatmul.bf16.vlgmr.msrb.gmra.mxu3 %v1175_v45  ;;  %v1575_v45 = vmul.f32 1.442695, %v1556_v38 }
 0x37b   : > { %1141 = vadd.xlane.f32.xlu2 %v5570_v24 }
 0x37d   : > { %v4788_v50 = vpop.eup %4787 }
 0x37e   : > { %v4790_v20 = vpop.eup %4789  ;;  %v1162_v39 = vmul.f32 %v4788_v50, %v5489_v62  ;;  %v1120_v51 = vpop.xlane.xlu1 %1119 }
 0x37f   : > { %1677 = vrot.lane.b32.xlu1 %v5041_v2, %s4895_s24  ;;  %v1161_v0 = vmul.f32 %v4790_v20, %v5482_v32  ;;  %4791 = vrcp.f32 %v1120_v51  ;;  %v1476_v50 = vpop.f32.mrf.mxu1 }
 0x380   : > { %v1500_v34 = vmul.f32 0.25, %v1476_v50 }
 0x381   : > { %v1176_v31 = vpack.c.bf16 %v1162_v39, %v1161_v0  ;;  %v1555_v39 = vsub.f32 %v5375_v35, %v5480_v60  ;;  %v1579_v0 = vmul.f32 1.442695, %v1558_v61  ;;  %v1557_v35 = vsub.f32 %v5384_v53, %v5516_v17 }
 0x382   : > { %v5599_v51 = vadd.f32 %v1500_v34, %v5433_v63 }
 0x383   : > { %v1577_v60 = vmul.f32 1.442695, %v1557_v35 }
 0x385   : > { %v4792_v14 = vpop.eup %4791 }
 0x386   : > { %v1163_v54 = vmul.f32 %v4792_v14, %v5492_v25  ;;  %v1498_v25 = vmul.f32 0.25, %v1471_v19 }
 0x387   : > { %v1479_v23 = vpop.f32.mrf.mxu1 }
 0x388   : > { %v5590_v10 = vadd.f32 %v1498_v25, %v5419_v42  ;;  %v1501_v19 = vmul.f32 0.25, %v1479_v23 }
 0x38a   : > { %1220 = vmatmul.bf16.gmra.mxu3 %v1176_v31  ;;  %v1573_v31 = vmul.f32 1.442695, %v1555_v39  ;;  %v5609_v63 = vadd.f32 %v1501_v19, %v5440_v3 }
 0x38d   : > { %v1122_v7 = vpop.xlane.xlu2 %1121 }
 0x38e   : > { %4793 = vrcp.f32 %v1122_v7 }
 0x38f   : > { %4795 = vpow2.f32 %v1575_v45  ;;  %v1481_v7 = vpop.f32.mrf.mxu1 }
 0x390   : > { %4797 = vpow2.f32 %v1579_v0 }
 0x393   : > { %1673 = vrot.lane.b32.xlu2 %v5087_v33, %s4895_s24  ;;  %v1682_v33 = vpop.permute.xlu0 %1681 }
 0x394   : > { %v4794_v2 = vpop.eup %4793 }
 0x395   : > { %v1164_v16 = vmul.f32 %v4794_v2, %v5499_v49  ;;  %v1124_v44 = vpop.xlane.xlu2 %1123  ;;  %v5587_v20 = vpop.eup %4795 }
 0x396   : > { %v1686_v62 = vpop.permute.xlu1 %1685  ;;  %4799 = vrcp.f32 %v1124_v44 }
 0x397   : > { %1698 = vmatpush.bf16.msra.mxu3 %v1686_v62  ;;  %v1177_v32 = vpack.c.bf16 %v1164_v16, %v1163_v54  ;;  %4801 = vpow2.f32 %v1573_v31  ;;  %v1484_v54 = vpop.f32.mrf.mxu1 }
 0x398   : > { %v1503_v34 = vmul.f32 0.25, %v1484_v54 }
 0x39a   : > { %1225 = vmatmul.bf16.gmra.mxu3 %v1177_v32  ;;  %v5642_v39 = vadd.f32 %v1503_v34, %v5454_v57 }
 0x39b   : > { %1699 = vmatpush.bf16.msra.mxu3 %v1684_v26  ;;  %v1499_v26 = vmul.f32 0.25, %v1474_v37 }
 0x39d   : > { %v1680_v49 = vpop.permute.xlu2 %1679  ;;  %v5602_v42 = vadd.f32 %v1499_v26, %v5426_v48  ;;  %v5611_v48 = vpop.eup %4797 }
 0x39e   : > { %v4800_v5 = vpop.eup %4799 }
 0x39f   : > { %1537 = vmax.xlane.f32.xlu0 %v5584_v13  ;;  %1700 = vmatpush.bf16.msra.mxu3 %v1682_v33  ;;  %v5615_v14 = vpop.eup %4801  ;;  %v1165_v17 = vmul.f32 %v4800_v5, %v5502_v27  ;;  %v1502_v33 = vmul.f32 0.25, %v1481_v7 }
 0x3a1   : > { %v5629_v50 = vadd.f32 %v1502_v33, %v5447_v55 }
 0x3a3   : > { %1701 = vmatpush.bf16.msra.mxu3 %v1680_v49 }
 0x3a7   : > { %1607 = vadd.xlane.f32.xlu0 %v5587_v20 }
 0x3a9   : > { %1539 = vmax.xlane.f32.xlu1 %v5590_v10 }
 0x3af   : > { %1543 = vmax.xlane.f32.xlu0 %v5599_v51 }
 0x3b1   : > { %1541 = vmax.xlane.f32.xlu1 %v5602_v42 }
 0x3b4   : > { %v1126_v6 = vpop.xlane.xlu0 %1125 }
 0x3b5   : > { %4803 = vrcp.f32 %v1126_v6 }
 0x3b6   : > { %4805 = vpow2.f32 %v1577_v60 }
 0x3b7   : > { %1545 = vmax.xlane.f32.xlu0 %v5609_v63 }
 0x3b9   : > { %1611 = vadd.xlane.f32.xlu1 %v5611_v48 }
 0x3bb   : > { %v4804_v2 = vpop.eup %4803 }
 0x3bc   : > { %1605 = vadd.xlane.f32.xlu2 %v5615_v14  ;;  %v1534_v53 = vpop.xlane.xlu0 %1533  ;;  %v1166_v3 = vmul.f32 %v4804_v2, %v5514_v9  ;;  %v5622_v44 = vpop.eup %4805 }
 0x3bd   : > { %v1559_v16 = vsub.f32 %v5522_v59, %v1534_v53  ;;  %v1486_v9 = vpop.f32.mrf.mxu1 }
 0x3be   : > { %v1178_v37 = vpack.c.bf16 %v1166_v3, %v1165_v17 }
 0x3bf   : > { %v1581_v62 = vmul.f32 1.442695, %v1559_v16 }
 0x3c0   : > { %1230 = vmatmul.bf16.gmra.mxu3 %v1178_v37 }
 0x3c1   : > { %v1536_v32 = vpop.xlane.xlu1 %1535  ;;  %4807 = vpow2.f32 %v1581_v62 }
 0x3c2   : > { %v1560_v38 = vsub.f32 %v5528_v36, %v1536_v32  ;;  %v1504_v36 = vmul.f32 0.25, %v1486_v9 }
 0x3c4   : > { %v1583_v46 = vmul.f32 1.442695, %v1560_v38  ;;  %1609 = vadd.xlane.f32.xlu2 %v5622_v44  ;;  %v1128_v45 = vpop.xlane.xlu0 %1127  ;;  %v5636_v23 = vadd.f32 %v1504_v36, %v5461_v41 }
 0x3c6   : > { %4809 = vpow2.f32 %v1583_v46 }
 0x3c7   : > { %v5625_v27 = vpop.eup %4807  ;;  %4811 = vrcp.f32 %v1128_v45 }
 0x3c8   : > { %1613 = vadd.xlane.f32.xlu1 %v5625_v27 }
 0x3c9   : > { %v1130_v59 = vpop.xlane.xlu1 %1129 }
 0x3ca   : > { %4813 = vrcp.f32 %v1130_v59 }
 0x3cc   : > { %v5631_v25 = vpop.eup %4809  ;;  %1547 = vmax.xlane.f32.xlu2 %v5629_v50  ;;  %v1604_v41 = vpop.xlane.xlu0 %1603 }
 0x3cd   : > { %1615 = vadd.xlane.f32.xlu0 %v5631_v25  ;;  %v4812_v49 = vpop.eup %4811 }
 0x3ce   : > { %v1167_v26 = vmul.f32 %v4812_v49, %v5532_v18  ;;  %v4322_v18 = vld [vmem:[%s7506_s4] sm:$0xff] }
 0x3cf   : > { %1301 = vmatpush.bf16.msrb.mxu0 %v4322_v18 }
 0x3d0   : > { %v4814_v61 = vpop.eup %4813  ;;  %1551 = vmax.xlane.f32.xlu1 %v5636_v23 }
 0x3d1   : > { %v1168_v55 = vmul.f32 %v4814_v61, %v5538_v58  ;;  %v1132_v19 = vpop.xlane.xlu1 %1131 }
 0x3d2   : > { %4815 = vrcp.f32 %v1132_v19 }
 0x3d3   : > { %v1179_v0 = vpack.c.bf16 %v1168_v55, %v1167_v26 }
 0x3d4   : > { %1549 = vmax.xlane.f32.xlu2 %v5642_v39  ;;  %v1138_v53 = vpop.xlane.xlu0 %1137 }
 0x3d5   : > { %1235 = vmatmul.bf16.gmra.mxu3 %v1179_v0 }
 0x3d6   : > { %v1602_v31 = vpop.xlane.xlu2 %1601 }
 0x3d8   : > { %v4816_v35 = vpop.eup %4815 }
 0x3d9   : > { %v1169_v57 = vmul.f32 %v4816_v35, %v5546_v40  ;;  %v1140_v2 = vpop.xlane.xlu1 %1139 }
 0x3de   : > { %v1134_v7 = vpop.xlane.xlu2 %1133 }
 0x3df   : > { %4817 = vrcp.f32 %v1134_v7 }
 0x3e5   : > { %v4818_v6 = vpop.eup %4817 }
 0x3e6   : > { %v1136_v58 = vpop.xlane.xlu2 %1135  ;;  %v1170_v60 = vmul.f32 %v4818_v6, %v5559_v12 }
 0x3e7   : > { %4819 = vrcp.f32 %v1136_v58  ;;  %v1676_v37 = vpop.permute.xlu0 %1675 }
 0x3e8   : > { %v1180_v5 = vpack.c.bf16 %v1170_v60, %v1169_v57  ;;  %4821 = vrcp.f32 %v1138_v53 }
 0x3ea   : > { %1240 = vmatmul.bf16.gmra.mxu3 %v1180_v5 }
 0x3ed   : > { %v4820_v54 = vpop.eup %4819 }
 0x3ee   : > { %v1142_v17 = vpop.xlane.xlu2 %1141  ;;  %v4822_v16 = vpop.eup %4821  ;;  %v1171_v62 = vmul.f32 %v4820_v54, %v5563_v30 }
 0x3ef   : > { %v1172_v40 = vmul.f32 %v4822_v16, %v5549_v52  ;;  %4823 = vrcp.f32 %v1142_v17 }
 0x3f0   : > { %4825 = vrcp.f32 %v1140_v2 }
 0x3f1   : > { %v1678_v3 = vpop.permute.xlu1 %1677  ;;  %v1181_v12 = vpack.c.bf16 %v1172_v40, %v1171_v62  ;;  %4827 = vrcp.f32 %v1602_v31 }
 0x3f2   : > { %1702 = vmatpush.bf16.msra.mxu3 %v1678_v3  ;;  %4829 = vrcp.f32 %v1604_v41 }
 0x3f5   : > { %v4824_v46 = vpop.eup %4823 }
 0x3f6   : > { %1703 = vmatpush.bf16.msra.mxu3 %v1676_v37  ;;  %v1674_v32 = vpop.permute.xlu2 %1673  ;;  %v4826_v45 = vpop.eup %4825  ;;  %v1174_v33 = vmul.f32 %v4824_v46, %v5570_v24 }
 0x3f7   : > { %v1173_v36 = vmul.f32 %v4826_v45, %v5556_v22  ;;  %v4828_v49 = vpop.eup %4827 }
 0x3f8   : > { %v4830_v61 = vpop.eup %4829  ;;  %v1649_v55 = vmul.f32 %v4828_v49, %v5551_v29 }
 0x3f9   : > { %v1182_v30 = vpack.c.bf16 %v1174_v33, %v1173_v36  ;;  %v1650_v19 = vmul.f32 %v4830_v61, %v5542_v47 }
 0x3fa   : > { %1704 = vmatpush.bf16.msra.mxu3 %v1674_v32 }
 0x3fb   : > { %1245 = vmatmul.bf16.gmra.mxu3 %v1181_v12  ;;  %v1665_v22 = vpack.c.bf16 %v1650_v19, %v1649_v55 }
 0x3fd   : > { %v1216_v38 = vpop.f32.mrf.mxu3 }
 0x405   : > { %v1218_v9 = vpop.f32.mrf.mxu3 }
 0x406   : > { %v1256_v59 = vpack.c.bf16 %v1218_v9, %v1216_v38 }
 0x408   : > { %4080 = vmatmul.msk.bf16.vlgmr.msrb.gmra.mxu0 %vm901_vm14, %v1256_v59 }
 0x40b   : > { %1250 = vmatmul.bf16.gmra.mxu3 %v1182_v30 }
 0x40d   : > { %v1221_v52 = vpop.f32.mrf.mxu3 }
 0x412   : > { %v1538_v34 = vpop.xlane.xlu0 %1537 }
 0x413   : > { %v1561_v26 = vsub.f32 %v5584_v13, %v1538_v34 }
 0x415   : > { %v1585_v0 = vmul.f32 1.442695, %v1561_v26  ;;  %v1223_v24 = vpop.f32.mrf.mxu3 }
 0x416   : > { %v1257_v7 = vpack.c.bf16 %v1223_v24, %v1221_v52 }
 0x417   : > { %4831 = vpow2.f32 %v1585_v0 }
 0x418   : > { %4081 = vmatmul.msk.bf16.gmra.mxu0 %vm901_vm14, %v1257_v7 }
 0x41a   : > { %v1608_v35 = vpop.xlane.xlu0 %1607 }
 0x41b   : > { %1705 = vmatmul.bf16.vlgmr.msra.gmra.mxu3 %v1665_v22 }
 0x41c   : > { %v1540_v31 = vpop.xlane.xlu1 %1539 }
 0x41d   : > { %v1562_v41 = vsub.f32 %v5590_v10, %v1540_v31  ;;  %v5660_v6 = vpop.eup %4831  ;;  %v1226_v18 = vpop.f32.mrf.mxu3 }
 0x41e   : > { %1617 = vadd.xlane.f32.xlu0 %v5660_v6 }
 0x41f   : > { %v1587_v13 = vmul.f32 1.442695, %v1562_v41 }
 0x421   : > { %4833 = vpow2.f32 %v1587_v13 }
 0x422   : > { %v1544_v29 = vpop.xlane.xlu0 %1543 }
 0x423   : > { %v1564_v47 = vsub.f32 %v5599_v51, %v1544_v29 }
 0x424   : > { %v1542_v58 = vpop.xlane.xlu1 %1541 }
 0x425   : > { %v1563_v57 = vsub.f32 %v5602_v42, %v1542_v58  ;;  %v1591_v60 = vmul.f32 1.442695, %v1564_v47  ;;  %v1228_v5 = vpop.f32.mrf.mxu3 }
 0x426   : > { %v1258_v17 = vpack.c.bf16 %v1228_v5, %v1226_v18 }
 0x427   : > { %v5665_v2 = vpop.eup %4833  ;;  %v1589_v53 = vmul.f32 1.442695, %v1563_v57  ;;  %4835 = vpow2.f32 %v1591_v60 }
 0x428   : > { %1619 = vadd.xlane.f32.xlu2 %v5665_v2  ;;  %4082 = vmatmul.msk.bf16.gmra.mxu0 %vm901_vm14, %v1258_v17  ;;  %v5705_v17 = vadd.s32 15, %v4961_v4 }
 0x429   : > { %4837 = vpow2.f32 %v1589_v53 }
 0x42a   : > { %v1546_v10 = vpop.xlane.xlu0 %1545  ;;  %4839 = vrcp.f32 %v1608_v35  ;;  %vm629_vm1 = vcmp.eq.s32.totalorder %v5188_v28, %v5705_v17  ;;  %vm632_vm2 = vcmp.eq.s32.totalorder %v5250_v11, %v5705_v17  ;;  %vm628_vm4 = vcmp.eq.s32.totalorder %v4958_v1, %v5705_v17  ;;  %v7604_v11 = vld [vmem:[#allocation5_spill] sm:$0xff] }
 0x42b   : > { %v1565_v3 = vsub.f32 %v5609_v63, %v1546_v10  ;;  %v7601_v10 = vmov 0.0   ;;  %vm634_vm5 = vcmp.eq.s32.totalorder %v5275_v21, %v5705_v17  ;;  %vm635_vm6 = vcmp.eq.s32.totalorder %v5278_v56, %v5705_v17 }
 0x42c   : > { %v1612_v37 = vpop.xlane.xlu1 %1611  ;;  %v650_v28 = vsel %vm634_vm5, 1.0, %v7601_v10  ;;  %vm630_vm7 = vcmp.eq.s32.totalorder %v5214_v43, %v5705_v17  ;;  %vm633_vm9 = vcmp.eq.s32.totalorder %v5253_v15, %v5705_v17  ;;  %vm637_vm10 = vcmp.eq.s32.totalorder %v4967_v8, %v5705_v17  ;;  %v7602_v43 = vld [vmem:[#allocation6_spill] sm:$0xff] }
 0x42d   : > { %v5670_v54 = vpop.eup %4835  ;;  %v1593_v51 = vmul.f32 1.442695, %v1565_v3  ;;  %v645_v3 = vsel %vm629_vm1, 1.0, %v7601_v10  ;;  %vm550_vm11 = vcmp.eq.s32.totalorder %v7602_v43, %v4961_v4  ;;  %vm631_vm15 = vcmp.eq.s32.totalorder %v7602_v43, %v5705_v17  ;;  %v5822_v43 = vld [vmem:[%s7508_s6] sm:$0x1f] }
 0x42e   : > { %1623 = vadd.xlane.f32.xlu0 %v5670_v54  ;;  %vm547_vm1 = vcmp.eq.s32.totalorder %v4958_v1, %v4961_v4 }
 0x42f   : > { %v5672_v16 = vpop.eup %4837  ;;  %v1606_v42 = vpop.xlane.xlu2 %1605  ;;  %4841 = vpow2.f32 %v1593_v51  ;;  %v663_v51 = vsel %vm437_vm12, %v645_v3, 0.0 }
 0x430   : > { %1621 = vadd.xlane.f32.xlu1 %v5672_v16  ;;  %4843 = vrcp.f32 %v1606_v42  ;;  %v4840_v62 = vpop.eup %4839 }
 0x431   : > { %v1652_v38 = vmul.f32 %v4840_v62, %v5587_v20 }
 0x435   : > { %v5676_v40 = vpop.eup %4841 }
 0x436   : > { %v4844_v32 = vpop.eup %4843  ;;  %1625 = vadd.xlane.f32.xlu2 %v5676_v40 }
 0x437   : > { %v1610_v63 = vpop.xlane.xlu2 %1609  ;;  %v1651_v12 = vmul.f32 %v4844_v32, %v5615_v14  ;;  %v648_v32 = vsel %vm632_vm2, 1.0, %v7601_v10  ;;  %vm639_vm2 = vcmp.eq.s32.totalorder %v7604_v11, %v5705_v17 }
 0x438   : > { %4845 = vrcp.f32 %v1610_v63  ;;  %v672_v63 = vsel %vm437_vm12, %v648_v32, 0.0 }
 0x439   : > { %v1666_v46 = vpack.c.bf16 %v1652_v38, %v1651_v12  ;;  %4847 = vrcp.f32 %v1612_v37 }
 0x43b   : > { %v1614_v45 = vpop.xlane.xlu1 %1613  ;;  %1710 = vmatmul.bf16.gmra.mxu3 %v1666_v46 }
 0x43e   : > { %v4846_v36 = vpop.eup %4845 }
 0x43f   : > { %v1548_v33 = vpop.xlane.xlu2 %1547  ;;  %v4848_v49 = vpop.eup %4847  ;;  %v1653_v14 = vmul.f32 %v4846_v36, %v5622_v44  ;;  %v644_v36 = vsel %vm628_vm4, 1.0, %v7601_v10  ;;  %vm553_vm4 = vcmp.eq.s32.totalorder %v5275_v21, %v4961_v4 }
 0x440   : > { %v1566_v9 = vsub.f32 %v5629_v50, %v1548_v33  ;;  %v1654_v55 = vmul.f32 %v4848_v49, %v5611_v48  ;;  %v1616_v50 = vpop.xlane.xlu0 %1615 }
 0x442   : > { %v1595_v59 = vmul.f32 1.442695, %v1566_v9  ;;  %v1667_v19 = vpack.c.bf16 %v1654_v55, %v1653_v14 }
 0x443   : > { %v1231_v30 = vpop.f32.mrf.mxu3  ;;  %v1552_v52 = vpop.xlane.xlu1 %1551 }
 0x444   : > { %4849 = vpow2.f32 %v1595_v59  ;;  %v1568_v34 = vsub.f32 %v5636_v23, %v1552_v52  ;;  %v564_v59 = vsel %vm548_vm3, 1.0, %v7601_v10  ;;  %vm552_vm3 = vcmp.eq.s32.totalorder %v5253_v15, %v4961_v4  ;;  %v7605_v15 = vld [vmem:[#allocation2_spill] sm:$0xff] }
 0x445   : > { %v582_v49 = vsel %vm437_vm12, %v564_v59, 0.0  ;;  %v568_v59 = vsel %vm552_vm3, 1.0, %v7601_v10  ;;  %vm636_vm5 = vcmp.eq.s32.totalorder %v7605_v15, %v5705_v17  ;;  %vm2323_vm3 = vcmask 785408  }
 0x446   : > { %v1599_v61 = vmul.f32 1.442695, %v1568_v34  ;;  %v660_v34 = vsel %vm437_vm12, %v644_v36, 0.0 }
 0x447   : > { %v1550_v20 = vpop.xlane.xlu2 %1549 }
 0x448   : > { %v1567_v26 = vsub.f32 %v5642_v39, %v1550_v20  ;;  %4851 = vpow2.f32 %v1599_v61  ;;  %v678_v20 = vsel %vm437_vm12, %v650_v28, 0.0 }
 0x44a   : > { %v5686_v0 = vpop.eup %4849  ;;  %v1597_v24 = vmul.f32 1.442695, %v1567_v26 }
 0x44b   : > { %1627 = vadd.xlane.f32.xlu1 %v5686_v0  ;;  %v1233_v7 = vpop.f32.mrf.mxu3  ;;  %1715 = vmatmul.bf16.gmra.mxu3 %v1667_v19  ;;  %v651_v19 = vsel %vm635_vm6, 1.0, %v7601_v10  ;;  %vm554_vm6 = vcmp.eq.s32.totalorder %v5278_v56, %v4961_v4  ;;  %v7607_v56 = vld [vmem:[#allocation9_spill] sm:$0xff] }
 0x44c   : > { %4853 = vpow2.f32 %v1597_v24  ;;  %v1259_v23 = vpack.c.bf16 %v1233_v7, %v1231_v30  ;;  %v646_v7 = vsel %vm630_vm7, 1.0, %v7601_v10 }
 0x44d   : > { %4855 = vrcp.f32 %v1616_v50 }
 0x44e   : > { %v5689_v44 = vpop.eup %4851  ;;  %4857 = vrcp.f32 %v1614_v45  ;;  %4083 = vmatmul.msk.bf16.gmra.mxu0 %vm901_vm14, %v1259_v23  ;;  %v681_v23 = vsel %vm437_vm12, %v651_v19, 0.0 }
 0x44f   : > { %1631 = vadd.xlane.f32.xlu2 %v5689_v44 }
 0x452   : > { %v5693_v48 = vpop.eup %4853 }
 0x453   : > { %v4856_v39 = vpop.eup %4855  ;;  %1629 = vadd.xlane.f32.xlu0 %v5693_v48  ;;  %661 = vadd.xlane.f32.xlu1 %v660_v34 }
 0x454   : > { %v4858_v22 = vpop.eup %4857  ;;  %v1656_v35 = vmul.f32 %v4856_v39, %v5631_v25  ;;  %v4323_v25 = vld [vmem:[%s7506_s4 + $0x8] sm:$0xff]  ;;  %v666_v39 = vsel %vm437_vm12, %v646_v7, 0.0 }
 0x455   : > { %v1655_v41 = vmul.f32 %v4858_v22, %v5625_v27  ;;  %1791 = vmatpush.bf16.msrb.mxu2 %v4323_v25  ;;  %v649_v22 = vsel %vm633_vm9, 1.0, %v7601_v10  ;;  %vm555_vm9 = vcmp.eq.s32.totalorder %v7605_v15, %v4961_v4 }
 0x457   : > { %v1668_v18 = vpack.c.bf16 %v1656_v35, %v1655_v41  ;;  %667 = vadd.xlane.f32.xlu2 %v666_v39 }
 0x458   : > { %v1236_v31 = vpop.f32.mrf.mxu3 }
 0x45b   : > { %1720 = vmatmul.bf16.gmra.mxu3 %v1668_v18  ;;  %664 = vadd.xlane.f32.xlu0 %v663_v51 }
 0x460   : > { %v1238_v13 = vpop.f32.mrf.mxu3 }
 0x461   : > { %v1260_v29 = vpack.c.bf16 %v1238_v13, %v1236_v31  ;;  %v675_v31 = vsel %vm437_vm12, %v649_v22, 0.0  ;;  %v653_v13 = vsel %vm637_vm10, 1.0, %v7601_v10  ;;  %v7608_v22 = vld [vmem:[#allocation8_spill] sm:$0xff] }
 0x462   : > { %676 = vadd.xlane.f32.xlu2 %v675_v31  ;;  %vm641_vm10 = vcmp.eq.s32.totalorder %v7608_v22, %v5705_v17 }
 0x463   : > { %4084 = vmatmul.msk.bf16.gmra.mxu0 %vm901_vm14, %v1260_v29  ;;  %673 = vadd.xlane.f32.xlu0 %v672_v63  ;;  %v566_v29 = vsel %vm550_vm11, 1.0, %v7601_v10  ;;  %vm556_vm11 = vcmp.eq.s32.totalorder %v4967_v8, %v4961_v4 }
 0x46b   : > { %583 = vadd.xlane.f32.xlu0 %v582_v49  ;;  %v594_v49 = vsel %vm437_vm12, %v568_v59, 0.0 }
 0x46d   : > { %v1241_v47 = vpop.f32.mrf.mxu3 }
 0x473   : > { %679 = vadd.xlane.f32.xlu0 %v678_v20  ;;  %v570_v20 = vsel %vm554_vm6, 1.0, %v7601_v10 }
 0x475   : > { %v1243_v58 = vpop.f32.mrf.mxu3 }
 0x476   : > { %v1261_v57 = vpack.c.bf16 %v1243_v58, %v1241_v47  ;;  %v687_v58 = vsel %vm437_vm12, %v653_v13, 0.0 }
 0x478   : > { %4085 = vmatmul.msk.bf16.gmra.mxu0 %vm901_vm14, %v1261_v57 }
 0x47b   : > { %682 = vadd.xlane.f32.xlu0 %v681_v23 }
 0x47e   : > { %v1246_v60 = vpop.f32.mrf.mxu3 }
 0x486   : > { %v1248_v5 = vpop.f32.mrf.mxu3 }
 0x487   : > { %v1262_v53 = vpack.c.bf16 %v1248_v5, %v1246_v60  ;;  %v588_v60 = vsel %vm437_vm12, %v566_v29, 0.0 }
 0x488   : > { %589 = vadd.xlane.f32.xlu2 %v588_v60 }
 0x489   : > { %4086 = vmatmul.msk.bf16.gmra.mxu0 %vm901_vm14, %v1262_v53 }
 0x48e   : > { %v1251_v27 = vpop.f32.mrf.mxu3 }
 0x491   : > { %v1618_v37 = vpop.xlane.xlu0 %1617 }
 0x492   : > { %4859 = vrcp.f32 %v1618_v37  ;;  %v7603_v37 = vld [vmem:[#allocation4_spill] sm:$0xff] }
 0x493   : > { %vm638_vm13 = vcmp.eq.s32.totalorder %v7603_v37, %v5705_v17 }
 0x496   : > { %v1253_v42 = vpop.f32.mrf.mxu3 }
 0x497   : > { %v1263_v62 = vpack.c.bf16 %v1253_v42, %v1251_v27 }
 0x498   : > { %v4860_v46 = vpop.eup %4859 }
 0x499   : > { %4087 = vmatmul.msk.bf16.gmra.mxu0 %vm901_vm14, %v1263_v62  ;;  %v1657_v33 = vmul.f32 %v4860_v46, %v5660_v6  ;;  %v567_v62 = vsel %vm551_vm0, 1.0, %v7601_v10  ;;  %v563_v46 = vsel %vm547_vm1, 1.0, %v7601_v10  ;;  %vm2083_vm0 = vcmp.lt.s32.totalorder %v4958_v1, 7 }
 0x49a   : > { %vm2261_vm1 = vcmask 523264  }
 0x49b   : > { %v1620_v12 = vpop.xlane.xlu2 %1619 }
 0x49c   : > { %4861 = vrcp.f32 %v1620_v12  ;;  %v591_v12 = vsel %vm437_vm12, %v567_v62, 0.0 }
 0x49d   : > { %592 = vadd.xlane.f32.xlu2 %v591_v12 }
 0x49e   : > { %v1706_v38 = vpop.f32.mrf.mxu3 }
 0x4a1   : > { %v1624_v6 = vpop.xlane.xlu0 %1623 }
 0x4a2   : > { %v4862_v45 = vpop.eup %4861 }
 0x4a3   : > { %v1658_v9 = vmul.f32 %v4862_v45, %v5665_v2  ;;  %v1622_v30 = vpop.xlane.xlu1 %1621 }
 0x4a4   : > { %4863 = vrcp.f32 %v1622_v30 }
 0x4a5   : > { %v1669_v52 = vpack.c.bf16 %v1658_v9, %v1657_v33  ;;  %4865 = vrcp.f32 %v1624_v6  ;;  %v655_v33 = vsel %vm639_vm2, 1.0, %v7601_v10  ;;  %v579_v9 = vsel %vm437_vm12, %v563_v46, 0.0  ;;  %595 = vadd.xlane.f32.xlu2 %v594_v49 }
 0x4a6   : > { %v1708_v14 = vpop.f32.mrf.mxu3  ;;  %v652_v6 = vsel %vm636_vm5, 1.0, %v7601_v10  ;;  %vm558_vm2 = vcmp.eq.s32.totalorder %v7604_v11, %v4961_v4 }
 0x4a7   : > { %v1746_v2 = vpack.c.bf16 %v1708_v14, %v1706_v38  ;;  %1725 = vmatmul.bf16.gmra.mxu3 %v1669_v52  ;;  %v693_v52 = vsel %vm437_vm12, %v655_v33, 0.0 }
 0x4a9   : > { %4100 = vmatmul.msk.bf16.vlgmr.msrb.gmra.mxu2 %vm901_vm14, %v1746_v2 }
 0x4aa   : > { %v4864_v61 = vpop.eup %4863 }
 0x4ab   : > { %v4866_v26 = vpop.eup %4865  ;;  %v1659_v55 = vmul.f32 %v4864_v61, %v5672_v16  ;;  %v1626_v16 = vpop.xlane.xlu2 %1625 }
 0x4ac   : > { %v1660_v50 = vmul.f32 %v4866_v26, %v5670_v54  ;;  %v565_v54 = vsel %vm549_vm8, 1.0, %v7601_v10  ;;  %4867 = vrcp.f32 %v1626_v16  ;;  %v600_v26 = vsel %vm437_vm12, %v570_v20, 0.0 }
 0x4ad   : > { %v585_v35 = vsel %vm437_vm12, %v565_v54, 0.0  ;;  %vm642_vm8 = vcmp.eq.s32.totalorder %v7607_v56, %v5705_v17  ;;  %v571_v16 = vsel %vm555_vm9, 1.0, %v7601_v10 }
 0x4ae   : > { %v1670_v24 = vpack.c.bf16 %v1660_v50, %v1659_v55  ;;  %586 = vadd.xlane.f32.xlu0 %v585_v35  ;;  %v658_v23 = vsel %vm642_vm8, 1.0, %v7601_v10  ;;  %v603_v54 = vsel %vm437_vm12, %v571_v16, 0.0  ;;  %v657_v35 = vsel %vm641_vm10, 1.0, %v7601_v10 }
 0x4af   : > { %v702_v39 = vsel %vm437_vm12, %v658_v23, 0.0  ;;  %v699_v31 = vsel %vm437_vm12, %v657_v35, 0.0 }
 0x4b2   : > { %v4868_v47 = vpop.eup %4867 }
 0x4b3   : > { %v1661_v5 = vmul.f32 %v4868_v47, %v5676_v40  ;;  %v654_v40 = vsel %vm638_vm13, 1.0, %v7601_v10 }
 0x4b4   : > { %v690_v32 = vsel %vm437_vm12, %v654_v40, 0.0 }
 0x4b6   : > { %688 = vadd.xlane.f32.xlu0 %v687_v58  ;;  %v5826_v58 = vperm.slane %v5822_v43, 4 }
 0x4b7   : > { %1730 = vmatmul.bf16.gmra.mxu3 %v1670_v24  ;;  %v7606_v24 = vld [vmem:[#allocation7_spill] sm:$0xff] }
 0x4b8   : > { %vm640_vm7 = vcmp.eq.s32.totalorder %v7606_v24, %v5705_v17 }
 0x4b9   : > { %v656_v19 = vsel %vm640_vm7, 1.0, %v7601_v10 }
 0x4ba   : > { %v696_v7 = vsel %vm437_vm12, %v656_v19, 0.0 }
 0x4bb   : > { %697 = vadd.xlane.f32.xlu2 %v696_v7 }
 0x4be   : > { %v1628_v41 = vpop.xlane.xlu1 %1627  ;;  %v1711_v18 = vpop.f32.mrf.mxu3  ;;  %691 = vadd.xlane.f32.xlu0 %v690_v32 }
 0x4bf   : > { %4869 = vrcp.f32 %v1628_v41  ;;  %v1303_v41 = vpop.f32.mrf.mxu0 }
 0x4c0   : > { %v1344_v60 = vadd.f32 %v5826_v58, %v1303_v41 }
 0x4c2   : > { %v1632_v42 = vpop.xlane.xlu2 %1631 }
 0x4c3   : > { %703 = vadd.xlane.f32.xlu2 %v702_v39 }
 0x4c5   : > { %v4870_v57 = vpop.eup %4869 }
 0x4c6   : > { %v1662_v25 = vmul.f32 %v4870_v57, %v5686_v0  ;;  %v1713_v53 = vpop.f32.mrf.mxu3  ;;  %v1630_v27 = vpop.xlane.xlu0 %1629  ;;  %v647_v0 = vsel %vm631_vm15, 1.0, %v7601_v10  ;;  %694 = vadd.xlane.f32.xlu0 %v693_v52  ;;  %vm2034_vm15 = vcmp.lt.s32.totalorder %v4958_v1, 1 }
 0x4c7   : > { %v1747_v3 = vpack.c.bf16 %v1713_v53, %v1711_v18  ;;  %4871 = vrcp.f32 %v1630_v27  ;;  %v669_v63 = vsel %vm437_vm12, %v647_v0, 0.0  ;;  %v572_v18 = vsel %vm556_vm11, 1.0, %v7601_v10  ;;  %v1305_v57 = vpop.f32.mrf.mxu0 }
 0x4c8   : > { %v1671_v51 = vpack.c.bf16 %v1662_v25, %v1661_v5  ;;  %4873 = vrcp.f32 %v1632_v42  ;;  %670 = vadd.xlane.f32.xlu1 %v669_v63  ;;  %v606_v29 = vsel %vm437_vm12, %v572_v18, 0.0  ;;  %v7609_v5 = vld [vmem:[#allocation10_spill] sm:$0xff]  ;;  %v1345_v25 = vadd.f32 %v5826_v58, %v1305_v57 }
 0x4c9   : > { %4101 = vmatmul.msk.bf16.gmra.mxu2 %vm901_vm14, %v1747_v3  ;;  %vm643_vm13 = vcmp.eq.s32.totalorder %v7609_v5, %v5705_v17 }
 0x4ca   : > { %1735 = vmatmul.bf16.gmra.mxu3 %v1671_v51  ;;  %v659_v3 = vsel %vm643_vm13, 1.0, %v7601_v10  ;;  %v668_v57 = vpop.xlane.xlu2 %667 }
 0x4cb   : > { %v705_v42 = vsel %vm437_vm12, %v659_v3, 0.0 }
 0x4cd   : > { %v4872_v45 = vpop.eup %4871 }
 0x4ce   : > { %v1716_v38 = vpop.f32.mrf.mxu3  ;;  %v4874_v36 = vpop.eup %4873  ;;  %v1663_v30 = vmul.f32 %v4872_v45, %v5693_v48  ;;  %v569_v48 = vsel %vm553_vm4, 1.0, %v7601_v10  ;;  %vm560_vm4 = vcmp.eq.s32.totalorder %v7608_v22, %v4961_v4 }
 0x4cf   : > { %v1664_v34 = vmul.f32 %v4874_v36, %v5689_v44  ;;  %v684_v44 = vsel %vm437_vm12, %v652_v6, 0.0  ;;  %v597_v61 = vsel %vm437_vm12, %v569_v48, 0.0  ;;  %v662_v36 = vpop.xlane.xlu1 %661  ;;  %v665_v49 = vpop.xlane.xlu0 %664 }
 0x4d0   : > { %580 = vadd.xlane.f32.xlu1 %v579_v9  ;;  %598 = vadd.xlane.f32.xlu0 %v597_v61  ;;  %v5862_v6 = vsub.f32 1.0, %v662_v36 }
 0x4d1   : > { %v1672_v28 = vpack.c.bf16 %v1664_v34, %v1663_v30 }
 0x4d6   : > { %v1718_v14 = vpop.f32.mrf.mxu3 }
 0x4d7   : > { %v1748_v2 = vpack.c.bf16 %v1718_v14, %v1716_v38  ;;  %v1308_v38 = vpop.f32.mrf.mxu0  ;;  %v5860_v14 = vsub.f32 1.0, %v665_v49 }
 0x4d8   : > { %685 = vadd.xlane.f32.xlu1 %v684_v44  ;;  %700 = vadd.xlane.f32.xlu0 %v699_v31  ;;  %v1346_v9 = vadd.f32 %v5826_v58, %v1308_v38 }
 0x4d9   : > { %4102 = vmatmul.msk.bf16.gmra.mxu2 %vm901_vm14, %v1748_v2  ;;  %7610 = vst [vmem:[#allocation6_spill] sm:$0xff] %v5860_v14 }
 0x4da   : > { %1740 = vmatmul.bf16.gmra.mxu3 %v1672_v28 }
 0x4de   : > { %v1721_v21 = vpop.f32.mrf.mxu3 }
 0x4df   : > { %v1310_v33 = vpop.f32.mrf.mxu0 }
 0x4e0   : > { %601 = vadd.xlane.f32.xlu1 %v600_v26  ;;  %607 = vadd.xlane.f32.xlu0 %v606_v29  ;;  %v1347_v26 = vadd.f32 %v5826_v58, %v1310_v33 }
 0x4e6   : > { %v1723_v55 = vpop.f32.mrf.mxu3 }
 0x4e7   : > { %v1749_v50 = vpack.c.bf16 %v1723_v55, %v1721_v21  ;;  %v1313_v55 = vpop.f32.mrf.mxu0 }
 0x4e8   : > { %604 = vadd.xlane.f32.xlu1 %v603_v54  ;;  %706 = vadd.xlane.f32.xlu0 %v705_v42  ;;  %v1348_v31 = vadd.f32 %v5826_v58, %v1313_v55 }
 0x4e9   : > { %4103 = vmatmul.msk.bf16.gmra.mxu2 %vm901_vm14, %v1749_v50 }
 0x52a   : > { %v1726_v13 = vpop.f32.mrf.mxu3 }
 0x52c   : > { %v1793_v47 = vpop.f32.mrf.mxu2 }
 0x52d   : > { %v5832_v53 = vadd.f32 %v1793_v47, %v1344_v60 }
 0x52f   : > { %v7532_v0 = vrot.slane %v5832_v53, 7  ;;  %v7531_v34 = vrot.slane %v5832_v53, 1 }
 0x532   : > { %v1728_v8 = vpop.f32.mrf.mxu3 }
 0x533   : > { %v1750_v27 = vpack.c.bf16 %v1728_v8, %v1726_v13  ;;  %v1315_v8 = vpop.f32.mrf.mxu0 }
 0x534   : > { %v1795_v51 = vpop.f32.mrf.mxu2 }
 0x535   : > { %v5836_v40 = vadd.f32 %v1795_v51, %v1345_v25  ;;  %4104 = vmatmul.msk.bf16.gmra.mxu2 %vm901_vm14, %v1750_v27  ;;  %v5896_v25 = vsub.f32 1.0, %v668_v57 }
 0x537   : > { %v2868_v17 = vrot.slane %v5836_v40, 7  ;;  %v4387_v62 = vpack.i.bf16 %v5836_v40, %v5832_v53  ;;  %v2916_v59 = vrot.slane %v5836_v40, 1  ;;  %7611 = vst [vmem:[#allocation5_spill] sm:$0xff] %v5896_v25 }
 0x539   : > { %v5850_v63 = vsel %vm2034_vm15, %v7532_v0, %v2868_v17  ;;  %4388 = vrot.lane.b32.xlu2 %v4387_v62, %s4897_s23  ;;  %v2945_v48 = vsel %vm2083_vm0, %v7531_v34, %v2916_v59 }
 0x53a   : > { %v1731_v12 = vpop.f32.mrf.mxu3  ;;  %v2947_v21 = vmul.f32 %v2945_v48, %v5862_v6 }
 0x53b   : > { %v671_v18 = vpop.xlane.xlu1 %670 }
 0x53c   : > { %v5899_v27 = vsub.f32 1.0, %v671_v18 }
 0x53e   : > { %7612 = vst [vmem:[#allocation2_spill] sm:$0xff] %v5899_v27 }
 0x542   : > { %v1733_v46 = vpop.f32.mrf.mxu3 }
 0x543   : > { %v1751_v45 = vpack.c.bf16 %v1733_v46, %v1731_v12  ;;  %v1349_v46 = vadd.f32 %v5826_v58, %v1315_v8 }
 0x545   : > { %4105 = vmatmul.msk.bf16.gmra.mxu2 %vm901_vm14, %v1751_v45  ;;  %v674_v45 = vpop.xlane.xlu0 %673 }
 0x54c   : > { %v1798_v30 = vpop.f32.mrf.mxu2 }
 0x54d   : > { %v1736_v52 = vpop.f32.mrf.mxu3  ;;  %v5858_v15 = vadd.f32 %v1798_v30, %v1346_v9 }
 0x54f   : > { %v2869_v2 = vrot.slane %v5858_v15, 7  ;;  %v2917_v28 = vrot.slane %v5858_v15, 1 }
 0x551   : > { %v5872_v44 = vsel %vm2034_vm15, %v2868_v17, %v2869_v2  ;;  %v2944_v61 = vsel %vm2083_vm0, %v2916_v59, %v2917_v28 }
 0x552   : > { %v2948_v20 = vmul.f32 %v2944_v61, %v5860_v14 }
 0x554   : > { %v1800_v50 = vpop.f32.mrf.mxu2  ;;  %v4392_v7 = vpack.i.bf16 %v2948_v20, %v2947_v21 }
 0x555   : > { %v1738_v19 = vpop.f32.mrf.mxu3  ;;  %v5879_v23 = vadd.f32 %v1800_v50, %v1347_v26  ;;  %v677_v26 = vpop.xlane.xlu2 %676  ;;  %v5932_v50 = vsub.f32 1.0, %v674_v45 }
 0x556   : > { %v1752_v39 = vpack.c.bf16 %v1738_v19, %v1736_v52  ;;  %4393 = vrot.lane.b32.xlu1 %v4392_v7, %s4894_s27  ;;  %v1318_v52 = vpop.f32.mrf.mxu0  ;;  %v5934_v19 = vpop.xlane.xlu0 %583  ;;  %v5936_v7 = vsub.f32 1.0, %v677_v26 }
 0x557   : > { %v2870_v16 = vrot.slane %v5879_v23, 7  ;;  %v2918_v41 = vrot.slane %v5879_v23, 1  ;;  %v4397_v47 = vpack.i.bf16 %v5879_v23, %v5858_v15  ;;  %v1350_v61 = vadd.f32 %v5826_v58, %v1318_v52  ;;  %7613 = vst [vmem:[#allocation8_spill] sm:$0xff] %v5932_v50  ;;  %v5970_v52 = vpop.xlane.xlu1 %580 }
 0x558   : > { %4106 = vmatmul.msk.bf16.gmra.mxu2 %vm901_vm14, %v1752_v39  ;;  %7614 = vst [vmem:[#allocation11_spill] sm:$0xff] %v5936_v7 }
 0x559   : > { %v5888_v35 = vsel %vm2034_vm15, %v2869_v2, %v2870_v16  ;;  %v2943_v42 = vsel %vm2083_vm0, %v2917_v28, %v2918_v41 }
 0x55a   : > { %v2949_v38 = vmul.f32 %v2943_v42, %v5896_v25 }
 0x55c   : > { %v1803_v13 = vpop.f32.mrf.mxu2 }
 0x55d   : > { %v1741_v29 = vpop.f32.mrf.mxu3  ;;  %v5894_v60 = vadd.f32 %v1803_v13, %v1348_v31 }
 0x55e   : > { %4398 = vrot.lane.b32.xlu1 %v4397_v47, %s4897_s23 }
 0x55f   : > { %v2871_v3 = vrot.slane %v5894_v60, 7  ;;  %v2919_v51 = vrot.slane %v5894_v60, 1 }
 0x561   : > { %v5907_v17 = vsel %vm2034_vm15, %v2870_v16, %v2871_v3  ;;  %v2942_v62 = vsel %vm2083_vm0, %v2918_v41, %v2919_v51  ;;  %v1320_v41 = vpop.f32.mrf.mxu0 }
 0x562   : > { %v2950_v12 = vmul.f32 %v2942_v62, %v5899_v27  ;;  %v1351_v57 = vadd.f32 %v5826_v58, %v1320_v41 }
 0x564   : > { %v1805_v33 = vpop.f32.mrf.mxu2  ;;  %v4402_v59 = vpack.i.bf16 %v2950_v12, %v2949_v38  ;;  %v680_v12 = vpop.xlane.xlu0 %679 }
 0x565   : > { %v1743_v9 = vpop.f32.mrf.mxu3  ;;  %v5914_v36 = vadd.f32 %v1805_v33, %v1349_v46 }
 0x566   : > { %v1753_v30 = vpack.c.bf16 %v1743_v9, %v1741_v29  ;;  %4403 = vrot.lane.b32.xlu0 %v4402_v59, %s4894_s27 }
 0x567   : > { %v2872_v49 = vrot.slane %v5914_v36, 7  ;;  %v4407_v2 = vpack.i.bf16 %v5914_v36, %v5894_v60  ;;  %v2920_v21 = vrot.slane %v5914_v36, 1 }
 0x568   : > { %4107 = vmatmul.msk.bf16.gmra.mxu2 %vm901_vm14, %v1753_v30  ;;  %v5968_v30 = vpop.xlane.xlu2 %589  ;;  %vm2244_vm14 = vcmask 261120  }
 0x569   : > { %v5925_v48 = vsel %vm2034_vm15, %v2871_v3, %v2872_v49  ;;  %4408 = vrot.lane.b32.xlu1 %v4407_v2, %s4897_s23  ;;  %v2941_v31 = vsel %vm2083_vm0, %v2919_v51, %v2920_v21 }
 0x56a   : > { %v2951_v29 = vmul.f32 %v2941_v31, %v5932_v50 }
 0x56c   : > { %v1808_v20 = vpop.f32.mrf.mxu2  ;;  %v683_v45 = vpop.xlane.xlu0 %682 }
 0x56d   : > { %v5930_v55 = vadd.f32 %v1808_v20, %v1350_v61 }
 0x56f   : > { %v2873_v39 = vrot.slane %v5930_v55, 7  ;;  %v2921_v16 = vrot.slane %v5930_v55, 1 }
 0x570   : > { %v5974_v61 = vpop.xlane.xlu2 %592 }
 0x571   : > { %v5944_v18 = vsel %vm2034_vm15, %v2872_v49, %v2873_v39  ;;  %v2940_v13 = vsel %vm2083_vm0, %v2920_v21, %v2921_v16  ;;  %v1323_v49 = vpop.f32.mrf.mxu0  ;;  %v686_v21 = vpop.xlane.xlu1 %685 }
 0x572   : > { %v2952_v47 = vmul.f32 %v2940_v13, %v5936_v7  ;;  %v6032_v24 = vsub.f32 1.0, %v686_v21 }
 0x574   : > { %v1810_v8 = vpop.f32.mrf.mxu2  ;;  %v4412_v3 = vpack.i.bf16 %v2952_v47, %v2951_v29  ;;  %v5964_v33 = vpop.xlane.xlu0 %586  ;;  %v5984_v47 = vsub.f32 1.0, %v680_v12  ;;  %7618 = vst [vmem:[#allocation15_spill] sm:$0xff] %v6032_v24 }
 0x575   : > { %v5951_v42 = vadd.f32 %v1810_v8, %v1351_v57  ;;  %v5986_v57 = vsub.f32 1.0, %v683_v45 }
 0x576   : > { %4413 = vrot.lane.b32.xlu2 %v4412_v3, %s4894_s27  ;;  %7615 = vst [vmem:[#allocation12_spill] sm:$0xff] %v5984_v47 }
 0x577   : > { %v2874_v51 = vrot.slane %v5951_v42, 7  ;;  %v4417_v46 = vpack.i.bf16 %v5951_v42, %v5930_v55  ;;  %v2922_v41 = vrot.slane %v5951_v42, 1  ;;  %7616 = vst [vmem:[#allocation13_spill] sm:$0xff] %v5986_v57 }
 0x578   : > { %v5979_v31 = vpop.xlane.xlu2 %595 }
 0x579   : > { %v5959_v38 = vsel %vm2034_vm15, %v2873_v39, %v2874_v51  ;;  %v1325_v20 = vpop.f32.mrf.mxu0  ;;  %v1352_v39 = vadd.f32 %v5826_v58, %v1323_v49  ;;  %v5988_v8 = vpop.xlane.xlu1 %601  ;;  %v2939_v49 = vsel %vm2083_vm0, %v2921_v16, %v2922_v41 }
 0x57a   : > { %v2953_v45 = vmul.f32 %v2939_v49, %v5984_v47  ;;  %v1353_v28 = vadd.f32 %v5826_v58, %v1325_v20  ;;  %v4349_v20 = vld [vmem:[%s7507_s5 + $0x88] sm:$0xff] }
 0x57b   : > { %3194 = vmatpush.bf16.msra.mxu2 %v4349_v20 }
 0x57c   : > { %v689_v9 = vpop.xlane.xlu0 %688 }
 0x57d   : > { %v6030_v56 = vsub.f32 1.0, %v689_v9  ;;  %v4348_v9 = vld [vmem:[%s7507_s5 + $0x80] sm:$0xff] }
 0x57e   : > { %4418 = vrot.lane.b32.xlu2 %v4417_v46, %s4897_s23 }
 0x57f   : > { %7617 = vst [vmem:[#allocation14_spill] sm:$0xff] %v6030_v56  ;;  %3195 = vmatpush.bf16.msra.mxu2 %v4348_v9  ;;  %v6068_v9 = vsub.f32 1.0, %v5968_v30 }
 0x580   : > { %v6005_v62 = vpop.xlane.xlu2 %697 }
 0x581   : > { %v1328_v32 = vpop.f32.mrf.mxu0  ;;  %v6009_v5 = vpop.xlane.xlu1 %604  ;;  %7621 = vst [vmem:[#allocation18_spill] sm:$0xff] %v6068_v9 }
 0x584   : > { %v5966_v59 = vpop.xlane.xlu0 %691 }
 0x589   : > { %v1330_v49 = vpop.f32.mrf.mxu0 }
 0x58c   : > { %v5972_v2 = vpop.xlane.xlu0 %694 }
 0x594   : > { %v5976_v26 = vpop.xlane.xlu0 %598 }
 0x59c   : > { %v5994_v54 = vpop.xlane.xlu0 %700 }
 0x5b8   : > { %v1813_v13 = vpop.f32.mrf.mxu2 }
 0x5b9   : > { %v5982_v29 = vadd.f32 %v1813_v13, %v1352_v39 }
 0x5bb   : > { %v2875_v3 = vrot.slane %v5982_v29, 7  ;;  %v2923_v46 = vrot.slane %v5982_v29, 1 }
 0x5bd   : > { %v5998_v39 = vsel %vm2034_vm15, %v2874_v51, %v2875_v3  ;;  %v2938_v12 = vsel %vm2083_vm0, %v2922_v41, %v2923_v46 }
 0x5be   : > { %v2954_v13 = vmul.f32 %v2938_v12, %v5986_v57  ;;  %v1354_v12 = vadd.f32 %v5826_v58, %v1328_v32 }
 0x5c0   : > { %v1815_v34 = vpop.f32.mrf.mxu2  ;;  %v4422_v16 = vpack.i.bf16 %v2954_v13, %v2953_v45 }
 0x5c1   : > { %v6007_v0 = vadd.f32 %v1815_v34, %v1353_v28  ;;  %v6022_v28 = vpop.xlane.xlu0 %607 }
 0x5c2   : > { %4423 = vrot.lane.b32.xlu0 %v4422_v16, %s4894_s27  ;;  %v6026_v16 = vpop.xlane.xlu2 %703 }
 0x5c3   : > { %v2876_v51 = vrot.slane %v6007_v0, 7  ;;  %v2924_v34 = vrot.slane %v6007_v0, 1  ;;  %v4427_v13 = vpack.i.bf16 %v6007_v0, %v5982_v29 }
 0x5c5   : > { %v6015_v41 = vsel %vm2034_vm15, %v2875_v3, %v2876_v51  ;;  %v2937_v50 = vsel %vm2083_vm0, %v2923_v46, %v2924_v34  ;;  %v4347_v46 = vld [vmem:[%s7507_s5 + $0x78] sm:$0xff] }
 0x5c6   : > { %3196 = vmatpush.bf16.msra.mxu2 %v4347_v46 }
 0x5c8   : > { %v1818_v45 = vpop.f32.mrf.mxu2  ;;  %v6034_v47 = vpop.permute.xlu1 %4393 }
 0x5c9   : > { %v6028_v3 = vadd.f32 %v1818_v45, %v1354_v12  ;;  %v2955_v12 = vmul.f32 %v2937_v50, %v6032_v24  ;;  %v6053_v7 = vpop.xlane.xlu0 %706 }
 0x5ca   : > { %4428 = vrot.lane.b32.xlu0 %v4427_v13, %s4897_s23  ;;  %v1355_v13 = vadd.f32 %v5826_v58, %v1330_v49 }
 0x5cb   : > { %v2877_v32 = vrot.slane %v6028_v3, 7  ;;  %v2925_v57 = vrot.slane %v6028_v3, 1 }
 0x5cd   : > { %v2936_v20 = vsel %vm2083_vm0, %v2924_v34, %v2925_v57  ;;  %v6048_v21 = vsel %vm2034_vm15, %v2876_v51, %v2877_v32  ;;  %v1333_v34 = vpop.f32.mrf.mxu0  ;;  %v6061_v51 = vpop.permute.xlu2 %4388 }
 0x5ce   : > { %7619 = vst [vmem:[#allocation16_spill] sm:$0xff] %v6048_v21  ;;  %v2956_v45 = vmul.f32 %v2936_v20, %v6030_v56  ;;  %v6065_v20 = vsub.f32 1.0, %v5964_v33  ;;  %v6081_v33 = vsub.f32 1.0, %v5979_v31  ;;  %v1356_v30 = vadd.f32 %v5826_v58, %v1333_v34 }
 0x5cf   : > { %v2902_v21 = vmul.f32 %v5888_v35, %v6068_v9 }
 0x5d0   : > { %v1820_v37 = vpop.f32.mrf.mxu2  ;;  %v4432_v27 = vpack.i.bf16 %v2956_v45, %v2955_v12  ;;  %v4399_v49 = vpop.permute.xlu1 %4398  ;;  %7620 = vst [vmem:[#allocation17_spill] sm:$0xff] %v6065_v20  ;;  %v4346_v12 = vld [vmem:[%s7507_s5 + $0x70] sm:$0xff]  ;;  %v2901_v46 = vmul.f32 %v5872_v44, %v6065_v20  ;;  %v2904_v56 = vmul.f32 %v5925_v48, %v6081_v33  ;;  %v6115_v48 = vsub.f32 1.0, %v5972_v2 }
 0x5d1   : > { %v6058_v25 = vadd.f32 %v1820_v37, %v1355_v13  ;;  %v4400_v45 = vunpack.i.l.bf16 %v4399_v49  ;;  %3197 = vmatpush.bf16.msra.mxu2 %v4346_v12  ;;  %v6078_v13 = vsub.f32 1.0, %v5974_v61  ;;  %7623 = vst [vmem:[#allocation20_spill] sm:$0xff] %v6081_v33 }
 0x5d2   : > { %4433 = vrot.lane.b32.xlu2 %v4432_v27, %s4894_s27  ;;  %v4401_v27 = vunpack.i.h.bf16 %v4399_v49 }
 0x5d3   : > { %v2878_v50 = vrot.slane %v6058_v25, 7  ;;  %v2926_v61 = vrot.slane %v6058_v25, 1  ;;  %v3093_v35 = vsel %vm2244_vm14, %v2901_v46, %v4400_v45  ;;  %v2903_v20 = vmul.f32 %v5907_v17, %v6078_v13 }
 0x5d4   : > { %v3094_v44 = vsel %vm2244_vm14, %v2902_v21, %v4401_v27  ;;  %v4344_v21 = vld [vmem:[%s7507_s5 + $0x60] sm:$0xff] }
 0x5d5   : > { %v6075_v37 = vsel %vm2034_vm15, %v2877_v32, %v2878_v50  ;;  %v4345_v32 = vld [vmem:[%s7507_s5 + $0x68] sm:$0xff]  ;;  %v1335_v49 = vpop.f32.mrf.mxu0  ;;  %v4414_v34 = vpop.permute.xlu2 %4413 }
 0x5d6   : > { %7622 = vst [vmem:[#allocation19_spill] sm:$0xff] %v6075_v37  ;;  %v6093_v37 = vsub.f32 1.0, %v5966_v59  ;;  %3198 = vmatpush.bf16.msra.mxu2 %v4345_v32  ;;  %v4416_v32 = vunpack.i.h.bf16 %v4414_v34 }
 0x5d8   : > { %v4404_v24 = vpop.permute.xlu0 %4403 }
 0x5d9   : > { %v4406_v12 = vunpack.i.h.bf16 %v4404_v24  ;;  %v4405_v31 = vunpack.i.l.bf16 %v4404_v24 }
 0x5da   : > { %3199 = vmatpush.bf16.msra.mxu2 %v4344_v21 }
 0x5db   : > { %v1823_v9 = vpop.f32.mrf.mxu2  ;;  %v6102_v14 = vsel %vm2261_vm1, %v3093_v35, %v4405_v31  ;;  %v6105_v24 = vsel %vm2261_vm1, %v3094_v44, %v4406_v12  ;;  %v4409_v59 = vpop.permute.xlu1 %4408  ;;  %v4415_v31 = vunpack.i.l.bf16 %v4414_v34  ;;  %v2935_v12 = vsel %vm2083_vm0, %v2925_v57, %v2926_v61 }
 0x5dc   : > { %v6112_v45 = vadd.f32 %v1823_v9, %v1356_v30  ;;  %v4411_v17 = vunpack.i.h.bf16 %v4409_v59  ;;  %v4410_v46 = vunpack.i.l.bf16 %v4409_v59 }
 0x5de   : > { %v2879_v44 = vrot.slane %v6112_v45, 7  ;;  %v2927_v35 = vrot.slane %v6112_v45, 1  ;;  %v3096_v33 = vsel %vm2244_vm14, %v2904_v56, %v4411_v17  ;;  %v3095_v27 = vsel %vm2244_vm14, %v2903_v20, %v4410_v46  ;;  %v1338_v17 = vpop.f32.mrf.mxu0 }
 0x5df   : > { %v6124_v9 = vsel %vm2261_vm1, %v3095_v27, %v4415_v31  ;;  %v6127_v2 = vsel %vm2261_vm1, %v3096_v33, %v4416_v32  ;;  %v1357_v56 = vadd.f32 %v5826_v58, %v1335_v49  ;;  %v2957_v20 = vmul.f32 %v2935_v12, %v6093_v37 }
 0x5e0   : > { %v2934_v30 = vsel %vm2083_vm0, %v2926_v61, %v2927_v35  ;;  %v6135_v34 = vsel %vm2034_vm15, %v2878_v50, %v2879_v44  ;;  %v1358_v31 = vadd.f32 %v5826_v58, %v1338_v17 }
 0x5e1   : > { %7624 = vst [vmem:[#allocation21_spill] sm:$0xff] %v6135_v34  ;;  %v2958_v59 = vmul.f32 %v2934_v30, %v6115_v48 }
 0x5e3   : > { %v1825_v21 = vpop.f32.mrf.mxu2  ;;  %v4447_v33 = vpack.i.bf16 %v2958_v59, %v2957_v20  ;;  %v6162_v20 = vsub.f32 1.0, %v5994_v54 }
 0x5e4   : > { %v6140_v27 = vadd.f32 %v1825_v21, %v1357_v56  ;;  %v6159_v56 = vsub.f32 1.0, %v6005_v62 }
 0x5e5   : > { %4448 = vrot.lane.b32.xlu2 %v4447_v33, %s4894_s27 }
 0x5e6   : > { %v2880_v61 = vrot.slane %v6140_v27, 7  ;;  %v2928_v46 = vrot.slane %v6140_v27, 1  ;;  %v1340_v21 = vpop.f32.mrf.mxu0 }
 0x5e8   : > { %v6149_v49 = vsel %vm2034_vm15, %v2879_v44, %v2880_v61  ;;  %v2933_v32 = vsel %vm2083_vm0, %v2927_v35, %v2928_v46  ;;  %v574_v35 = vsel %vm558_vm2, 1.0, %v7601_v10 }
 0x5e9   : > { %7625 = vst [vmem:[#allocation22_spill] sm:$0xff] %v6149_v49  ;;  %v612_v62 = vsel %vm437_vm12, %v574_v35, 0.0  ;;  %v6175_v17 = vmul.f32 %v2933_v32, %v6159_v56  ;;  %v6192_v32 = vsub.f32 1.0, %v6026_v16  ;;  %v6195_v35 = vsub.f32 1.0, %v6053_v7 }
 0x5ea   : > { %v4396_v16 = vunpack.i.h.bf16 %v6034_v47  ;;  %v7627_v7 = vrot.slane %v5832_v53, 7 }
 0x5eb   : > { %v1828_v12 = vpop.f32.mrf.mxu2 }
 0x5ec   : > { %v6156_v30 = vadd.f32 %v1828_v12, %v1358_v31  ;;  %v1359_v31 = vadd.f32 %v5826_v58, %v1340_v21  ;;  %v6182_v12 = vsub.f32 1.0, %v5934_v19 }
 0x5ee   : > { %v2881_v44 = vrot.slane %v6156_v30, 7  ;;  %v2929_v59 = vrot.slane %v6156_v30, 1 }
 0x5f0   : > { %v2932_v33 = vsel %vm2083_vm0, %v2928_v46, %v2929_v59  ;;  %v6171_v11 = vsel %vm2034_vm15, %v2880_v61, %v2881_v44  ;;  %v6189_v61 = vsub.f32 1.0, %v5970_v52  ;;  %v2900_v52 = vmul.f32 %v5850_v63, %v6182_v12 }
 0x5f1   : > { %7626 = vst [vmem:[#allocation23_spill] sm:$0xff] %v6171_v11  ;;  %v6178_v54 = vmul.f32 %v2932_v33, %v6162_v20  ;;  %v4391_v33 = vunpack.i.h.bf16 %v6061_v51  ;;  %v7628_v46 = vrot.slane %v5832_v53, 1  ;;  %v4390_v11 = vunpack.i.l.bf16 %v6061_v51  ;;  %v7650_v51 = vld [vmem:[#allocation11_spill] sm:$0xff] }
 0x5f3   : > { %v1830_v50 = vpop.f32.mrf.mxu2 }
 0x5f4   : > { %v6186_v57 = vadd.f32 %v1830_v50, %v1359_v31  ;;  %613 = vadd.xlane.f32.xlu0 %v612_v62 }
 0x5f6   : > { %v2882_v58 = vrot.slane %v6186_v57, 7  ;;  %v2930_v19 = vrot.slane %v6186_v57, 1  ;;  %v1872_v21 = vpack.c.bf16 %v6186_v57, %v6156_v30 }
 0x5f8   : > { %v2898_v62 = vsel %vm2034_vm15, %v2882_v58, %v7627_v7  ;;  %1921 = vmatpush.bf16.msra.mxu0 %v1872_v21  ;;  %v2931_v31 = vsel %vm2083_vm0, %v2929_v59, %v2930_v19  ;;  %v2946_v50 = vsel %vm2083_vm0, %v2930_v19, %v7628_v46  ;;  %v6219_v63 = vsel %vm2034_vm15, %v2881_v44, %v2882_v58 }
 0x5f9   : > { %7629 = vst [vmem:[#allocation24_spill] sm:$0xff] %v6219_v63  ;;  %v2899_v34 = vmul.f32 %v2898_v62, %v6189_v61  ;;  %v6224_v49 = vmul.f32 %v2931_v31, %v6192_v32  ;;  %v6227_v21 = vmul.f32 %v2946_v50, %v6195_v35  ;;  %v4395_v59 = vunpack.i.l.bf16 %v6034_v47 }
 0x5fa   : > { %v1871_v7 = vpack.c.bf16 %v6140_v27, %v6112_v45  ;;  %v3092_v46 = vsel %vm2244_vm14, %v2900_v52, %v4391_v33  ;;  %v1870_v47 = vpack.c.bf16 %v6058_v25, %v6028_v3  ;;  %v1869_v52 = vpack.c.bf16 %v6007_v0, %v5982_v29 }
 0x5fb   : > { %v3091_v44 = vsel %vm2244_vm14, %v2899_v34, %v4390_v11  ;;  %v3108_v58 = vsel %vm2261_vm1, %v3092_v46, %v4396_v16  ;;  %v4442_v34 = vpack.i.bf16 %v6058_v25, %v6028_v3  ;;  %v7630_v11 = vpack.c.bf16 %v5951_v42, %v5930_v55  ;;  %v4324_v25 = vld [vmem:[%s7503_s1] sm:$0xff]  ;;  %v4326_v3 = vld [vmem:[%s7503_s1 + $0x10] sm:$0xff] }
 0x5fc   : > { %1922 = vmatpush.bf16.msra.mxu0 %v1871_v7  ;;  %v3107_v19 = vsel %vm2261_vm1, %v3091_v44, %v4395_v59  ;;  %v7631_v33 = vpack.c.bf16 %v5914_v36, %v5894_v60  ;;  %v7632_v16 = vpack.c.bf16 %v6105_v24, %v6102_v14  ;;  %v7633_v0 = vpack.c.bf16 %v5879_v23, %v5858_v15  ;;  %v4325_v14 = vld [vmem:[%s7503_s1 + $0x8] sm:$0xff]  ;;  %v4419_v23 = vpop.permute.xlu2 %4418 }
 0x5fd   : > { %v3123_v50 = vpack.c.bf16 %v3108_v58, %v3107_v19  ;;  %v7634_v55 = vpack.c.bf16 %v5836_v40, %v5832_v53  ;;  %v7635_v60 = vpack.c.bf16 %v6127_v2, %v6124_v9  ;;  %v576_v15 = vsel %vm560_vm4, 1.0, %v7601_v10 }
 0x5fe   : > { %v618_v53 = vsel %vm437_vm12, %v576_v15, 0.0  ;;  %v6277_v40 = vsub.f32 1.0, %v5976_v26  ;;  %v6280_v36 = vsub.f32 1.0, %v5988_v8  ;;  %v4421_v42 = vunpack.i.h.bf16 %v4419_v23 }
 0x5ff   : > { %4228 = vmatmul.msk.bf16.vlgmr.msra.gmra.mxu2 %vm2323_vm3, %v3123_v50  ;;  %v4420_v29 = vunpack.i.l.bf16 %v4419_v23  ;;  %v6294_v46 = vsub.f32 1.0, %v6009_v5 }
 0x600   : > { %1923 = vmatpush.bf16.msra.mxu0 %v1870_v47  ;;  %7636 = vst [vmem:[#allocation25_spill] sm:$0xff] %v6280_v36  ;;  %v2905_v22 = vmul.f32 %v5944_v18, %v6277_v40  ;;  %v2906_v24 = vmul.f32 %v5959_v38, %v6280_v36  ;;  %v6297_v18 = vsub.f32 1.0, %v6022_v28 }
 0x601   : > { %7637 = vst [vmem:[#allocation26_spill] sm:$0xff] %v6294_v46  ;;  %v2907_v58 = vmul.f32 %v5998_v39, %v6294_v46  ;;  %v4327_v39 = vld [vmem:[%s7503_s1 + $0x18] sm:$0xff] }
 0x602   : > { %v3097_v62 = vsel %vm2244_vm14, %v2905_v22, %v4420_v29  ;;  %v3098_v8 = vsel %vm2244_vm14, %v2906_v24, %v4421_v42  ;;  %7638 = vst [vmem:[#allocation27_spill] sm:$0xff] %v6297_v18  ;;  %v2908_v19 = vmul.f32 %v6015_v41, %v6297_v18  ;;  %v4328_v41 = vld [vmem:[%s7503_s1 + $0x20] sm:$0xff] }
 0x604   : > { %1924 = vmatpush.bf16.msra.mxu0 %v1869_v52 }
 0x608   : > { %4443 = vrot.lane.b32.xlu0 %v4442_v34, %s4897_s23  ;;  %1925 = vmatpush.bf16.msra.mxu0 %v7630_v11 }
 0x60c   : > { %1926 = vmatpush.bf16.msra.mxu0 %v7631_v33 }
 0x60f   : > { %4229 = vmatmul.msk.bf16.gmra.mxu2 %vm2323_vm3, %v7632_v16 }
 0x610   : > { %1927 = vmatpush.bf16.msra.mxu0 %v7633_v0  ;;  %v4329_v0 = vld [vmem:[%s7503_s1 + $0x28] sm:$0xff] }
 0x614   : > { %1928 = vmatpush.bf16.msra.mxu0 %v7634_v55  ;;  %v6322_v55 = vperm.slane %v5822_v43, 2 }
 0x616   : > { %7639 = vst [vmem:[#allocation28_spill] sm:$0xff] %v6322_v55 }
 0x617   : > { %1929 = vmatmul.bf16.vlgmr.msra.gmra.mxu0 %v4324_v25  ;;  %v4330_v25 = vld [vmem:[%s7503_s1 + $0x30] sm:$0xff] }
 0x61f   : > { %4230 = vmatmul.msk.bf16.gmra.mxu2 %vm2323_vm3, %v7635_v60 }
 0x627   : > { %1934 = vmatmul.bf16.gmra.mxu0 %v4325_v14  ;;  %v4331_v14 = vld [vmem:[%s7503_s1 + $0x38] sm:$0xff] }
 0x62c   : > { %v4434_v38 = vpop.permute.xlu2 %4433 }
 0x62d   : > { %v4436_v52 = vunpack.i.h.bf16 %v4434_v38  ;;  %v4435_v34 = vunpack.i.l.bf16 %v4434_v38 }
 0x632   : > { %619 = vadd.xlane.f32.xlu0 %v618_v53 }
 0x634   : > { %v4424_v9 = vpop.permute.xlu0 %4423 }
 0x635   : > { %v4426_v2 = vunpack.i.h.bf16 %v4424_v9  ;;  %v4425_v26 = vunpack.i.l.bf16 %v4424_v9 }
 0x637   : > { %v3113_v31 = vsel %vm2261_vm1, %v3097_v62, %v4425_v26  ;;  %v3114_v59 = vsel %vm2261_vm1, %v3098_v8, %v4426_v2  ;;  %1939 = vmatmul.bf16.gmra.mxu0 %v4326_v3 }
 0x638   : > { %v3126_v7 = vpack.c.bf16 %v3114_v59, %v3113_v31 }
 0x63a   : > { %4231 = vmatmul.msk.bf16.gmra.mxu2 %vm2323_vm3, %v3126_v7 }
 0x63c   : > { %v4429_v44 = vpop.permute.xlu0 %4428 }
 0x63d   : > { %v4431_v50 = vunpack.i.h.bf16 %v4429_v44  ;;  %v4430_v47 = vunpack.i.l.bf16 %v4429_v44 }
 0x63f   : > { %v3100_v5 = vsel %vm2244_vm14, %v2908_v19, %v4431_v50  ;;  %v3099_v11 = vsel %vm2244_vm14, %v2907_v58, %v4430_v47 }
 0x640   : > { %v3115_v28 = vsel %vm2261_vm1, %v3099_v11, %v4435_v34  ;;  %v3116_v33 = vsel %vm2261_vm1, %v3100_v5, %v4436_v52 }
 0x641   : > { %v3127_v16 = vpack.c.bf16 %v3116_v33, %v3115_v28 }
 0x647   : > { %1944 = vmatmul.bf16.gmra.mxu0 %v4327_v39 }
 0x64a   : > { %4232 = vmatmul.msk.bf16.gmra.mxu2 %vm2323_vm3, %v3127_v16 }
 0x657   : > { %1949 = vmatmul.bf16.gmra.mxu0 %v4328_v41 }
 0x667   : > { %1954 = vmatmul.bf16.gmra.mxu0 %v4329_v0 }
 0x677   : > { %1959 = vmatmul.bf16.gmra.mxu0 %v4330_v25 }
 0x682   : > { %v3201_v60 = vpop.f32.mrf.mxu2 }
 0x683   : > { %v3202_v15 = vadd.f32 %v3201_v60, %v6322_v55 }
 0x685   : > { %v3257_v23 = vmul.f32 0.2, %v3202_v15  ;;  %vm3241_vm5 = vcmp.gt.f32.partialorder %v3202_v15, 0.0 }
 0x687   : > { %1964 = vmatmul.bf16.gmra.mxu0 %v4331_v14  ;;  %v6329_v29 = vsel %vm3241_vm5, %v3202_v15, %v3257_v23 }
 0x688   : > { %v7557_v43 = vrot.slane %v6329_v29, 7 }
 0x68a   : > { %v3203_v53 = vpop.f32.mrf.mxu2 }
 0x68b   : > { %v3204_v42 = vadd.f32 %v3203_v53, %v6322_v55 }
 0x68d   : > { %vm3242_vm6 = vcmp.gt.f32.partialorder %v3204_v42, 0.0  ;;  %v3258_v3 = vmul.f32 0.2, %v3204_v42 }
 0x68f   : > { %v6331_v22 = vsel %vm3242_vm6, %v3204_v42, %v3258_v3  ;;  %v7643_v3 = vld [vmem:[#allocation6_spill] sm:$0xff] }
 0x690   : > { %v3290_v24 = vrot.slane %v6331_v22, 7 }
 0x692   : > { %v3206_v9 = vpop.f32.mrf.mxu2  ;;  %v6339_v2 = vsel %vm2034_vm15, %v7557_v43, %v3290_v24 }
 0x693   : > { %7640 = vst [vmem:[#allocation29_spill] sm:$0xff] %v6339_v2  ;;  %v3207_v26 = vadd.f32 %v3206_v9, %v6322_v55 }
 0x694   : > { %v6342_v62 = vpop.f32.mrf.mxu0 }
 0x695   : > { %vm3243_vm7 = vcmp.gt.f32.partialorder %v3207_v26, 0.0  ;;  %v3259_v8 = vmul.f32 0.2, %v3207_v26  ;;  %v7559_v33 = vrot.slane %v6342_v62, 1 }
 0x697   : > { %v6344_v31 = vsel %vm3243_vm7, %v3207_v26, %v3259_v8 }
 0x698   : > { %v3291_v59 = vrot.slane %v6344_v31, 7 }
 0x69a   : > { %v3208_v7 = vpop.f32.mrf.mxu2  ;;  %v6349_v38 = vsel %vm2034_vm15, %v3290_v24, %v3291_v59 }
 0x69b   : > { %7641 = vst [vmem:[#allocation30_spill] sm:$0xff] %v6349_v38  ;;  %v3209_v44 = vadd.f32 %v3208_v7, %v6322_v55 }
 0x69c   : > { %v6352_v58 = vpop.f32.mrf.mxu0 }
 0x69d   : > { %vm3244_vm8 = vcmp.gt.f32.partialorder %v3209_v44, 0.0  ;;  %v3260_v19 = vmul.f32 0.2, %v3209_v44  ;;  %v4437_v50 = vpack.i.bf16 %v6352_v58, %v6342_v62  ;;  %v2068_v34 = vrot.slane %v6352_v58, 1 }
 0x69e   : > { %v7560_v16 = vrot.slane %v6352_v58, 7 }
 0x69f   : > { %v6356_v47 = vsel %vm3244_vm8, %v3209_v44, %v3260_v19  ;;  %4438 = vrot.lane.b32.xlu1 %v4437_v50, %s4897_s23  ;;  %v2098_v60 = vsel %vm2083_vm0, %v7559_v33, %v2068_v34 }
 0x6a0   : > { %v3292_v52 = vrot.slane %v6356_v47, 7  ;;  %v2100_v42 = vmul.f32 %v2098_v60, %v5862_v6 }
 0x6a2   : > { %v3211_v5 = vpop.f32.mrf.mxu2  ;;  %v6363_v11 = vsel %vm2034_vm15, %v3291_v59, %v3292_v52 }
 0x6a3   : > { %7642 = vst [vmem:[#allocation31_spill] sm:$0xff] %v6363_v11  ;;  %v3212_v28 = vadd.f32 %v3211_v5, %v6322_v55 }
 0x6a4   : > { %v6368_v39 = vpop.f32.mrf.mxu0 }
 0x6a5   : > { %vm3245_vm9 = vcmp.gt.f32.partialorder %v3212_v28, 0.0  ;;  %v3261_v41 = vmul.f32 0.2, %v3212_v28  ;;  %v7558_v0 = vrot.slane %v6368_v39, 7  ;;  %v2069_v25 = vrot.slane %v6368_v39, 1 }
 0x6a7   : > { %v6376_v14 = vsel %vm3245_vm9, %v3212_v28, %v3261_v41  ;;  %v6384_v15 = vsel %vm2034_vm15, %v7560_v16, %v7558_v0  ;;  %v2097_v23 = vsel %vm2083_vm0, %v2068_v34, %v2069_v25 }
 0x6a8   : > { %v3293_v53 = vrot.slane %v6376_v14, 7  ;;  %v2101_v24 = vmul.f32 %v2097_v23, %v7643_v3  ;;  %v7646_v23 = vld [vmem:[#allocation5_spill] sm:$0xff] }
 0x6aa   : > { %v3213_v9 = vpop.f32.mrf.mxu2  ;;  %v6393_v26 = vsel %vm2034_vm15, %v3292_v52, %v3293_v53  ;;  %v4452_v59 = vpack.i.bf16 %v2101_v24, %v2100_v42  ;;  %v7647_v24 = vld [vmem:[#allocation2_spill] sm:$0xff] }
 0x6ab   : > { %7644 = vst [vmem:[#allocation6_spill] sm:$0xff] %v6393_v26  ;;  %v3214_v8 = vadd.f32 %v3213_v9, %v6322_v55 }
 0x6ac   : > { %v6396_v7 = vpop.f32.mrf.mxu0  ;;  %4453 = vrot.lane.b32.xlu2 %v4452_v59, %s4894_s27 }
 0x6ad   : > { %vm3246_vm10 = vcmp.gt.f32.partialorder %v3214_v8, 0.0  ;;  %v3262_v44 = vmul.f32 0.2, %v3214_v8  ;;  %v2070_v34 = vrot.slane %v6396_v7, 1 }
 0x6af   : > { %v6399_v19 = vsel %vm3246_vm10, %v3214_v8, %v3262_v44  ;;  %v2096_v41 = vsel %vm2083_vm0, %v2069_v25, %v2070_v34  ;;  %v7648_v25 = vld [vmem:[#allocation4_spill] sm:$0xff] }
 0x6b0   : > { %v3294_v50 = vrot.slane %v6399_v19, 7  ;;  %v2102_v42 = vmul.f32 %v2096_v41, %v7646_v23  ;;  %vm557_vm13 = vcmp.eq.s32.totalorder %v7648_v25, %v4961_v4 }
 0x6b2   : > { %v6405_v5 = vsel %vm2034_vm15, %v3293_v53, %v3294_v50 }
 0x6b3   : > { %7645 = vst [vmem:[#allocation32_spill] sm:$0xff] %v6405_v5  ;;  %v7651_v5 = vld [vmem:[#allocation8_spill] sm:$0xff] }
 0x6b4   : > { %v6407_v52 = vpop.f32.mrf.mxu0 }
 0x6b5   : > { %v2071_v28 = vrot.slane %v6407_v52, 1 }
 0x6b7   : > { %v2095_v60 = vsel %vm2083_vm0, %v2070_v34, %v2071_v28 }
 0x6b8   : > { %v2103_v9 = vmul.f32 %v2095_v60, %v7647_v24 }
 0x6ba   : > { %v4462_v8 = vpack.i.bf16 %v2103_v9, %v2102_v42  ;;  %v573_v42 = vsel %vm557_vm13, 1.0, %v7601_v10 }
 0x6bc   : > { %v6416_v59 = vpop.f32.mrf.mxu0  ;;  %4463 = vrot.lane.b32.xlu2 %v4462_v8, %s4894_s27 }
 0x6bd   : > { %v3216_v53 = vpop.f32.mrf.mxu2  ;;  %v2072_v0 = vrot.slane %v6416_v59, 1 }
 0x6be   : > { %v3217_v44 = vadd.f32 %v3216_v53, %v6322_v55 }
 0x6bf   : > { %v2094_v9 = vsel %vm2083_vm0, %v2071_v28, %v2072_v0 }
 0x6c0   : > { %vm3247_vm11 = vcmp.gt.f32.partialorder %v3217_v44, 0.0  ;;  %v3263_v43 = vmul.f32 0.2, %v3217_v44  ;;  %v2104_v28 = vmul.f32 %v2094_v9, %v7651_v5 }
 0x6c2   : > { %v6423_v34 = vsel %vm3247_vm11, %v3217_v44, %v3263_v43  ;;  %v609_v44 = vsel %vm437_vm12, %v573_v42, 0.0 }
 0x6c3   : > { %v3295_v41 = vrot.slane %v6423_v34, 7 }
 0x6c4   : > { %v6426_v60 = vpop.f32.mrf.mxu0 }
 0x6c5   : > { %v2073_v8 = vrot.slane %v6426_v60, 1  ;;  %v3218_v53 = vpop.f32.mrf.mxu2  ;;  %v6434_v33 = vsel %vm2034_vm15, %v3294_v50, %v3295_v41 }
 0x6c6   : > { %7649 = vst [vmem:[#allocation5_spill] sm:$0xff] %v6434_v33  ;;  %v3219_v25 = vadd.f32 %v3218_v53, %v6322_v55 }
 0x6c7   : > { %v2093_v43 = vsel %vm2083_vm0, %v2072_v0, %v2073_v8 }
 0x6c8   : > { %v2105_v16 = vmul.f32 %v2093_v43, %v7650_v51  ;;  %vm3248_vm2 = vcmp.gt.f32.partialorder %v3219_v25, 0.0  ;;  %v3264_v2 = vmul.f32 0.2, %v3219_v25 }
 0x6c9   : > { %610 = vadd.xlane.f32.xlu1 %v609_v44 }
 0x6ca   : > { %v6442_v26 = vsel %vm3248_vm2, %v3219_v25, %v3264_v2  ;;  %v4472_v11 = vpack.i.bf16 %v2105_v16, %v2104_v28 }
 0x6cb   : > { %7652 = vst [vmem:[#allocation2_spill] sm:$0xff] %v6442_v26  ;;  %v3296_v50 = vrot.slane %v6442_v26, 7 }
 0x6cc   : > { %v6445_v33 = vpop.f32.mrf.mxu0  ;;  %4473 = vrot.lane.b32.xlu2 %v4472_v11, %s4894_s27 }
 0x6cd   : > { %v3221_v53 = vpop.f32.mrf.mxu2  ;;  %v6451_v42 = vsel %vm2034_vm15, %v3295_v41, %v3296_v50  ;;  %v4477_v9 = vpack.i.bf16 %v6445_v33, %v6426_v60  ;;  %v2074_v16 = vrot.slane %v6445_v33, 1 }
 0x6ce   : > { %v3222_v0 = vadd.f32 %v3221_v53, %v6322_v55  ;;  %7653 = vst [vmem:[#allocation4_spill] sm:$0xff] %v6451_v42 }
 0x6cf   : > { %v2092_v11 = vsel %vm2083_vm0, %v2073_v8, %v2074_v16 }
 0x6d0   : > { %vm3249_vm4 = vcmp.gt.f32.partialorder %v3222_v0, 0.0  ;;  %v3265_v2 = vmul.f32 0.2, %v3222_v0 }
 0x6d2   : > { %v6456_v25 = vsel %vm3249_vm4, %v3222_v0, %v3265_v2  ;;  %v7656_v2 = vld [vmem:[#allocation13_spill] sm:$0xff] }
 0x6d3   : > { %7654 = vst [vmem:[#allocation11_spill] sm:$0xff] %v6456_v25  ;;  %v3297_v43 = vrot.slane %v6456_v25, 7 }
 0x6d4   : > { %v6459_v44 = vpop.f32.mrf.mxu0  ;;  %4478 = vrot.lane.b32.xlu2 %v4477_v9, %s4897_s23  ;;  %v7657_v9 = vld [vmem:[#allocation12_spill] sm:$0xff] }
 0x6d5   : > { %v2075_v41 = vrot.slane %v6459_v44, 1  ;;  %v3223_v28 = vpop.f32.mrf.mxu2  ;;  %v6467_v53 = vsel %vm2034_vm15, %v3296_v50, %v3297_v43  ;;  %v2106_v26 = vmul.f32 %v2092_v11, %v7657_v9  ;;  %v7570_v50 = vrot.slane %v6459_v44, 7  ;;  %v4336_v11 = vld [vmem:[%s7507_s5 + $0x20] sm:$0xff] }
 0x6d6   : > { %7655 = vst [vmem:[#allocation8_spill] sm:$0xff] %v6467_v53  ;;  %v3224_v42 = vadd.f32 %v3223_v28, %v6322_v55  ;;  %v7667_v55 = vld [vmem:[#allocation14_spill] sm:$0xff] }
 0x6d7   : > { %v2091_v0 = vsel %vm2083_vm0, %v2074_v16, %v2075_v41 }
 0x6d8   : > { %v2107_v25 = vmul.f32 %v2091_v0, %v7656_v2  ;;  %vm3250_vm5 = vcmp.gt.f32.partialorder %v3224_v42, 0.0  ;;  %v3266_v38 = vmul.f32 0.2, %v3224_v42 }
 0x6da   : > { %v6474_v63 = vsel %vm3250_vm5, %v3224_v42, %v3266_v38  ;;  %v4492_v8 = vpack.i.bf16 %v2107_v25, %v2106_v26  ;;  %v4337_v26 = vld [vmem:[%s7507_s5 + $0x28] sm:$0xff]  ;;  %v4457_v42 = vpack.i.bf16 %v6396_v7, %v6368_v39 }
 0x6db   : > { %7658 = vst [vmem:[#allocation33_spill] sm:$0xff] %v6474_v63  ;;  %v7569_v18 = vrot.slane %v6474_v63, 7  ;;  %2350 = vmatpush.bf16.msrb.mxu1 %v4337_v26  ;;  %v4467_v26 = vpack.i.bf16 %v6416_v59, %v6407_v52 }
 0x6dc   : > { %v6477_v46 = vpop.f32.mrf.mxu0  ;;  %4493 = vrot.lane.b32.xlu0 %v4492_v8, %s4894_s27  ;;  %v4335_v8 = vld [vmem:[%s7507_s5 + $0x18] sm:$0xff] }
 0x6dd   : > { %v2027_v28 = vrot.slane %v6477_v46, 7  ;;  %v6486_v16 = vsel %vm2034_vm15, %v3297_v43, %v7569_v18 }
 0x6de   : > { %7659 = vst [vmem:[#allocation34_spill] sm:$0xff] %v6486_v16  ;;  %v7664_v16 = vld [vmem:[#allocation7_spill] sm:$0xff] }
 0x6df   : > { %v6492_v38 = vsel %vm2034_vm15, %v7570_v50, %v2027_v28  ;;  %2351 = vmatpush.bf16.msrb.mxu1 %v4336_v11  ;;  %v4333_v50 = vld [vmem:[%s7507_s5 + $0x8] sm:$0xff]  ;;  %vm559_vm6 = vcmp.eq.s32.totalorder %v7664_v16, %v4961_v4 }
 0x6e0   : > { %7660 = vst [vmem:[#allocation35_spill] sm:$0xff] %v6492_v38 }
 0x6e2   : > { %4458 = vrot.lane.b32.xlu1 %v4457_v42, %s4897_s23 }
 0x6e3   : > { %2352 = vmatpush.bf16.msrb.mxu1 %v4335_v8 }
 0x6e4   : > { %v6500_v25 = vpop.f32.mrf.mxu0 }
 0x6e5   : > { %v2028_v43 = vrot.slane %v6500_v25, 7 }
 0x6e7   : > { %v6508_v0 = vsel %vm2034_vm15, %v2027_v28, %v2028_v43  ;;  %v4334_v28 = vld [vmem:[%s7507_s5 + $0x10] sm:$0xff] }
 0x6e8   : > { %7661 = vst [vmem:[#allocation36_spill] sm:$0xff] %v6508_v0  ;;  %2353 = vmatpush.bf16.msrb.mxu1 %v4334_v28  ;;  %v4332_v28 = vld [vmem:[%s7507_s5] sm:$0xff]  ;;  %v7670_v0 = vld [vmem:[#allocation15_spill] sm:$0xff] }
 0x6ea   : > { %4468 = vrot.lane.b32.xlu1 %v4467_v26, %s4897_s23  ;;  %v7663_v26 = vpack.i.bf16 %v6140_v27, %v6112_v45  ;;  %v575_v45 = vsel %vm559_vm6, 1.0, %v7601_v10  ;;  %v2076_v27 = vrot.slane %v6477_v46, 1 }
 0x6eb   : > { %v615_v16 = vsel %vm437_vm12, %v575_v45, 0.0  ;;  %v7668_v45 = vld [vmem:[#allocation9_spill] sm:$0xff] }
 0x6ec   : > { %v6516_v42 = vpop.f32.mrf.mxu0  ;;  %2354 = vmatpush.bf16.msrb.mxu1 %v4333_v50  ;;  %vm561_vm7 = vcmp.eq.s32.totalorder %v7668_v45, %v4961_v4 }
 0x6ed   : > { %v2029_v18 = vrot.slane %v6516_v42, 7 }
 0x6ef   : > { %v6524_v11 = vsel %vm2034_vm15, %v2028_v43, %v2029_v18  ;;  %v2077_v43 = vrot.slane %v6500_v25, 1 }
 0x6f0   : > { %7662 = vst [vmem:[#allocation37_spill] sm:$0xff] %v6524_v11  ;;  %2355 = vmatpush.bf16.msrb.mxu1 %v4332_v28 }
 0x6f1   : > { %v2089_v50 = vsel %vm2083_vm0, %v2076_v27, %v2077_v43 }
 0x6f2   : > { %4483 = vrot.lane.b32.xlu1 %v7663_v26, %s4897_s23  ;;  %v7666_v26 = vpack.i.bf16 %v6178_v54, %v6175_v17  ;;  %v2109_v28 = vmul.f32 %v2089_v50, %v7667_v55  ;;  %v577_v54 = vsel %vm561_vm7, 1.0, %v7601_v10 }
 0x6f4   : > { %v6533_v8 = vpop.f32.mrf.mxu0 }
 0x6f5   : > { %v2030_v53 = vrot.slane %v6533_v8, 7  ;;  %v2079_v36 = vrot.slane %v6533_v8, 1 }
 0x6f7   : > { %v6544_v9 = vsel %vm2034_vm15, %v2029_v18, %v2030_v53  ;;  %v2090_v18 = vsel %vm2083_vm0, %v2075_v41, %v2076_v27  ;;  %v621_v41 = vsel %vm437_vm12, %v577_v54, 0.0 }
 0x6f8   : > { %7665 = vst [vmem:[#allocation7_spill] sm:$0xff] %v6544_v9  ;;  %v2108_v17 = vmul.f32 %v2090_v18, %v7670_v0  ;;  %v2018_v18 = vrot.slane %v6342_v62, 7 }
 0x6fa   : > { %4488 = vrot.lane.b32.xlu1 %v7666_v26, %s4894_s27  ;;  %v4502_v26 = vpack.i.bf16 %v2109_v28, %v2108_v17  ;;  %v7672_v17 = vrot.slane %v6352_v58, 7 }
 0x6fc   : > { %v6555_v2 = vpop.f32.mrf.mxu0  ;;  %v2049_v54 = vsel %vm2034_vm15, %v2018_v18, %v7672_v17 }
 0x6fd   : > { %v2031_v63 = vrot.slane %v6555_v2, 7  ;;  %616 = vadd.xlane.f32.xlu2 %v615_v16  ;;  %v2052_v0 = vmul.f32 %v2049_v54, %v6182_v12 }
 0x6ff   : > { %v6565_v9 = vsel %vm2034_vm15, %v2030_v53, %v2031_v63  ;;  %v6578_v53 = vpop.permute.xlu2 %4448 }
 0x700   : > { %7669 = vst [vmem:[#allocation9_spill] sm:$0xff] %v6565_v9 }
 0x702   : > { %4503 = vrot.lane.b32.xlu1 %v4502_v26, %s4894_s27 }
 0x704   : > { %v6571_v27 = vpop.f32.mrf.mxu0 }
 0x705   : > { %v2032_v16 = vrot.slane %v6571_v27, 7 }
 0x706   : > { %622 = vadd.xlane.f32.xlu0 %v621_v41 }
 0x707   : > { %v6576_v50 = vsel %vm2034_vm15, %v2031_v63, %v2032_v16  ;;  %v4454_v41 = vpop.permute.xlu2 %4453 }
 0x708   : > { %7671 = vst [vmem:[#allocation38_spill] sm:$0xff] %v6576_v50  ;;  %v4497_v50 = vpack.i.bf16 %v6477_v46, %v6459_v44  ;;  %v4456_v38 = vunpack.i.h.bf16 %v4454_v41  ;;  %v4455_v17 = vunpack.i.l.bf16 %v4454_v41  ;;  %v2078_v46 = vrot.slane %v6516_v42, 1 }
 0x70c   : > { %v6580_v45 = vpop.f32.mrf.mxu0 }
 0x70d   : > { %v2033_v28 = vrot.slane %v6580_v45, 7 }
 0x70f   : > { %v6590_v26 = vsel %vm2034_vm15, %v2032_v16, %v2033_v28  ;;  %v2050_v63 = vsel %vm2034_vm15, %v2033_v28, %v2018_v18 }
 0x710   : > { %7673 = vst [vmem:[#allocation39_spill] sm:$0xff] %v6590_v26  ;;  %v2051_v9 = vmul.f32 %v2050_v63, %v6189_v61  ;;  %v2080_v63 = vrot.slane %v6555_v2, 1 }
 0x711   : > { %v4439_v55 = vpop.permute.xlu1 %4438 }
 0x712   : > { %v4441_v58 = vunpack.i.h.bf16 %v4439_v55  ;;  %v4440_v11 = vunpack.i.l.bf16 %v4439_v55  ;;  %v2087_v55 = vsel %vm2083_vm0, %v2078_v46, %v2079_v36 }
 0x714   : > { %v2246_v16 = vsel %vm2244_vm14, %v2052_v0, %v4441_v58  ;;  %v2245_v26 = vsel %vm2244_vm14, %v2051_v9, %v4440_v11  ;;  %v7674_v0 = vpack.i.bf16 %v6186_v57, %v6156_v30  ;;  %v2088_v9 = vsel %vm2083_vm0, %v2077_v43, %v2078_v46 }
 0x715   : > { %4498 = vrot.lane.b32.xlu2 %v4497_v50, %s4897_s23  ;;  %v2263_v18 = vsel %vm2261_vm1, %v2246_v16, %v4456_v38  ;;  %v2262_v28 = vsel %vm2261_vm1, %v2245_v26, %v4455_v17  ;;  %v2111_v38 = vmul.f32 %v2087_v55, %v6115_v48  ;;  %v2081_v11 = vrot.slane %v6571_v27, 1 }
 0x716   : > { %v2278_v54 = vpack.c.bf16 %v2263_v18, %v2262_v28  ;;  %v7675_v50 = vpack.i.bf16 %v6227_v21, %v6224_v49  ;;  %v2110_v26 = vmul.f32 %v2088_v9, %v6093_v37  ;;  %v4517_v30 = vpack.i.bf16 %v6516_v42, %v6500_v25  ;;  %v7676_v49 = vld [vmem:[#allocation10_spill] sm:$0xff] }
 0x717   : > { %v2085_v57 = vsel %vm2083_vm0, %v2080_v63, %v2081_v11  ;;  %v2086_v43 = vsel %vm2083_vm0, %v2079_v36, %v2080_v63  ;;  %vm562_vm8 = vcmp.eq.s32.totalorder %v7676_v49, %v4961_v4  ;;  %v4527_v18 = vpack.i.bf16 %v6555_v2, %v6533_v8  ;;  %v614_v36 = vpop.xlane.xlu0 %613 }
 0x718   : > { %4164 = vmatmul.msk.bf16.vlgmr.msrb.gmra.mxu1 %vm2323_vm3, %v2278_v54  ;;  %v4522_v41 = vpack.i.bf16 %v2111_v38, %v2110_v26  ;;  %v2113_v58 = vmul.f32 %v2085_v57, %v6162_v20  ;;  %v2112_v21 = vmul.f32 %v2086_v43, %v6159_v56  ;;  %v578_v17 = vsel %vm562_vm8, 1.0, %v7601_v10  ;;  %v7677_v57 = vld [vmem:[#allocation19_spill] sm:$0xff] }
 0x719   : > { %v624_v25 = vsel %vm437_vm12, %v578_v17, 0.0  ;;  %v4547_v4 = vpack.i.bf16 %v6331_v22, %v6329_v29  ;;  %v3339_v42 = vrot.slane %v6344_v31, 1  ;;  %v4537_v10 = vpack.i.bf16 %v6580_v45, %v6571_v27 }
 0x71a   : > { %4508 = vrot.lane.b32.xlu0 %v7674_v0, %s4897_s23  ;;  %v4532_v16 = vpack.i.bf16 %v2113_v58, %v2112_v21  ;;  %v3338_v28 = vrot.slane %v6331_v22, 1  ;;  %v7578_v2 = vrot.slane %v6329_v29, 1  ;;  %v4557_v22 = vpack.i.bf16 %v6356_v47, %v6344_v31 }
 0x71b   : > { %v3341_v27 = vrot.slane %v6376_v14, 1  ;;  %v6659_v0 = vsub.f32 1.0, %v614_v36  ;;  %v2082_v9 = vrot.slane %v6580_v45, 1  ;;  %v7678_v45 = vrot.slane %v6342_v62, 1 }
 0x71c   : > { %v3366_v8 = vsel %vm2083_vm0, %v3338_v28, %v3339_v42  ;;  %v3367_v46 = vsel %vm2083_vm0, %v7578_v2, %v3338_v28  ;;  %v4567_v62 = vpack.i.bf16 %v6399_v19, %v6376_v14  ;;  %v4451_v28 = vunpack.i.h.bf16 %v6578_v53 }
 0x71d   : > { %4513 = vrot.lane.b32.xlu2 %v7675_v50, %s4894_s27  ;;  %v3370_v54 = vmul.f32 %v3366_v8, %v7643_v3  ;;  %v3369_v38 = vmul.f32 %v3367_v46, %v5862_v6  ;;  %v3340_v50 = vrot.slane %v6356_v47, 1  ;;  %v2910_v31 = vmul.f32 %v7677_v57, %v6659_v0  ;;  %v4464_v57 = vpop.permute.xlu2 %4463 }
 0x71e   : > { %v2084_v43 = vsel %vm2083_vm0, %v2081_v11, %v2082_v9  ;;  %v2099_v47 = vsel %vm2083_vm0, %v2082_v9, %v7678_v45 }
 0x71f   : > { %v4444_v55 = vpop.permute.xlu0 %4443  ;;  %v4552_v63 = vpack.i.bf16 %v3370_v54, %v3369_v38  ;;  %v3365_v21 = vsel %vm2083_vm0, %v3339_v42, %v3340_v50  ;;  %v2115_v36 = vmul.f32 %v2099_v47, %v6195_v35  ;;  %v4450_v42 = vunpack.i.l.bf16 %v6578_v53  ;;  %v7682_v47 = vld [vmem:[#allocation18_spill] sm:$0xff] }
 0x720   : > { %v4446_v26 = vunpack.i.h.bf16 %v4444_v55  ;;  %v3371_v8 = vmul.f32 %v3365_v21, %v7646_v23 }
 0x722   : > { %4523 = vrot.lane.b32.xlu0 %v4522_v41, %s4894_s27  ;;  %v3364_v41 = vsel %vm2083_vm0, %v3340_v50, %v3341_v27  ;;  %v3102_v17 = vsel %vm2244_vm14, %v2910_v31, %v4446_v26 }
 0x723   : > { %v3372_v11 = vmul.f32 %v3364_v41, %v7647_v24  ;;  %v3118_v54 = vsel %vm2261_vm1, %v3102_v17, %v4451_v28  ;;  %v7680_v41 = vrot.slane %v6368_v39, 7 }
 0x725   : > { %4518 = vrot.lane.b32.xlu2 %v4517_v30, %s4897_s23  ;;  %v7581_v30 = vrot.slane %v6423_v34, 1 }
 0x72a   : > { %4533 = vrot.lane.b32.xlu0 %v4532_v16, %s4894_s27  ;;  %v4445_v16 = vunpack.i.l.bf16 %v4444_v55  ;;  %v4562_v55 = vpack.i.bf16 %v3372_v11, %v3371_v8 }
 0x72c   : > { %625 = vadd.xlane.f32.xlu1 %v624_v25  ;;  %v2114_v25 = vmul.f32 %v2084_v43, %v6192_v32  ;;  %v7681_v43 = vld [vmem:[#allocation17_spill] sm:$0xff] }
 0x72d   : > { %4528 = vrot.lane.b32.xlu2 %v4527_v18, %s4897_s23  ;;  %v3342_v18 = vrot.slane %v6399_v19, 1  ;;  %v2053_v45 = vmul.f32 %v6384_v15, %v7681_v43  ;;  %v2023_v15 = vrot.slane %v6416_v59, 7 }
 0x72e   : > { %v4542_v53 = vpack.i.bf16 %v2115_v36, %v2114_v25  ;;  %v2022_v36 = vrot.slane %v6407_v52, 7 }
 0x72f   : > { %v3362_v46 = vsel %vm2083_vm0, %v3342_v18, %v7581_v30 }
 0x730   : > { %v3374_v38 = vmul.f32 %v3362_v46, %v7650_v51 }
 0x732   : > { %4548 = vrot.lane.b32.xlu0 %v4547_v4, %s4897_s23  ;;  %v7679_v4 = vld [vmem:[#allocation16_spill] sm:$0xff] }
 0x735   : > { %4538 = vrot.lane.b32.xlu2 %v4537_v10, %s4897_s23 }
 0x73a   : > { %4558 = vrot.lane.b32.xlu0 %v4557_v22, %s4897_s23  ;;  %v3363_v22 = vsel %vm2083_vm0, %v3341_v27, %v3342_v18  ;;  %v4465_v18 = vunpack.i.l.bf16 %v4464_v57 }
 0x73b   : > { %v3373_v50 = vmul.f32 %v3363_v22, %v7651_v5 }
 0x73c   : > { %v611_v58 = vpop.xlane.xlu1 %610 }
 0x73d   : > { %4553 = vrot.lane.b32.xlu2 %v4552_v63, %s4894_s27  ;;  %v6677_v49 = vsub.f32 1.0, %v611_v58  ;;  %v4577_v26 = vpack.i.bf16 %v3374_v38, %v3373_v50  ;;  %v2021_v63 = vrot.slane %v6396_v7, 7  ;;  %v620_v50 = vpop.xlane.xlu0 %619 }
 0x73f   : > { %v2909_v10 = vmul.f32 %v7679_v4, %v6677_v49  ;;  %v2047_v27 = vsel %vm2034_vm15, %v7680_v41, %v2021_v63  ;;  %v2046_v28 = vsel %vm2034_vm15, %v2021_v63, %v2022_v36  ;;  %v2024_v41 = vrot.slane %v6426_v60, 7 }
 0x740   : > { %v2054_v58 = vmul.f32 %v2047_v27, %v7682_v47  ;;  %v2025_v27 = vrot.slane %v6445_v33, 7 }
 0x741   : > { %v3101_v14 = vsel %vm2244_vm14, %v2909_v10, %v4445_v16  ;;  %v4466_v16 = vunpack.i.h.bf16 %v4464_v57  ;;  %v4474_v10 = vpop.permute.xlu2 %4473 }
 0x742   : > { %4568 = vrot.lane.b32.xlu0 %v4567_v62, %s4897_s23  ;;  %v3117_v19 = vsel %vm2261_vm1, %v3101_v14, %v4450_v42  ;;  %v2045_v42 = vsel %vm2034_vm15, %v2022_v36, %v2023_v15  ;;  %v2055_v14 = vmul.f32 %v2046_v28, %v6078_v13  ;;  %v4476_v22 = vunpack.i.h.bf16 %v4474_v10  ;;  %v7688_v28 = vld [vmem:[#allocation25_spill] sm:$0xff] }
 0x743   : > { %v3128_v9 = vpack.c.bf16 %v3118_v54, %v3117_v19  ;;  %v7683_v19 = vld [vmem:[#allocation20_spill] sm:$0xff]  ;;  %v4475_v59 = vunpack.i.l.bf16 %v4474_v10 }
 0x744   : > { %v2056_v54 = vmul.f32 %v2045_v42, %v7683_v19 }
 0x745   : > { %4563 = vrot.lane.b32.xlu2 %v4562_v55, %s4894_s27  ;;  %4543 = vrot.lane.b32.xlu1 %v4542_v53, %s4894_s27 }
 0x746   : > { %4233 = vmatmul.msk.bf16.gmra.mxu2 %vm2323_vm3, %v3128_v9 }
 0x74a   : > { %4578 = vrot.lane.b32.xlu0 %v4577_v26, %s4894_s27  ;;  %v4479_v26 = vpop.permute.xlu2 %4478 }
 0x74b   : > { %v4481_v60 = vunpack.i.h.bf16 %v4479_v26 }
 0x754   : > { %v4459_v31 = vpop.permute.xlu1 %4458 }
 0x755   : > { %v4461_v21 = vunpack.i.h.bf16 %v4459_v31  ;;  %v4460_v17 = vunpack.i.l.bf16 %v4459_v31  ;;  %v6737_v31 = vsub.f32 1.0, %v620_v50 }
 0x757   : > { %v2248_v11 = vsel %vm2244_vm14, %v2054_v58, %v4461_v21  ;;  %v2247_v7 = vsel %vm2244_vm14, %v2053_v45, %v4460_v17  ;;  %7684 = vst [vmem:[#allocation10_spill] sm:$0xff] %v6737_v31  ;;  %v4494_v45 = vpop.permute.xlu0 %4493  ;;  %v2044_v21 = vsel %vm2034_vm15, %v2023_v15, %v2024_v41  ;;  %v2043_v17 = vsel %vm2034_vm15, %v2024_v41, %v2025_v27 }
 0x758   : > { %v2264_v39 = vsel %vm2261_vm1, %v2247_v7, %v4465_v18  ;;  %v2265_v62 = vsel %vm2261_vm1, %v2248_v11, %v4466_v16  ;;  %v7686_v11 = vld [vmem:[#allocation22_spill] sm:$0xff]  ;;  %v2057_v15 = vmul.f32 %v2044_v21, %v6277_v40  ;;  %v2058_v42 = vmul.f32 %v2043_v17, %v7688_v28 }
 0x759   : > { %v2279_v25 = vpack.c.bf16 %v2265_v62, %v2264_v39  ;;  %v2912_v7 = vmul.f32 %v7686_v11, %v6737_v31  ;;  %v4480_v39 = vunpack.i.l.bf16 %v4479_v26  ;;  %v4496_v62 = vunpack.i.h.bf16 %v4494_v45 }
 0x75b   : > { %4165 = vmatmul.msk.bf16.gmra.mxu1 %vm2323_vm3, %v2279_v25  ;;  %v4495_v25 = vunpack.i.l.bf16 %v4494_v45 }
 0x75c   : > { %v4469_v4 = vpop.permute.xlu1 %4468 }
 0x75d   : > { %v4471_v8 = vunpack.i.h.bf16 %v4469_v4  ;;  %v4470_v46 = vunpack.i.l.bf16 %v4469_v4  ;;  %v7687_v4 = vld [vmem:[#allocation21_spill] sm:$0xff] }
 0x75f   : > { %v2250_v52 = vsel %vm2244_vm14, %v2056_v54, %v4471_v8  ;;  %v2249_v55 = vsel %vm2244_vm14, %v2055_v14, %v4470_v46  ;;  %v7689_v46 = vrot.slane %v6459_v44, 7 }
 0x760   : > { %v2266_v9 = vsel %vm2261_vm1, %v2249_v55, %v4475_v59  ;;  %v2267_v38 = vsel %vm2261_vm1, %v2250_v52, %v4476_v22  ;;  %v2251_v55 = vsel %vm2244_vm14, %v2057_v15, %v4480_v39  ;;  %v2252_v22 = vsel %vm2244_vm14, %v2058_v42, %v4481_v60 }
 0x761   : > { %v2280_v63 = vpack.c.bf16 %v2267_v38, %v2266_v9  ;;  %v2042_v14 = vsel %vm2034_vm15, %v2025_v27, %v7689_v46  ;;  %v2268_v9 = vsel %vm2261_vm1, %v2251_v55, %v4495_v25  ;;  %v2269_v38 = vsel %vm2261_vm1, %v2252_v22, %v4496_v62  ;;  %v7691_v27 = vld [vmem:[#allocation27_spill] sm:$0xff]  ;;  %v7693_v46 = vld [vmem:[#allocation37_spill] sm:$0xff] }
 0x762   : > { %v2281_v17 = vpack.c.bf16 %v2269_v38, %v2268_v9 }
 0x764   : > { %v4484_v53 = vpop.permute.xlu1 %4483 }
 0x765   : > { %v4486_v16 = vunpack.i.h.bf16 %v4484_v53  ;;  %v4485_v36 = vunpack.i.l.bf16 %v4484_v53 }
 0x767   : > { %v3104_v54 = vsel %vm2244_vm14, %v2912_v7, %v4486_v16 }
 0x76b   : > { %4166 = vmatmul.msk.bf16.gmra.mxu1 %vm2323_vm3, %v2280_v63  ;;  %v7690_v63 = vld [vmem:[#allocation26_spill] sm:$0xff] }
 0x76c   : > { %v4489_v57 = vpop.permute.xlu1 %4488  ;;  %v2059_v41 = vmul.f32 %v2042_v14, %v7690_v63  ;;  %v2062_v14 = vmul.f32 %v7693_v46, %v6659_v0 }
 0x76d   : > { %v4491_v33 = vunpack.i.h.bf16 %v4489_v57  ;;  %v4490_v8 = vunpack.i.l.bf16 %v4489_v57  ;;  %v7692_v57 = vld [vmem:[#allocation35_spill] sm:$0xff] }
 0x76e   : > { %v2060_v45 = vmul.f32 %v7692_v57, %v7691_v27 }
 0x76f   : > { %v3120_v59 = vsel %vm2261_vm1, %v3104_v54, %v4491_v33  ;;  %v7694_v54 = vld [vmem:[#allocation36_spill] sm:$0xff] }
 0x770   : > { %v617_v58 = vpop.xlane.xlu2 %616 }
 0x771   : > { %v6743_v18 = vsub.f32 1.0, %v617_v58 }
 0x773   : > { %7685 = vst [vmem:[#allocation19_spill] sm:$0xff] %v6743_v18  ;;  %v2911_v10 = vmul.f32 %v7687_v4, %v6743_v18 }
 0x774   : > { %v4504_v44 = vpop.permute.xlu1 %4503 }
 0x775   : > { %v3103_v52 = vsel %vm2244_vm14, %v2911_v10, %v4485_v36  ;;  %v4506_v16 = vunpack.i.h.bf16 %v4504_v44  ;;  %v4505_v11 = vunpack.i.l.bf16 %v4504_v44 }
 0x776   : > { %v3119_v53 = vsel %vm2261_vm1, %v3103_v52, %v4490_v8  ;;  %v2061_v52 = vmul.f32 %v7694_v54, %v6677_v49 }
 0x777   : > { %v3129_v50 = vpack.c.bf16 %v3120_v59, %v3119_v53  ;;  %v4879_v53 = vld [vmem:[%s7508_s6] sm:$0x1f] }
 0x778   : > { %v4499_v26 = vpop.permute.xlu2 %4498  ;;  %v6782_v9 = vperm.slane %v4879_v53, 0 }
 0x779   : > { %v4501_v58 = vunpack.i.h.bf16 %v4499_v26  ;;  %v4500_v21 = vunpack.i.l.bf16 %v4499_v26  ;;  %4234 = vmatmul.msk.bf16.gmra.mxu2 %vm2323_vm3, %v3129_v50  ;;  %v623_v36 = vpop.xlane.xlu0 %622 }
 0x77b   : > { %v2254_v7 = vsel %vm2244_vm14, %v2060_v45, %v4501_v58  ;;  %v2253_v60 = vsel %vm2244_vm14, %v2059_v41, %v4500_v21  ;;  %4167 = vmatmul.msk.bf16.gmra.mxu1 %vm2323_vm3, %v2281_v17 }
 0x77c   : > { %v2270_v39 = vsel %vm2261_vm1, %v2253_v60, %v4505_v11  ;;  %v2271_v33 = vsel %vm2261_vm1, %v2254_v7, %v4506_v16  ;;  %v7695_v16 = vld [vmem:[#allocation9_spill] sm:$0xff]  ;;  %v7696_v7 = vld [vmem:[#allocation7_spill] sm:$0xff] }
 0x77d   : > { %v2282_v62 = vpack.c.bf16 %v2271_v33, %v2270_v39  ;;  %v2064_v11 = vmul.f32 %v7695_v16, %v6737_v31  ;;  %v2063_v60 = vmul.f32 %v7696_v7, %v6743_v18  ;;  %v6795_v39 = vsub.f32 1.0, %v623_v36  ;;  %v7700_v16 = vld [vmem:[#allocation24_spill] sm:$0xff] }
 0x77e   : > { %v7712_v31 = vrot.slane %v6423_v34, 1 }
 0x77f   : > { %7697 = vst [vmem:[#allocation16_spill] sm:$0xff] %v6795_v39 }
 0x780   : > { %v6772_v25 = vpop.permute.xlu2 %4513 }
 0x781   : > { %v4515_v7 = vunpack.i.l.bf16 %v6772_v25 }
 0x788   : > { %v4519_v4 = vpop.permute.xlu2 %4518 }
 0x789   : > { %v4521_v42 = vunpack.i.h.bf16 %v4519_v4  ;;  %v4520_v8 = vunpack.i.l.bf16 %v4519_v4 }
 0x78b   : > { %4168 = vmatmul.msk.bf16.gmra.mxu1 %vm2323_vm3, %v2282_v62  ;;  %v2256_v38 = vsel %vm2244_vm14, %v2062_v14, %v4521_v42  ;;  %v2255_v44 = vsel %vm2244_vm14, %v2061_v52, %v4520_v8 }
 0x78c   : > { %v4509_v10 = vpop.permute.xlu0 %4508 }
 0x78d   : > { %v4510_v14 = vunpack.i.l.bf16 %v4509_v10 }
 0x790   : > { %v4529_v15 = vpop.permute.xlu2 %4528 }
 0x791   : > { %v4531_v21 = vunpack.i.h.bf16 %v4529_v15  ;;  %v4530_v17 = vunpack.i.l.bf16 %v4529_v15 }
 0x793   : > { %v2258_v8 = vsel %vm2244_vm14, %v2064_v11, %v4531_v21  ;;  %v2257_v46 = vsel %vm2244_vm14, %v2063_v60, %v4530_v17 }
 0x794   : > { %v4524_v55 = vpop.permute.xlu0 %4523 }
 0x795   : > { %v4526_v22 = vunpack.i.h.bf16 %v4524_v55  ;;  %v4525_v59 = vunpack.i.l.bf16 %v4524_v55  ;;  %v2357_v50 = vpop.f32.mrf.mxu1  ;;  %v7698_v55 = vld [vmem:[#allocation23_spill] sm:$0xff] }
 0x796   : > { %v2358_v58 = vadd.f32 %v2357_v50, %v6782_v9 }
 0x797   : > { %v2272_v26 = vsel %vm2261_vm1, %v2255_v44, %v4525_v59  ;;  %v2273_v41 = vsel %vm2261_vm1, %v2256_v38, %v4526_v22  ;;  %v2913_v22 = vmul.f32 %v7698_v55, %v6795_v39  ;;  %v7703_v55 = vld [vmem:[#allocation31_spill] sm:$0xff] }
 0x798   : > { %v2283_v57 = vpack.c.bf16 %v2273_v41, %v2272_v26  ;;  %v6788_v45 = vpop.permute.xlu2 %4538  ;;  %v2413_v62 = vmul.f32 0.2, %v2358_v58  ;;  %vm2397_vm12 = vcmp.gt.f32.partialorder %v2358_v58, 0.0  ;;  %v4516_v41 = vunpack.i.h.bf16 %v6772_v25 }
 0x799   : > { %v3105_v21 = vsel %vm2244_vm14, %v2913_v22, %v4510_v14  ;;  %v3324_v22 = vmul.f32 %v7703_v55, %v7682_v47 }
 0x79a   : > { %v6805_v38 = vsel %vm2397_vm12, %v2358_v58, %v2413_v62 }
 0x79b   : > { %4169 = vmatmul.msk.bf16.gmra.mxu1 %vm2323_vm3, %v2283_v57  ;;  %v4511_v57 = vunpack.i.h.bf16 %v4509_v10  ;;  %v7577_v58 = vrot.slane %v6805_v38, 7 }
 0x79c   : > { %v4534_v33 = vpop.permute.xlu0 %4533 }
 0x79d   : > { %v4536_v4 = vunpack.i.h.bf16 %v4534_v33  ;;  %v4535_v42 = vunpack.i.l.bf16 %v4534_v33  ;;  %v2359_v15 = vpop.f32.mrf.mxu1 }
 0x79e   : > { %v2360_v36 = vadd.f32 %v2359_v15, %v6782_v9  ;;  %v7701_v15 = vld [vmem:[#allocation2_spill] sm:$0xff] }
 0x79f   : > { %v2274_v54 = vsel %vm2261_vm1, %v2257_v46, %v4535_v42  ;;  %v2275_v52 = vsel %vm2261_vm1, %v2258_v8, %v4536_v4  ;;  %v626_v53 = vpop.xlane.xlu1 %625  ;;  %v3121_v4 = vsel %vm2261_vm1, %v3105_v21, %v4515_v7  ;;  %v4587_v14 = vpack.i.bf16 %v7701_v15, %v6423_v34 }
 0x7a0   : > { %v2284_v59 = vpack.c.bf16 %v2275_v52, %v2274_v54  ;;  %vm2398_vm9 = vcmp.gt.f32.partialorder %v2360_v36, 0.0  ;;  %v2414_v44 = vmul.f32 0.2, %v2360_v36  ;;  %v6807_v50 = vsub.f32 1.0, %v626_v53  ;;  %v6809_v26 = vpop.permute.xlu2 %4553  ;;  %v7702_v52 = vld [vmem:[#allocation30_spill] sm:$0xff] }
 0x7a2   : > { %7699 = vst [vmem:[#allocation17_spill] sm:$0xff] %v6807_v50  ;;  %v6813_v17 = vsel %vm2398_vm9, %v2360_v36, %v2414_v44  ;;  %v2914_v11 = vmul.f32 %v7700_v16, %v6807_v50  ;;  %v3323_v36 = vmul.f32 %v7702_v52, %v7681_v43 }
 0x7a3   : > { %v2446_v60 = vrot.slane %v6813_v17, 7  ;;  %v4572_v33 = vpack.i.bf16 %v6813_v17, %v6805_v38 }
 0x7a4   : > { %v6822_v62 = vpop.permute.xlu0 %4548  ;;  %v3106_v10 = vsel %vm2244_vm14, %v2914_v11, %v4511_v57 }
 0x7a5   : > { %4573 = vrot.lane.b32.xlu2 %v4572_v33, %s4897_s23  ;;  %v3122_v42 = vsel %vm2261_vm1, %v3106_v10, %v4516_v41  ;;  %v6834_v25 = vsel %vm2034_vm15, %v7577_v58, %v2446_v60  ;;  %v4541_v10 = vunpack.i.h.bf16 %v6788_v45 }
 0x7a6   : > { %v3130_v8 = vpack.c.bf16 %v3122_v42, %v3121_v4  ;;  %v4540_v4 = vunpack.i.l.bf16 %v6788_v45  ;;  %v7704_v42 = vld [vmem:[#allocation39_spill] sm:$0xff]  ;;  %v7706_v45 = vld [vmem:[#allocation6_spill] sm:$0xff] }
 0x7a8   : > { %4235 = vmatmul.msk.bf16.gmra.mxu2 %vm2323_vm3, %v3130_v8  ;;  %v4564_v46 = vpop.permute.xlu2 %4563  ;;  %v2066_v8 = vmul.f32 %v7704_v42, %v6807_v50 }
 0x7a9   : > { %v4566_v41 = vunpack.i.h.bf16 %v4564_v46  ;;  %v4565_v57 = vunpack.i.l.bf16 %v4564_v46  ;;  %v7705_v46 = vld [vmem:[#allocation38_spill] sm:$0xff] }
 0x7ab   : > { %4170 = vmatmul.msk.bf16.gmra.mxu1 %vm2323_vm3, %v2284_v59 }
 0x7ac   : > { %v4559_v54 = vpop.permute.xlu0 %4558 }
 0x7ad   : > { %v4561_v53 = vunpack.i.h.bf16 %v4559_v54  ;;  %v4560_v44 = vunpack.i.l.bf16 %v4559_v54  ;;  %4588 = vrot.lane.b32.xlu2 %v4587_v14, %s4897_s23  ;;  %v2065_v14 = vmul.f32 %v7705_v46, %v6795_v39 }
 0x7af   : > { %v3516_v21 = vsel %vm2244_vm14, %v3324_v22, %v4561_v53  ;;  %v3515_v16 = vsel %vm2244_vm14, %v3323_v36, %v4560_v44  ;;  %v2259_v55 = vsel %vm2244_vm14, %v2065_v14, %v4540_v4  ;;  %v2260_v44 = vsel %vm2244_vm14, %v2066_v8, %v4541_v10 }
 0x7b0   : > { %v6848_v11 = vsel %vm2261_vm1, %v3515_v16, %v4565_v57  ;;  %v6851_v59 = vsel %vm2261_vm1, %v3516_v21, %v4566_v41  ;;  %v3325_v21 = vmul.f32 %v7706_v45, %v6078_v13  ;;  %v7707_v16 = vld [vmem:[#allocation32_spill] sm:$0xff] }
 0x7b1   : > { %v3326_v42 = vmul.f32 %v7707_v16, %v7683_v19 }
 0x7b4   : > { %v4569_v33 = vpop.permute.xlu0 %4568 }
 0x7b5   : > { %v4571_v22 = vunpack.i.h.bf16 %v4569_v33  ;;  %v4570_v53 = vunpack.i.l.bf16 %v4569_v33 }
 0x7b7   : > { %v4544_v54 = vpop.permute.xlu1 %4543  ;;  %v3518_v4 = vsel %vm2244_vm14, %v3326_v42, %v4571_v22  ;;  %v3517_v33 = vsel %vm2244_vm14, %v3325_v21, %v4570_v53 }
 0x7b8   : > { %v4546_v52 = vunpack.i.h.bf16 %v4544_v54  ;;  %v4545_v36 = vunpack.i.l.bf16 %v4544_v54 }
 0x7ba   : > { %v2277_v41 = vsel %vm2261_vm1, %v2260_v44, %v4546_v52  ;;  %v2276_v57 = vsel %vm2261_vm1, %v2259_v55, %v4545_v36  ;;  %v7708_v36 = vld [vmem:[#allocation28_spill] sm:$0xff] }
 0x7bb   : > { %v2285_v46 = vpack.c.bf16 %v2277_v41, %v2276_v57  ;;  %v7709_v41 = vld [vmem:[#allocation33_spill] sm:$0xff] }
 0x7bc   : > { %v4579_v7 = vpop.permute.xlu0 %4578  ;;  %v7710_v57 = vrot.slane %v7709_v41, 7 }
 0x7bd   : > { %v4581_v58 = vunpack.i.h.bf16 %v4579_v7  ;;  %v4580_v54 = vunpack.i.l.bf16 %v4579_v7  ;;  %4171 = vmatmul.msk.bf16.gmra.mxu1 %vm2323_vm3, %v2285_v46 }
 0x7bf   : > { %v6873_v10 = vsel %vm2261_vm1, %v3517_v33, %v4580_v54  ;;  %v6876_v8 = vsel %vm2261_vm1, %v3518_v4, %v4581_v58  ;;  %v2494_v33 = vrot.slane %v6813_v17, 1 }
 0x7c9   : > { %v3226_v52 = vpop.f32.mrf.mxu2 }
 0x7ca   : > { %v3227_v55 = vadd.f32 %v3226_v52, %v7708_v36 }
 0x7cc   : > { %vm3251_vm10 = vcmp.gt.f32.partialorder %v3227_v55, 0.0  ;;  %v3267_v7 = vmul.f32 0.2, %v3227_v55 }
 0x7ce   : > { %v6881_v44 = vsel %vm3251_vm10, %v3227_v55, %v3267_v7  ;;  %v7580_v55 = vrot.slane %v6805_v38, 1 }
 0x7cf   : > { %v3299_v22 = vrot.slane %v6881_v44, 7 }
 0x7d1   : > { %v3228_v53 = vpop.f32.mrf.mxu2  ;;  %v6888_v45 = vsel %vm2034_vm15, %v7710_v57, %v3299_v22 }
 0x7d2   : > { %v3229_v58 = vadd.f32 %v3228_v53, %v7708_v36 }
 0x7d4   : > { %vm3252_vm11 = vcmp.gt.f32.partialorder %v3229_v58, 0.0  ;;  %v3268_v21 = vmul.f32 0.2, %v3229_v58 }
 0x7d6   : > { %v6891_v16 = vsel %vm3252_vm11, %v3229_v58, %v3268_v21  ;;  %v2523_v58 = vsel %vm2083_vm0, %v7580_v55, %v2494_v33  ;;  %v7711_v21 = vld [vmem:[#allocation11_spill] sm:$0xff]  ;;  %v3344_v55 = vrot.slane %v7701_v15, 1 }
 0x7d7   : > { %v7579_v42 = vrot.slane %v6891_v16, 7  ;;  %v3345_v14 = vrot.slane %v7711_v21, 1 }
 0x7d8   : > { %v2362_v46 = vpop.f32.mrf.mxu1 }
 0x7d9   : > { %v6898_v54 = vsel %vm2034_vm15, %v3299_v22, %v7579_v42  ;;  %v2363_v4 = vadd.f32 %v2362_v46, %v6782_v9 }
 0x7db   : > { %vm2399_vm13 = vcmp.gt.f32.partialorder %v2363_v4, 0.0  ;;  %v2415_v52 = vmul.f32 0.2, %v2363_v4 }
 0x7dd   : > { %v2431_v7 = vsel %vm2399_vm13, %v2363_v4, %v2415_v52  ;;  %v2525_v52 = vmul.f32 %v2523_v58, %v5862_v6  ;;  %v3361_v6 = vsel %vm2083_vm0, %v7712_v31, %v3344_v55  ;;  %v7713_v58 = vld [vmem:[#allocation13_spill] sm:$0xff]  ;;  %v4607_v31 = vpack.i.bf16 %v7709_v41, %v7711_v21 }
 0x7de   : > { %v2447_v53 = vrot.slane %v2431_v7, 7  ;;  %v2495_v57 = vrot.slane %v2431_v7, 1 }
 0x7e0   : > { %v2364_v22 = vpop.f32.mrf.mxu1  ;;  %v2522_v46 = vsel %vm2083_vm0, %v2494_v33, %v2495_v57  ;;  %v6914_v2 = vsel %vm2034_vm15, %v2446_v60, %v2447_v53  ;;  %v3360_v33 = vsel %vm2083_vm0, %v3344_v55, %v3345_v14 }
 0x7e1   : > { %v2365_v4 = vadd.f32 %v2364_v22, %v6782_v9  ;;  %v2526_v42 = vmul.f32 %v2522_v46, %v7643_v3  ;;  %v3376_v3 = vmul.f32 %v3360_v33, %v7713_v58  ;;  %v3347_v33 = vrot.slane %v6881_v44, 1 }
 0x7e3   : > { %vm2400_vm2 = vcmp.gt.f32.partialorder %v2365_v4, 0.0  ;;  %v2416_v30 = vmul.f32 0.2, %v2365_v4  ;;  %v4582_v50 = vpack.i.bf16 %v2526_v42, %v2525_v52  ;;  %v7714_v42 = vld [vmem:[#allocation12_spill] sm:$0xff] }
 0x7e5   : > { %v2432_v39 = vsel %vm2400_vm2, %v2365_v4, %v2416_v30  ;;  %4583 = vrot.lane.b32.xlu1 %v4582_v50, %s4894_s27  ;;  %v3375_v50 = vmul.f32 %v3361_v6, %v7714_v42 }
 0x7e6   : > { %v2448_v17 = vrot.slane %v2432_v39, 7  ;;  %v4592_v60 = vpack.i.bf16 %v2432_v39, %v2431_v7  ;;  %v2496_v46 = vrot.slane %v2432_v39, 1 }
 0x7e7   : > { %v4597_v34 = vpack.i.bf16 %v3376_v3, %v3375_v50 }
 0x7e8   : > { %v2367_v22 = vpop.f32.mrf.mxu1  ;;  %4593 = vrot.lane.b32.xlu0 %v4592_v60, %s4897_s23  ;;  %v6931_v15 = vsel %vm2034_vm15, %v2447_v53, %v2448_v17  ;;  %v2521_v53 = vsel %vm2083_vm0, %v2495_v57, %v2496_v46  ;;  %v3346_v57 = vrot.slane %v7709_v41, 1 }
 0x7e9   : > { %v2368_v30 = vadd.f32 %v2367_v22, %v6782_v9  ;;  %v2527_v21 = vmul.f32 %v2521_v53, %v7646_v23 }
 0x7eb   : > { %vm2401_vm4 = vcmp.gt.f32.partialorder %v2368_v30, 0.0  ;;  %v2417_v7 = vmul.f32 0.2, %v2368_v30 }
 0x7ed   : > { %v2433_v4 = vsel %vm2401_vm4, %v2368_v30, %v2417_v7  ;;  %4598 = vrot.lane.b32.xlu1 %v4597_v34, %s4894_s27  ;;  %v3358_v7 = vsel %vm2083_vm0, %v3346_v57, %v3347_v33 }
 0x7ee   : > { %v2449_v55 = vrot.slane %v2433_v4, 7  ;;  %v2497_v52 = vrot.slane %v2433_v4, 1 }
 0x7f0   : > { %v2369_v60 = vpop.f32.mrf.mxu1  ;;  %4608 = vrot.lane.b32.xlu0 %v4607_v31, %s4897_s23  ;;  %v2520_v39 = vsel %vm2083_vm0, %v2496_v46, %v2497_v52  ;;  %v6946_v6 = vsel %vm2034_vm15, %v2448_v17, %v2449_v55  ;;  %v3359_v31 = vsel %vm2083_vm0, %v3345_v14, %v3346_v57  ;;  %v4627_v57 = vpack.i.bf16 %v6891_v16, %v6881_v44 }
 0x7f1   : > { %v2370_v3 = vadd.f32 %v2369_v60, %v6782_v9  ;;  %v2528_v22 = vmul.f32 %v2520_v39, %v7647_v24  ;;  %v7715_v60 = vld [vmem:[#allocation14_spill] sm:$0xff] }
 0x7f2   : > { %v3378_v23 = vmul.f32 %v3358_v7, %v7715_v60 }
 0x7f3   : > { %vm2402_vm5 = vcmp.gt.f32.partialorder %v2370_v3, 0.0  ;;  %v2418_v30 = vmul.f32 0.2, %v2370_v3  ;;  %v4602_v50 = vpack.i.bf16 %v2528_v22, %v2527_v21 }
 0x7f5   : > { %v2434_v34 = vsel %vm2402_vm5, %v2370_v3, %v2418_v30  ;;  %4603 = vrot.lane.b32.xlu2 %v4602_v50, %s4894_s27  ;;  %v7716_v3 = vld [vmem:[#allocation15_spill] sm:$0xff] }
 0x7f6   : > { %v2450_v46 = vrot.slane %v2434_v34, 7  ;;  %v4612_v17 = vpack.i.bf16 %v2434_v34, %v2433_v4  ;;  %v2498_v41 = vrot.slane %v2434_v34, 1  ;;  %v3377_v21 = vmul.f32 %v3359_v31, %v7716_v3 }
 0x7f8   : > { %v2372_v53 = vpop.f32.mrf.mxu1  ;;  %4613 = vrot.lane.b32.xlu1 %v4612_v17, %s4897_s23  ;;  %v6961_v24 = vsel %vm2034_vm15, %v2449_v55, %v2450_v46  ;;  %v4617_v30 = vpack.i.bf16 %v3378_v23, %v3377_v21  ;;  %v2519_v55 = vsel %vm2083_vm0, %v2497_v52, %v2498_v41 }
 0x7f9   : > { %v2373_v39 = vadd.f32 %v2372_v53, %v6782_v9  ;;  %v2529_v44 = vmul.f32 %v2519_v55, %v7651_v5 }
 0x7fb   : > { %vm2403_vm6 = vcmp.gt.f32.partialorder %v2373_v39, 0.0  ;;  %v2419_v22 = vmul.f32 0.2, %v2373_v39 }
 0x7fc   : > { %v3231_v4 = vpop.f32.mrf.mxu2 }
 0x7fd   : > { %v3232_v14 = vadd.f32 %v3231_v4, %v7708_v36  ;;  %v2435_v50 = vsel %vm2403_vm6, %v2373_v39, %v2419_v22  ;;  %4618 = vrot.lane.b32.xlu2 %v4617_v30, %s4894_s27  ;;  %v3348_v4 = vrot.slane %v6891_v16, 1 }
 0x7fe   : > { %v2451_v7 = vrot.slane %v2435_v50, 7  ;;  %v2499_v34 = vrot.slane %v2435_v50, 1 }
 0x7ff   : > { %vm3253_vm7 = vcmp.gt.f32.partialorder %v3232_v14, 0.0  ;;  %v3269_v17 = vmul.f32 0.2, %v3232_v14 }
 0x800   : > { %v2374_v53 = vpop.f32.mrf.mxu1  ;;  %4628 = vrot.lane.b32.xlu1 %v4627_v57, %s4897_s23  ;;  %v2518_v23 = vsel %vm2083_vm0, %v2498_v41, %v2499_v34  ;;  %v6984_v30 = vsel %vm2034_vm15, %v2450_v46, %v2451_v7 }
 0x801   : > { %v6971_v31 = vsel %vm3253_vm7, %v3232_v14, %v3269_v17  ;;  %v2375_v52 = vadd.f32 %v2374_v53, %v6782_v9  ;;  %v2530_v22 = vmul.f32 %v2518_v23, %v7650_v51  ;;  %v7717_v17 = vrot.slane %v6891_v16, 7 }
 0x802   : > { %v3301_v39 = vrot.slane %v6971_v31, 7  ;;  %v3349_v21 = vrot.slane %v6971_v31, 1 }
 0x803   : > { %vm2404_vm8 = vcmp.gt.f32.partialorder %v2375_v52, 0.0  ;;  %v2420_v14 = vmul.f32 0.2, %v2375_v52  ;;  %v4622_v41 = vpack.i.bf16 %v2530_v22, %v2529_v44  ;;  %v3357_v44 = vsel %vm2083_vm0, %v3347_v33, %v3348_v4 }
 0x804   : > { %v3233_v57 = vpop.f32.mrf.mxu2  ;;  %v3356_v55 = vsel %vm2083_vm0, %v3348_v4, %v3349_v21  ;;  %v6995_v51 = vsel %vm2034_vm15, %v7717_v17, %v3301_v39 }
 0x805   : > { %v3234_v5 = vadd.f32 %v3233_v57, %v7708_v36  ;;  %7718 = vst [vmem:[#allocation18_spill] sm:$0xff] %v6995_v51  ;;  %v2436_v53 = vsel %vm2404_vm8, %v2375_v52, %v2420_v14  ;;  %4623 = vrot.lane.b32.xlu0 %v4622_v41, %s4894_s27  ;;  %v3380_v57 = vmul.f32 %v3356_v55, %v6115_v48  ;;  %v4355_v55 = vld [vmem:[%s7507_s5 + $0xb8] sm:$0xff]  ;;  %v4550_v51 = vunpack.i.l.bf16 %v6822_v62 }
 0x806   : > { %v2452_v46 = vrot.slane %v2436_v53, 7  ;;  %v4632_v23 = vpack.i.bf16 %v2436_v53, %v2435_v50  ;;  %v3379_v50 = vmul.f32 %v3357_v44, %v6093_v37  ;;  %v2500_v14 = vrot.slane %v2436_v53, 1  ;;  %3616 = vmatpush.bf16.msrb.mxu0 %v4355_v55 }
 0x807   : > { %vm3254_vm12 = vcmp.gt.f32.partialorder %v3234_v5, 0.0  ;;  %v3270_v22 = vmul.f32 0.2, %v3234_v5 }
 0x808   : > { %v2377_v18 = vpop.f32.mrf.mxu1  ;;  %4633 = vrot.lane.b32.xlu2 %v4632_v23, %s4897_s23  ;;  %v7004_v16 = vsel %vm2034_vm15, %v2451_v7, %v2452_v46  ;;  %v4637_v4 = vpack.i.bf16 %v3380_v57, %v3379_v50  ;;  %v2517_v44 = vsel %vm2083_vm0, %v2499_v34, %v2500_v14 }
 0x809   : > { %7719 = vst [vmem:[#allocation20_spill] sm:$0xff] %v7004_v16  ;;  %v7006_v17 = vsel %vm3254_vm12, %v3234_v5, %v3270_v22  ;;  %v2378_v52 = vadd.f32 %v2377_v18, %v6782_v9  ;;  %v4354_v22 = vld [vmem:[%s7507_s5 + $0xb0] sm:$0xff] }
 0x80a   : > { %v7590_v41 = vrot.slane %v7006_v17, 7  ;;  %v4647_v18 = vpack.i.bf16 %v7006_v17, %v6971_v31  ;;  %3617 = vmatpush.bf16.msrb.mxu0 %v4354_v22  ;;  %v7726_v31 = vrot.slane %v7006_v17, 7 }
 0x80b   : > { %vm2405_vm9 = vcmp.gt.f32.partialorder %v2378_v52, 0.0  ;;  %v2421_v33 = vmul.f32 0.2, %v2378_v52 }
 0x80c   : > { %v7018_v7 = vsel %vm2034_vm15, %v3301_v39, %v7590_v41 }
 0x80d   : > { %7720 = vst [vmem:[#allocation22_spill] sm:$0xff] %v7018_v7  ;;  %v2437_v5 = vsel %vm2405_vm9, %v2378_v52, %v2421_v33  ;;  %4638 = vrot.lane.b32.xlu0 %v4637_v4, %s4894_s27  ;;  %v2531_v33 = vmul.f32 %v2517_v44, %v7714_v42  ;;  %v4352_v42 = vld [vmem:[%s7507_s5 + $0xa0] sm:$0xff] }
 0x80e   : > { %v2453_v53 = vrot.slane %v2437_v5, 7  ;;  %v2501_v23 = vrot.slane %v2437_v5, 1 }
 0x810   : > { %v2379_v57 = vpop.f32.mrf.mxu1  ;;  %4648 = vrot.lane.b32.xlu2 %v4647_v18, %s4897_s23  ;;  %v2516_v39 = vsel %vm2083_vm0, %v2500_v14, %v2501_v23  ;;  %v7033_v52 = vsel %vm2034_vm15, %v2452_v46, %v2453_v53  ;;  %v4353_v18 = vld [vmem:[%s7507_s5 + $0xa8] sm:$0xff] }
 0x811   : > { %7721 = vst [vmem:[#allocation21_spill] sm:$0xff] %v7033_v52  ;;  %v2380_v50 = vadd.f32 %v2379_v57, %v6782_v9  ;;  %v2532_v34 = vmul.f32 %v2516_v39, %v7713_v58  ;;  %3618 = vmatpush.bf16.msrb.mxu0 %v4353_v18 }
 0x813   : > { %vm2406_vm10 = vcmp.gt.f32.partialorder %v2380_v50, 0.0  ;;  %v2422_v4 = vmul.f32 0.2, %v2380_v50  ;;  %v4642_v55 = vpack.i.bf16 %v2532_v34, %v2531_v33 }
 0x815   : > { %v2438_v41 = vsel %vm2406_vm10, %v2380_v50, %v2422_v4  ;;  %4643 = vrot.lane.b32.xlu1 %v4642_v55, %s4894_s27  ;;  %3619 = vmatpush.bf16.msrb.mxu0 %v4352_v42 }
 0x816   : > { %v2454_v46 = vrot.slane %v2438_v41, 7  ;;  %v4652_v14 = vpack.i.bf16 %v2438_v41, %v2437_v5  ;;  %v2502_v57 = vrot.slane %v2438_v41, 1  ;;  %v4351_v5 = vld [vmem:[%s7507_s5 + $0x98] sm:$0xff]  ;;  %v4350_v41 = vld [vmem:[%s7507_s5 + $0x90] sm:$0xff] }
 0x818   : > { %v2382_v44 = vpop.f32.mrf.mxu1  ;;  %4653 = vrot.lane.b32.xlu0 %v4652_v14, %s4897_s23  ;;  %v7048_v58 = vsel %vm2034_vm15, %v2453_v53, %v2454_v46  ;;  %v2515_v53 = vsel %vm2083_vm0, %v2501_v23, %v2502_v57 }
 0x819   : > { %7722 = vst [vmem:[#allocation25_spill] sm:$0xff] %v7048_v58  ;;  %v2383_v22 = vadd.f32 %v2382_v44, %v6782_v9  ;;  %3620 = vmatpush.bf16.msrb.mxu0 %v4351_v5  ;;  %v2533_v42 = vmul.f32 %v2515_v53, %v7716_v3  ;;  %v4342_v53 = vld [vmem:[%s7507_s5 + $0x50] sm:$0xff] }
 0x81b   : > { %vm2407_vm11 = vcmp.gt.f32.partialorder %v2383_v22, 0.0  ;;  %v2423_v39 = vmul.f32 0.2, %v2383_v22 }
 0x81d   : > { %v7054_v50 = vsel %vm2407_vm11, %v2383_v22, %v2423_v39  ;;  %3621 = vmatpush.bf16.msrb.mxu0 %v4350_v41 }
 0x81e   : > { %v2455_v33 = vrot.slane %v7054_v50, 7  ;;  %v7591_v34 = vrot.slane %v7054_v50, 1 }
 0x820   : > { %v2384_v4 = vpop.f32.mrf.mxu1  ;;  %v2514_v55 = vsel %vm2083_vm0, %v2502_v57, %v7591_v34  ;;  %v7069_v18 = vsel %vm2034_vm15, %v2454_v46, %v2455_v33  ;;  %v4343_v46 = vld [vmem:[%s7507_s5 + $0x58] sm:$0xff] }
 0x821   : > { %7723 = vst [vmem:[#allocation26_spill] sm:$0xff] %v7069_v18  ;;  %v2385_v14 = vadd.f32 %v2384_v4, %v6782_v9  ;;  %v2534_v23 = vmul.f32 %v2514_v55, %v7715_v60  ;;  %2772 = vmatpush.bf16.msrb.mxu3 %v4343_v46 }
 0x823   : > { %vm2408_vm13 = vcmp.gt.f32.partialorder %v2385_v14, 0.0  ;;  %v2424_v44 = vmul.f32 0.2, %v2385_v14  ;;  %v4662_v22 = vpack.i.bf16 %v2534_v23, %v2533_v42 }
 0x825   : > { %v7074_v39 = vsel %vm2408_vm13, %v2385_v14, %v2424_v44  ;;  %4663 = vrot.lane.b32.xlu2 %v4662_v22, %s4894_s27  ;;  %2773 = vmatpush.bf16.msrb.mxu3 %v4342_v53  ;;  %v4341_v14 = vld [vmem:[%s7507_s5 + $0x48] sm:$0xff] }
 0x826   : > { %v2456_v57 = vrot.slane %v7074_v39, 7 }
 0x828   : > { %v2387_v5 = vpop.f32.mrf.mxu1  ;;  %v7083_v3 = vsel %vm2034_vm15, %v2455_v33, %v2456_v57  ;;  %v3350_v33 = vrot.slane %v7006_v17, 1 }
 0x829   : > { %7724 = vst [vmem:[#allocation27_spill] sm:$0xff] %v7083_v3  ;;  %v2388_v60 = vadd.f32 %v2387_v5, %v6782_v9  ;;  %2774 = vmatpush.bf16.msrb.mxu3 %v4341_v14 }
 0x82b   : > { %vm2409_vm2 = vcmp.gt.f32.partialorder %v2388_v60, 0.0  ;;  %v2425_v41 = vmul.f32 0.2, %v2388_v60  ;;  %v3236_v4 = vpop.f32.mrf.mxu2 }
 0x82c   : > { %v3237_v55 = vadd.f32 %v3236_v4, %v7708_v36 }
 0x82d   : > { %v7093_v42 = vsel %vm2409_vm2, %v2388_v60, %v2425_v41  ;;  %v4340_v60 = vld [vmem:[%s7507_s5 + $0x40] sm:$0xff]  ;;  %v3355_v41 = vsel %vm2083_vm0, %v3349_v21, %v3350_v33 }
 0x82e   : > { %v2457_v23 = vrot.slane %v7093_v42, 7  ;;  %vm3255_vm4 = vcmp.gt.f32.partialorder %v3237_v55, 0.0  ;;  %v3271_v44 = vmul.f32 0.2, %v3237_v55  ;;  %2775 = vmatpush.bf16.msrb.mxu3 %v4340_v60  ;;  %v3381_v18 = vmul.f32 %v3355_v41, %v6159_v56 }
 0x82f   : > { %v2504_v60 = vrot.slane %v7074_v39, 1  ;;  %v4555_v41 = vunpack.i.l.bf16 %v6809_v26 }
 0x830   : > { %v3287_v22 = vsel %vm3255_vm4, %v3237_v55, %v3271_v44  ;;  %v2389_v46 = vpop.f32.mrf.mxu1  ;;  %v7099_v5 = vsel %vm2034_vm15, %v2456_v57, %v2457_v23 }
 0x831   : > { %7725 = vst [vmem:[#allocation35_spill] sm:$0xff] %v7099_v5  ;;  %v3303_v53 = vrot.slane %v3287_v22, 7  ;;  %v3351_v4 = vrot.slane %v3287_v22, 1  ;;  %v2390_v34 = vadd.f32 %v2389_v46, %v6782_v9  ;;  %v4339_v46 = vld [vmem:[%s7507_s5 + $0x38] sm:$0xff] }
 0x832   : > { %2776 = vmatpush.bf16.msrb.mxu3 %v4339_v46 }
 0x833   : > { %vm2410_vm5 = vcmp.gt.f32.partialorder %v2390_v34, 0.0  ;;  %v2426_v55 = vmul.f32 0.2, %v2390_v34  ;;  %v3238_v14 = vpop.f32.mrf.mxu2  ;;  %v3354_v57 = vsel %vm2083_vm0, %v3350_v33, %v3351_v4  ;;  %v7120_v21 = vsel %vm2034_vm15, %v7726_v31, %v3303_v53 }
 0x834   : > { %v3239_v44 = vadd.f32 %v3238_v14, %v7708_v36  ;;  %v3382_v5 = vmul.f32 %v3354_v57, %v6162_v20  ;;  %7727 = vst [vmem:[#allocation37_spill] sm:$0xff] %v7120_v21  ;;  %v4551_v33 = vunpack.i.h.bf16 %v6822_v62  ;;  %v2505_v14 = vrot.slane %v7093_v42, 1 }
 0x835   : > { %v7122_v3 = vsel %vm2410_vm5, %v2390_v34, %v2426_v55  ;;  %v4556_v34 = vunpack.i.h.bf16 %v6809_v26  ;;  %v7729_v55 = vld [vmem:[#allocation29_spill] sm:$0xff] }
 0x836   : > { %v2458_v36 = vrot.slane %v7122_v3, 7  ;;  %vm3256_vm6 = vcmp.gt.f32.partialorder %v3239_v44, 0.0  ;;  %v3272_v57 = vmul.f32 0.2, %v3239_v44  ;;  %v4657_v7 = vpack.i.bf16 %v3382_v5, %v3381_v18 }
 0x837   : > { %v3322_v31 = vmul.f32 %v7729_v55, %v6182_v12  ;;  %v2512_v55 = vsel %vm2083_vm0, %v2504_v60, %v2505_v14 }
 0x838   : > { %v7131_v17 = vsel %vm2034_vm15, %v2457_v23, %v2458_v36  ;;  %v3288_v21 = vsel %vm3256_vm6, %v3239_v44, %v3272_v57  ;;  %4658 = vrot.lane.b32.xlu1 %v4657_v7, %s4894_s27  ;;  %v4338_v23 = vld [vmem:[%s7507_s5 + $0x30] sm:$0xff]  ;;  %v7730_v44 = vrot.slane %v7054_v50, 1  ;;  %v2506_v7 = vrot.slane %v7122_v3, 1 }
 0x839   : > { %7728 = vst [vmem:[#allocation36_spill] sm:$0xff] %v7131_v17  ;;  %v3304_v58 = vrot.slane %v3288_v21, 7  ;;  %v3352_v52 = vrot.slane %v3288_v21, 1  ;;  %v4667_v18 = vpack.i.bf16 %v3288_v21, %v3287_v22  ;;  %v3514_v46 = vsel %vm2244_vm14, %v3322_v31, %v4551_v33  ;;  %2777 = vmatpush.bf16.msrb.mxu3 %v4338_v23 }
 0x83a   : > { %v2392_v5 = vpop.f32.mrf.mxu1  ;;  %v2513_v62 = vsel %vm2083_vm0, %v7730_v44, %v2504_v60  ;;  %v7731_v22 = vrot.slane %v6329_v29, 7  ;;  %v7732_v57 = vrot.slane %v6329_v29, 1  ;;  %v3530_v17 = vsel %vm2261_vm1, %v3514_v46, %v4556_v34 }
 0x83b   : > { %v2393_v26 = vadd.f32 %v2392_v5, %v6782_v9  ;;  %4668 = vrot.lane.b32.xlu0 %v4667_v18, %s4897_s23  ;;  %v3353_v33 = vsel %vm2083_vm0, %v3351_v4, %v3352_v52  ;;  %v2536_v18 = vmul.f32 %v2512_v55, %v6115_v48  ;;  %v7169_v4 = vsel %vm2034_vm15, %v3303_v53, %v3304_v58 }
 0x83c   : > { %v3320_v21 = vsel %vm2034_vm15, %v3304_v58, %v7731_v22  ;;  %v3368_v31 = vsel %vm2083_vm0, %v3352_v52, %v7732_v57  ;;  %v3383_v44 = vmul.f32 %v3353_v33, %v6192_v32  ;;  %v4672_v29 = vpack.i.bf16 %v7074_v39, %v7054_v50 }
 0x83d   : > { %v3321_v60 = vmul.f32 %v3320_v21, %v6189_v61  ;;  %vm2411_vm7 = vcmp.gt.f32.partialorder %v2393_v26, 0.0  ;;  %v2427_v5 = vmul.f32 0.2, %v2393_v26  ;;  %v3384_v22 = vmul.f32 %v3368_v31, %v6195_v35 }
 0x83e   : > { %v2535_v21 = vmul.f32 %v2513_v62, %v6093_v37  ;;  %v2511_v58 = vsel %vm2083_vm0, %v2505_v14, %v2506_v7 }
 0x83f   : > { %v3513_v52 = vsel %vm2244_vm14, %v3321_v60, %v4550_v51  ;;  %v2443_v23 = vsel %vm2411_vm7, %v2393_v26, %v2427_v5  ;;  %v4677_v16 = vpack.i.bf16 %v3384_v22, %v3383_v44  ;;  %v2537_v14 = vmul.f32 %v2511_v58, %v6159_v56 }
 0x840   : > { %v2459_v57 = vrot.slane %v2443_v23, 7  ;;  %v2507_v33 = vrot.slane %v2443_v23, 1  ;;  %v3529_v34 = vsel %vm2261_vm1, %v3513_v52, %v4555_v41  ;;  %4673 = vrot.lane.b32.xlu1 %v4672_v29, %s4897_s23  ;;  %v4682_v50 = vpack.i.bf16 %v2536_v18, %v2535_v21 }
 0x841   : > { %v3545_v48 = vpack.c.bf16 %v3530_v17, %v3529_v34  ;;  %4678 = vrot.lane.b32.xlu2 %v4677_v16, %s4894_s27  ;;  %v4574_v16 = vpop.permute.xlu2 %4573  ;;  %v4687_v26 = vpack.i.bf16 %v7122_v3, %v7093_v42  ;;  %v7733_v56 = vrot.slane %v6805_v38, 1  ;;  %v7734_v44 = vrot.slane %v6805_v38, 7 }
 0x842   : > { %v2394_v53 = vpop.f32.mrf.mxu1  ;;  %v2510_v51 = vsel %vm2083_vm0, %v2506_v7, %v2507_v33  ;;  %v7184_v37 = vsel %vm2034_vm15, %v2458_v36, %v2459_v57  ;;  %v7735_v18 = vpack.c.bf16 %v6851_v59, %v6848_v11  ;;  %v4576_v29 = vunpack.i.h.bf16 %v4574_v16 }
 0x843   : > { %v2395_v39 = vadd.f32 %v2394_v53, %v6782_v9  ;;  %4260 = vmatmul.msk.bf16.vlgmr.msrb.gmra.mxu0 %vm2323_vm3, %v3545_v48  ;;  %v2538_v17 = vmul.f32 %v2510_v51, %v6162_v20  ;;  %4683 = vrot.lane.b32.xlu0 %v4682_v50, %s4894_s27  ;;  %v4575_v52 = vunpack.i.l.bf16 %v4574_v16  ;;  %v2479_v59 = vmul.f32 %v6914_v2, %v7681_v43  ;;  %v7736_v43 = vld [vmem:[#allocation5_spill] sm:$0xff] }
 0x845   : > { %vm2412_vm8 = vcmp.gt.f32.partialorder %v2395_v39, 0.0  ;;  %v2428_v41 = vmul.f32 0.2, %v2395_v39  ;;  %v4692_v46 = vpack.i.bf16 %v2538_v17, %v2537_v14 }
 0x847   : > { %v2444_v55 = vsel %vm2412_vm8, %v2395_v39, %v2428_v41  ;;  %v3327_v41 = vmul.f32 %v7736_v43, %v6277_v40 }
 0x848   : > { %v2460_v36 = vrot.slane %v2444_v55, 7  ;;  %v2508_v62 = vrot.slane %v2444_v55, 1  ;;  %v4697_v7 = vpack.i.bf16 %v2444_v55, %v2443_v23  ;;  %4688 = vrot.lane.b32.xlu1 %v4687_v26, %s4897_s23 }
 0x849   : > { %4693 = vrot.lane.b32.xlu2 %v4692_v46, %s4894_s27  ;;  %v4589_v5 = vpop.permute.xlu2 %4588 }
 0x84a   : > { %v2509_v20 = vsel %vm2083_vm0, %v2507_v33, %v2508_v62  ;;  %v2524_v9 = vsel %vm2083_vm0, %v2508_v62, %v7733_v56  ;;  %v7203_v31 = vsel %vm2034_vm15, %v2459_v57, %v2460_v36  ;;  %v2476_v22 = vsel %vm2034_vm15, %v2460_v36, %v7734_v44  ;;  %v7739_v44 = vld [vmem:[#allocation34_spill] sm:$0xff] }
 0x84b   : > { %v2539_v3 = vmul.f32 %v2509_v20, %v6192_v32  ;;  %v2540_v42 = vmul.f32 %v2524_v9, %v6195_v35  ;;  %4698 = vrot.lane.b32.xlu0 %v4697_v7, %s4897_s23  ;;  %v2477_v32 = vmul.f32 %v2476_v22, %v6189_v61  ;;  %v2478_v35 = vmul.f32 %v6834_v25, %v6182_v12 }
 0x84c   : > { %v2480_v12 = vmul.f32 %v6931_v15, %v7682_v47  ;;  %v4591_v51 = vunpack.i.h.bf16 %v4589_v5  ;;  %v4590_v39 = vunpack.i.l.bf16 %v4589_v5  ;;  %v7737_v47 = vld [vmem:[#allocation4_spill] sm:$0xff]  ;;  %v3330_v22 = vmul.f32 %v7739_v44, %v7691_v27 }
 0x84d   : > { %v4702_v60 = vpack.i.bf16 %v2540_v42, %v2539_v3  ;;  %v2670_v38 = vsel %vm2244_vm14, %v2478_v35, %v4576_v29  ;;  %v2669_v1 = vsel %vm2244_vm14, %v2477_v32, %v4575_v52  ;;  %v3328_v15 = vmul.f32 %v7737_v47, %v7688_v28  ;;  %v7738_v3 = vld [vmem:[#allocation8_spill] sm:$0xff] }
 0x84e   : > { %v3519_v7 = vsel %vm2244_vm14, %v3327_v41, %v4590_v39  ;;  %v3329_v42 = vmul.f32 %v7738_v3, %v7690_v63  ;;  %v7740_v32 = vpack.c.bf16 %v6876_v8, %v6873_v10 }
 0x84f   : > { %v3520_v62 = vsel %vm2244_vm14, %v3328_v15, %v4591_v51 }
 0x850   : > { %4703 = vrot.lane.b32.xlu1 %v4702_v60, %s4894_s27 }
 0x851   : > { %v4604_v23 = vpop.permute.xlu2 %4603 }
 0x852   : > { %v4606_v53 = vunpack.i.h.bf16 %v4604_v23  ;;  %v4605_v50 = vunpack.i.l.bf16 %v4604_v23 }
 0x853   : > { %4261 = vmatmul.msk.bf16.gmra.mxu0 %vm2323_vm3, %v7735_v18 }
 0x857   : > { %v4584_v21 = vpop.permute.xlu1 %4583 }
 0x858   : > { %v4586_v57 = vunpack.i.h.bf16 %v4584_v21  ;;  %v4585_v33 = vunpack.i.l.bf16 %v4584_v21 }
 0x859   : > { %v4619_v20 = vpop.permute.xlu2 %4618 }
 0x85a   : > { %v2685_v34 = vsel %vm2261_vm1, %v2669_v1, %v4585_v33  ;;  %v2686_v11 = vsel %vm2261_vm1, %v2670_v38, %v4586_v57  ;;  %v4594_v61 = vpop.permute.xlu0 %4593  ;;  %v4621_v35 = vunpack.i.h.bf16 %v4619_v20  ;;  %v4620_v52 = vunpack.i.l.bf16 %v4619_v20 }
 0x85b   : > { %v2701_v48 = vpack.c.bf16 %v2686_v11, %v2685_v34  ;;  %v4596_v25 = vunpack.i.h.bf16 %v4594_v61  ;;  %v4595_v58 = vunpack.i.l.bf16 %v4594_v61  ;;  %v2481_v11 = vmul.f32 %v6946_v6, %v6078_v13 }
 0x85c   : > { %v3331_v13 = vmul.f32 %v6888_v45, %v6677_v49 }
 0x85d   : > { %v2672_v17 = vsel %vm2244_vm14, %v2480_v12, %v4596_v25  ;;  %v2671_v14 = vsel %vm2244_vm14, %v2479_v59, %v4595_v58  ;;  %4196 = vmatmul.msk.bf16.vlgmr.msrb.gmra.mxu3 %vm2323_vm3, %v2701_v48  ;;  %v2482_v59 = vmul.f32 %v6961_v24, %v7683_v19  ;;  %v3332_v19 = vmul.f32 %v6898_v54, %v6659_v0 }
 0x85e   : > { %v2687_v16 = vsel %vm2261_vm1, %v2671_v14, %v4605_v50  ;;  %v2688_v2 = vsel %vm2261_vm1, %v2672_v17, %v4606_v53  ;;  %v2483_v54 = vmul.f32 %v6984_v30, %v6277_v40  ;;  %v7743_v30 = vld [vmem:[#allocation25_spill] sm:$0xff] }
 0x85f   : > { %v4599_v46 = vpop.permute.xlu1 %4598  ;;  %v2702_v26 = vpack.c.bf16 %v2688_v2, %v2687_v16 }
 0x860   : > { %v4601_v55 = vunpack.i.h.bf16 %v4599_v46  ;;  %v4600_v36 = vunpack.i.l.bf16 %v4599_v46 }
 0x862   : > { %v3535_v56 = vsel %vm2261_vm1, %v3519_v7, %v4600_v36  ;;  %v3536_v9 = vsel %vm2261_vm1, %v3520_v62, %v4601_v55  ;;  %v4609_v60 = vpop.permute.xlu0 %4608  ;;  %v4634_v8 = vpop.permute.xlu2 %4633  ;;  %v7741_v55 = vld [vmem:[#allocation20_spill] sm:$0xff] }
 0x863   : > { %v3548_v5 = vpack.c.bf16 %v3536_v9, %v3535_v56  ;;  %v4611_v18 = vunpack.i.h.bf16 %v4609_v60  ;;  %v4610_v29 = vunpack.i.l.bf16 %v4609_v60  ;;  %4262 = vmatmul.msk.bf16.gmra.mxu0 %vm2323_vm3, %v7740_v32  ;;  %v4635_v45 = vunpack.i.l.bf16 %v4634_v8 }
 0x864   : > { %v2484_v36 = vmul.f32 %v7741_v55, %v7688_v28  ;;  %v2486_v28 = vmul.f32 %v7743_v30, %v7691_v27  ;;  %v7753_v30 = vld [vmem:[#allocation35_spill] sm:$0xff] }
 0x865   : > { %v3522_v23 = vsel %vm2244_vm14, %v3330_v22, %v4611_v18  ;;  %v3521_v21 = vsel %vm2244_vm14, %v3329_v42, %v4610_v29  ;;  %v2675_v9 = vsel %vm2244_vm14, %v2483_v54, %v4635_v45 }
 0x866   : > { %v3537_v57 = vsel %vm2261_vm1, %v3521_v21, %v4620_v52  ;;  %v3538_v33 = vsel %vm2261_vm1, %v3522_v23, %v4621_v35 }
 0x867   : > { %v3549_v38 = vpack.c.bf16 %v3538_v33, %v3537_v57 }
 0x86a   : > { %v4614_v1 = vpop.permute.xlu1 %4613  ;;  %v4649_v2 = vpop.permute.xlu2 %4648 }
 0x86b   : > { %v4616_v34 = vunpack.i.h.bf16 %v4614_v1  ;;  %v4615_v10 = vunpack.i.l.bf16 %v4614_v1  ;;  %v4651_v27 = vunpack.i.h.bf16 %v4649_v2  ;;  %v4650_v33 = vunpack.i.l.bf16 %v4649_v2  ;;  %v7745_v1 = vld [vmem:[#allocation18_spill] sm:$0xff] }
 0x86d   : > { %4197 = vmatmul.msk.bf16.gmra.mxu3 %vm2323_vm3, %v2702_v26  ;;  %v2674_v25 = vsel %vm2244_vm14, %v2482_v59, %v4616_v34  ;;  %v2673_v58 = vsel %vm2244_vm14, %v2481_v11, %v4615_v10  ;;  %v4636_v26 = vunpack.i.h.bf16 %v4634_v8  ;;  %v7746_v10 = vld [vmem:[#allocation10_spill] sm:$0xff] }
 0x86e   : > { %v7747_v8 = vld [vmem:[#allocation22_spill] sm:$0xff] }
 0x86f   : > { %v2676_v56 = vsel %vm2244_vm14, %v2484_v36, %v4636_v26  ;;  %v3334_v11 = vmul.f32 %v7747_v8, %v7746_v10 }
 0x872   : > { %v4629_v53 = vpop.permute.xlu1 %4628 }
 0x873   : > { %4263 = vmatmul.msk.bf16.gmra.mxu0 %vm2323_vm3, %v3548_v5  ;;  %v4631_v17 = vunpack.i.h.bf16 %v4629_v53  ;;  %v4630_v14 = vunpack.i.l.bf16 %v4629_v53  ;;  %v7742_v5 = vld [vmem:[#allocation21_spill] sm:$0xff] }
 0x874   : > { %v2485_v44 = vmul.f32 %v7742_v5, %v7690_v63 }
 0x875   : > { %v3524_v43 = vsel %vm2244_vm14, %v3332_v19, %v4631_v17  ;;  %v3523_v41 = vsel %vm2244_vm14, %v3331_v13, %v4630_v14  ;;  %v7750_v19 = vld [vmem:[#allocation17_spill] sm:$0xff] }
 0x877   : > { %v4624_v61 = vpop.permute.xlu0 %4623 }
 0x878   : > { %v4626_v48 = vunpack.i.h.bf16 %v4624_v61  ;;  %v4625_v12 = vunpack.i.l.bf16 %v4624_v61 }
 0x87a   : > { %v2690_v50 = vsel %vm2261_vm1, %v2674_v25, %v4626_v48  ;;  %v2689_v51 = vsel %vm2261_vm1, %v2673_v58, %v4625_v12  ;;  %v3526_v12 = vsel %vm2244_vm14, %v3334_v11, %v4651_v27  ;;  %v2492_v11 = vmul.f32 %v7203_v31, %v7750_v19 }
 0x87b   : > { %v2703_v39 = vpack.c.bf16 %v2690_v50, %v2689_v51  ;;  %v7748_v51 = vld [vmem:[#allocation16_spill] sm:$0xff] }
 0x87c   : > { %v2491_v8 = vmul.f32 %v7184_v37, %v7748_v51 }
 0x87d   : > { %4198 = vmatmul.msk.bf16.gmra.mxu3 %vm2323_vm3, %v2703_v39  ;;  %v7749_v39 = vld [vmem:[#allocation37_spill] sm:$0xff] }
 0x87e   : > { %v3335_v17 = vmul.f32 %v7749_v39, %v7748_v51 }
 0x87f   : > { %v4639_v6 = vpop.permute.xlu0 %4638  ;;  %v4664_v3 = vpop.permute.xlu2 %4663 }
 0x880   : > { %v4641_v24 = vunpack.i.h.bf16 %v4639_v6  ;;  %v4640_v16 = vunpack.i.l.bf16 %v4639_v6  ;;  %v4666_v32 = vunpack.i.h.bf16 %v4664_v3  ;;  %v4665_v35 = vunpack.i.l.bf16 %v4664_v3 }
 0x881   : > { %v3336_v6 = vmul.f32 %v7169_v4, %v7750_v19  ;;  %v7751_v4 = vld [vmem:[#allocation26_spill] sm:$0xff] }
 0x882   : > { %v3540_v47 = vsel %vm2261_vm1, %v3524_v43, %v4641_v24  ;;  %v3539_v15 = vsel %vm2261_vm1, %v3523_v41, %v4640_v16  ;;  %v2487_v36 = vmul.f32 %v7751_v4, %v6677_v49 }
 0x883   : > { %v3550_v46 = vpack.c.bf16 %v3540_v47, %v3539_v15  ;;  %4264 = vmatmul.msk.bf16.gmra.mxu0 %vm2323_vm3, %v3549_v38  ;;  %v7744_v38 = vld [vmem:[#allocation19_spill] sm:$0xff] }
 0x884   : > { %v3333_v34 = vmul.f32 %v7745_v1, %v7744_v38  ;;  %v2489_v49 = vmul.f32 %v7753_v30, %v7744_v38 }
 0x886   : > { %v3525_v25 = vsel %vm2244_vm14, %v3333_v34, %v4650_v33  ;;  %v7329_v34 = vld [vmem:[%s7508_s6] sm:$0x1f] }
 0x887   : > { %v4644_v62 = vpop.permute.xlu1 %4643 }
 0x888   : > { %v4646_v7 = vunpack.i.h.bf16 %v4644_v62  ;;  %v4645_v20 = vunpack.i.l.bf16 %v4644_v62  ;;  %v7752_v62 = vld [vmem:[#allocation27_spill] sm:$0xff] }
 0x88a   : > { %v2691_v42 = vsel %vm2261_vm1, %v2675_v9, %v4645_v20  ;;  %v2692_v60 = vsel %vm2261_vm1, %v2676_v56, %v4646_v7  ;;  %v4654_v22 = vpop.permute.xlu0 %4653  ;;  %v2488_v7 = vmul.f32 %v7752_v62, %v6659_v0 }
 0x88b   : > { %v2704_v40 = vpack.c.bf16 %v2692_v60, %v2691_v42  ;;  %v4656_v18 = vunpack.i.h.bf16 %v4654_v22  ;;  %v4655_v29 = vunpack.i.l.bf16 %v4654_v22 }
 0x88d   : > { %v2678_v52 = vsel %vm2244_vm14, %v2486_v28, %v4656_v18  ;;  %v2677_v23 = vsel %vm2244_vm14, %v2485_v44, %v4655_v29  ;;  %4199 = vmatmul.msk.bf16.gmra.mxu3 %vm2323_vm3, %v2704_v40  ;;  %v7754_v28 = vld [vmem:[#allocation36_spill] sm:$0xff] }
 0x88e   : > { %v2693_v21 = vsel %vm2261_vm1, %v2677_v23, %v4665_v35  ;;  %v2694_v57 = vsel %vm2261_vm1, %v2678_v52, %v4666_v32  ;;  %v2490_v0 = vmul.f32 %v7754_v28, %v7746_v10  ;;  %v7332_v10 = vperm.slane %v7329_v34, 3 }
 0x88f   : > { %v2705_v63 = vpack.c.bf16 %v2694_v57, %v2693_v21 }
 0x893   : > { %4265 = vmatmul.msk.bf16.gmra.mxu0 %vm2323_vm3, %v3550_v46 }
 0x89b   : > { %v4679_v58 = vpop.permute.xlu2 %4678 }
 0x89c   : > { %v4681_v2 = vunpack.i.h.bf16 %v4679_v58  ;;  %v4680_v43 = vunpack.i.l.bf16 %v4679_v58 }
 0x89d   : > { %4200 = vmatmul.msk.bf16.gmra.mxu3 %vm2323_vm3, %v2705_v63 }
 0x8a3   : > { %v4694_v44 = vpop.permute.xlu2 %4693 }
 0x8a4   : > { %v4696_v32 = vunpack.i.h.bf16 %v4694_v44  ;;  %v4695_v35 = vunpack.i.l.bf16 %v4694_v44 }
 0x8aa   : > { %v4659_v59 = vpop.permute.xlu1 %4658 }
 0x8ab   : > { %v4661_v61 = vunpack.i.h.bf16 %v4659_v59  ;;  %v4660_v48 = vunpack.i.l.bf16 %v4659_v59 }
 0x8ad   : > { %v3541_v53 = vsel %vm2261_vm1, %v3525_v25, %v4660_v48  ;;  %v3542_v50 = vsel %vm2261_vm1, %v3526_v12, %v4661_v61  ;;  %v4669_v14 = vpop.permute.xlu0 %4668 }
 0x8ae   : > { %v3551_v13 = vpack.c.bf16 %v3542_v50, %v3541_v53  ;;  %v4671_v24 = vunpack.i.h.bf16 %v4669_v14  ;;  %v4670_v16 = vunpack.i.l.bf16 %v4669_v14 }
 0x8b0   : > { %v3528_v41 = vsel %vm2244_vm14, %v3336_v6, %v4671_v24  ;;  %v3527_v47 = vsel %vm2244_vm14, %v3335_v17, %v4670_v16  ;;  %4266 = vmatmul.msk.bf16.gmra.mxu0 %vm2323_vm3, %v3551_v13 }
 0x8b1   : > { %v3543_v15 = vsel %vm2261_vm1, %v3527_v47, %v4680_v43  ;;  %v3544_v46 = vsel %vm2261_vm1, %v3528_v41, %v4681_v2 }
 0x8b2   : > { %v4674_v26 = vpop.permute.xlu1 %4673  ;;  %v3552_v45 = vpack.c.bf16 %v3544_v46, %v3543_v15 }
 0x8b3   : > { %v4676_v54 = vunpack.i.h.bf16 %v4674_v26  ;;  %v4675_v55 = vunpack.i.l.bf16 %v4674_v26 }
 0x8b5   : > { %v4684_v20 = vpop.permute.xlu0 %4683  ;;  %v2680_v3 = vsel %vm2244_vm14, %v2488_v7, %v4676_v54  ;;  %v2679_v42 = vsel %vm2244_vm14, %v2487_v36, %v4675_v55 }
 0x8b6   : > { %v4686_v56 = vunpack.i.h.bf16 %v4684_v20  ;;  %v4685_v9 = vunpack.i.l.bf16 %v4684_v20 }
 0x8b8   : > { %v2696_v60 = vsel %vm2261_vm1, %v2680_v3, %v4686_v56  ;;  %v2695_v5 = vsel %vm2261_vm1, %v2679_v42, %v4685_v9 }
 0x8b9   : > { %v2706_v22 = vpack.c.bf16 %v2696_v60, %v2695_v5 }
 0x8ba   : > { %v4689_v40 = vpop.permute.xlu1 %4688 }
 0x8bb   : > { %v4691_v18 = vunpack.i.h.bf16 %v4689_v40  ;;  %v4690_v29 = vunpack.i.l.bf16 %v4689_v40  ;;  %4201 = vmatmul.msk.bf16.gmra.mxu3 %vm2323_vm3, %v2706_v22 }
 0x8bd   : > { %v2682_v52 = vsel %vm2244_vm14, %v2490_v0, %v4691_v18  ;;  %v2681_v23 = vsel %vm2244_vm14, %v2489_v49, %v4690_v29  ;;  %v4699_v21 = vpop.permute.xlu0 %4698 }
 0x8be   : > { %v2697_v57 = vsel %vm2261_vm1, %v2681_v23, %v4695_v35  ;;  %v2698_v63 = vsel %vm2261_vm1, %v2682_v52, %v4696_v32  ;;  %v4701_v38 = vunpack.i.h.bf16 %v4699_v21  ;;  %v4700_v1 = vunpack.i.l.bf16 %v4699_v21 }
 0x8bf   : > { %v2707_v33 = vpack.c.bf16 %v2698_v63, %v2697_v57 }
 0x8c0   : > { %v3623_v27 = vpop.f32.mrf.mxu0  ;;  %4267 = vmatmul.msk.bf16.gmra.mxu0 %vm2323_vm3, %v3552_v45  ;;  %v2684_v12 = vsel %vm2244_vm14, %v2492_v11, %v4701_v38  ;;  %v2683_v25 = vsel %vm2244_vm14, %v2491_v8, %v4700_v1 }
 0x8c1   : > { %v3624_v58 = vadd.f32 %v3623_v27, %v7332_v10 }
 0x8c2   : > { %v4704_v59 = vpop.permute.xlu1 %4703 }
 0x8c3   : > { %v4706_v61 = vunpack.i.h.bf16 %v4704_v59  ;;  %v4705_v48 = vunpack.i.l.bf16 %v4704_v59  ;;  %v3679_v14 = vmul.f32 0.2, %v3624_v58  ;;  %vm3663_vm15 = vcmp.gt.f32.partialorder %v3624_v58, 0.0 }
 0x8c5   : > { %v2699_v53 = vsel %vm2261_vm1, %v2683_v25, %v4705_v48  ;;  %v2700_v50 = vsel %vm2261_vm1, %v2684_v12, %v4706_v61  ;;  %v7346_v51 = vsel %vm3663_vm15, %v3624_v58, %v3679_v14 }
 0x8c6   : > { %v2708_v39 = vpack.c.bf16 %v2700_v50, %v2699_v53 }
 0x8c8   : > { %v3625_v17 = vpop.f32.mrf.mxu0 }
 0x8c9   : > { %v3626_v37 = vadd.f32 %v3625_v17, %v7332_v10 }
 0x8cb   : > { %vm3664_vm0 = vcmp.gt.f32.partialorder %v3626_v37, 0.0  ;;  %v3680_v31 = vmul.f32 0.2, %v3626_v37  ;;  %4202 = vmatmul.msk.bf16.gmra.mxu3 %vm2323_vm3, %v2707_v33 }
 0x8cd   : > { %v7348_v13 = vsel %vm3664_vm0, %v3626_v37, %v3680_v31 }
 0x8ce   : > { %v4742_v19 = vpack.i.bf16 %v7348_v13, %v7346_v51 }
 0x8d0   : > { %v3628_v6 = vpop.f32.mrf.mxu0 }
 0x8d1   : > { %v3629_v24 = vadd.f32 %v3628_v6, %v7332_v10 }
 0x8d3   : > { %v3681_v2 = vmul.f32 0.2, %v3629_v24  ;;  %vm3665_vm12 = vcmp.gt.f32.partialorder %v3629_v24, 0.0 }
 0x8d5   : > { %v7355_v47 = vsel %vm3665_vm12, %v3629_v24, %v3681_v2 }
 0x8d8   : > { %v3630_v16 = vpop.f32.mrf.mxu0 }
 0x8d9   : > { %v3631_v43 = vadd.f32 %v3630_v16, %v7332_v10 }
 0x8db   : > { %vm3666_vm9 = vcmp.gt.f32.partialorder %v3631_v43, 0.0  ;;  %v3682_v41 = vmul.f32 0.2, %v3631_v43  ;;  %4203 = vmatmul.msk.bf16.gmra.mxu3 %vm2323_vm3, %v2708_v39 }
 0x8dd   : > { %v7357_v15 = vsel %vm3666_vm9, %v3631_v43, %v3682_v41 }
 0x8de   : > { %v4737_v46 = vpack.i.bf16 %v7357_v15, %v7355_v47 }
 0x8e0   : > { %v3633_v26 = vpop.f32.mrf.mxu0  ;;  %v7365_v22 = vpop.f32.mrf.mxu3 }
 0x8e1   : > { %v3634_v57 = vadd.f32 %v3633_v26, %v7332_v10 }
 0x8e3   : > { %v3683_v8 = vmul.f32 0.2, %v3634_v57  ;;  %vm3667_vm6 = vcmp.gt.f32.partialorder %v3634_v57, 0.0 }
 0x8e5   : > { %v3699_v59 = vsel %vm3667_vm6, %v3634_v57, %v3683_v8 }
 0x8e8   : > { %v3635_v45 = vpop.f32.mrf.mxu0  ;;  %v7367_v18 = vpop.f32.mrf.mxu3 }
 0x8e9   : > { %v3636_v23 = vadd.f32 %v3635_v45, %v7332_v10 }
 0x8eb   : > { %v3684_v38 = vmul.f32 0.2, %v3636_v23  ;;  %vm3668_vm5 = vcmp.gt.f32.partialorder %v3636_v23, 0.0 }
 0x8ed   : > { %v3700_v11 = vsel %vm3668_vm5, %v3636_v23, %v3684_v38 }
 0x8ee   : > { %v4732_v61 = vpack.i.bf16 %v3700_v11, %v3699_v59 }
 0x8f0   : > { %v3638_v54 = vpop.f32.mrf.mxu0  ;;  %v7373_v1 = vpop.f32.mrf.mxu3 }
 0x8f1   : > { %v3639_v55 = vadd.f32 %v3638_v54, %v7332_v10 }
 0x8f3   : > { %v3685_v36 = vmul.f32 0.2, %v3639_v55  ;;  %vm3669_vm10 = vcmp.gt.f32.partialorder %v3639_v55, 0.0 }
 0x8f5   : > { %v3701_v20 = vsel %vm3669_vm10, %v3639_v55, %v3685_v36 }
 0x8f8   : > { %v3640_v4 = vpop.f32.mrf.mxu0  ;;  %v7377_v48 = vpop.f32.mrf.mxu3 }
 0x8f9   : > { %v3641_v62 = vadd.f32 %v3640_v4, %v7332_v10 }
 0x8fb   : > { %vm3670_vm11 = vcmp.gt.f32.partialorder %v3641_v62, 0.0  ;;  %v3686_v7 = vmul.f32 0.2, %v3641_v62 }
 0x8fd   : > { %v3702_v56 = vsel %vm3670_vm11, %v3641_v62, %v3686_v7 }
 0x8fe   : > { %v4727_v9 = vpack.i.bf16 %v3702_v56, %v3701_v20 }
 0x900   : > { %v3643_v3 = vpop.f32.mrf.mxu0  ;;  %v2789_v25 = vpop.f32.mrf.mxu3 }
 0x901   : > { %v3644_v42 = vadd.f32 %v3643_v3, %v7332_v10  ;;  %v7396_v3 = vperm.slane %v7329_v34, 1 }
 0x903   : > { %v3687_v5 = vmul.f32 0.2, %v3644_v42  ;;  %vm3671_vm3 = vcmp.gt.f32.partialorder %v3644_v42, 0.0  ;;  %v2790_v51 = vadd.f32 %v2789_v25, %v7396_v3  ;;  %v2787_v25 = vadd.f32 %v7377_v48, %v7396_v3 }
 0x905   : > { %v3703_v30 = vsel %vm3671_vm3, %v3644_v42, %v3687_v5  ;;  %vm2823_vm12 = vcmp.gt.f32.partialorder %v2790_v51, 0.0 }
 0x908   : > { %v3645_v60 = vpop.f32.mrf.mxu0  ;;  %v2791_v6 = vpop.f32.mrf.mxu3 }
 0x909   : > { %v3646_v44 = vadd.f32 %v3645_v60, %v7332_v10  ;;  %v2792_v13 = vadd.f32 %v2791_v6, %v7396_v3  ;;  %v2839_v60 = vmul.f32 0.2, %v2790_v51 }
 0x90b   : > { %vm3672_vm13 = vcmp.gt.f32.partialorder %v3646_v44, 0.0  ;;  %v3688_v40 = vmul.f32 0.2, %v3646_v44  ;;  %v2840_v5 = vmul.f32 0.2, %v2792_v13  ;;  %vm2824_vm9 = vcmp.gt.f32.partialorder %v2792_v13, 0.0 }
 0x90d   : > { %v3704_v49 = vsel %vm3672_vm13, %v3646_v44, %v3688_v40  ;;  %v2855_v44 = vsel %vm2823_vm12, %v2790_v51, %v2839_v60  ;;  %v2856_v40 = vsel %vm2824_vm9, %v2792_v13, %v2840_v5  ;;  %v2838_v5 = vmul.f32 0.2, %v2787_v25 }
 0x90e   : > { %v4722_v28 = vpack.i.bf16 %v3704_v49, %v3703_v30 }
 0x910   : > { %v3648_v0 = vpop.f32.mrf.mxu0  ;;  %v2794_v43 = vpop.f32.mrf.mxu3 }
 0x911   : > { %v3649_v29 = vadd.f32 %v3648_v0, %v7332_v10 }
 0x913   : > { %v3689_v35 = vmul.f32 0.2, %v3649_v29  ;;  %vm3673_vm2 = vcmp.gt.f32.partialorder %v3649_v29, 0.0 }
 0x915   : > { %v3705_v63 = vsel %vm3673_vm2, %v3649_v29, %v3689_v35 }
 0x918   : > { %v3650_v32 = vpop.f32.mrf.mxu0  ;;  %v2796_v36 = vpop.f32.mrf.mxu3 }
 0x919   : > { %v3651_v52 = vadd.f32 %v3650_v32, %v7332_v10 }
 0x91b   : > { %vm3674_vm4 = vcmp.gt.f32.partialorder %v3651_v52, 0.0  ;;  %v3690_v21 = vmul.f32 0.2, %v3651_v52 }
 0x91d   : > { %v3706_v27 = vsel %vm3674_vm4, %v3651_v52, %v3690_v21 }
 0x91e   : > { %v4717_v33 = vpack.i.bf16 %v3706_v27, %v3705_v63 }
 0x920   : > { %4718 = vrot.lane.b32.xlu1 %v4717_v33, %s4897_s23  ;;  %v2799_v62 = vpop.f32.mrf.mxu3 }
 0x921   : > { %v2800_v23 = vadd.f32 %v2799_v62, %v7396_v3 }
 0x923   : > { %vm2827_vm3 = vcmp.gt.f32.partialorder %v2800_v23, 0.0 }
 0x928   : > { %4733 = vrot.lane.b32.xlu1 %v4732_v61, %s4897_s23 }
 0x92d   : > { %v3653_v12 = vpop.f32.mrf.mxu0 }
 0x92e   : > { %v3654_v58 = vadd.f32 %v3653_v12, %v7332_v10  ;;  %v2785_v12 = vadd.f32 %v7373_v1, %v7396_v3 }
 0x930   : > { %v3691_v50 = vmul.f32 0.2, %v3654_v58  ;;  %vm3675_vm7 = vcmp.gt.f32.partialorder %v3654_v58, 0.0  ;;  %v2837_v13 = vmul.f32 0.2, %v2785_v12 }
 0x932   : > { %v3707_v14 = vsel %vm3675_vm7, %v3654_v58, %v3691_v50  ;;  %v2795_v50 = vadd.f32 %v2794_v43, %v7396_v3  ;;  %vm2821_vm7 = vcmp.gt.f32.partialorder %v2785_v12, 0.0 }
 0x935   : > { %v3655_v53 = vpop.f32.mrf.mxu0 }
 0x936   : > { %v3656_v39 = vadd.f32 %v3655_v53, %v7332_v10 }
 0x938   : > { %vm3676_vm8 = vcmp.gt.f32.partialorder %v3656_v39, 0.0  ;;  %v3692_v17 = vmul.f32 0.2, %v3656_v39 }
 0x93a   : > { %v3708_v37 = vsel %vm3676_vm8, %v3656_v39, %v3692_v17  ;;  %v2843_v39 = vmul.f32 0.2, %v2800_v23  ;;  %v2797_v17 = vadd.f32 %v2796_v36, %v7396_v3  ;;  %vm2822_vm8 = vcmp.gt.f32.partialorder %v2787_v25, 0.0 }
 0x93b   : > { %v4712_v31 = vpack.i.bf16 %v3708_v37, %v3707_v14 }
 0x93d   : > { %v3658_v24 = vpop.f32.mrf.mxu0  ;;  %4713 = vrot.lane.b32.xlu0 %v4712_v31, %s4897_s23 }
 0x93e   : > { %v3659_v16 = vadd.f32 %v3658_v24, %v7332_v10 }
 0x940   : > { %v3693_v41 = vmul.f32 0.2, %v3659_v16  ;;  %vm3677_vm15 = vcmp.gt.f32.partialorder %v3659_v16, 0.0 }
 0x942   : > { %v3709_v54 = vsel %vm3677_vm15, %v3659_v16, %v3693_v41  ;;  %vm2825_vm15 = vcmp.gt.f32.partialorder %v2795_v50, 0.0 }
 0x945   : > { %v3660_v2 = vpop.f32.mrf.mxu0  ;;  %4728 = vrot.lane.b32.xlu0 %v4727_v9, %s4897_s23 }
 0x946   : > { %v3661_v26 = vadd.f32 %v3660_v2, %v7332_v10  ;;  %v2801_v10 = vpop.f32.mrf.mxu3 }
 0x947   : > { %v2802_v21 = vadd.f32 %v2801_v10, %v7396_v3 }
 0x948   : > { %vm3678_vm0 = vcmp.gt.f32.partialorder %v3661_v26, 0.0  ;;  %v3694_v45 = vmul.f32 0.2, %v3661_v26 }
 0x949   : > { %vm2828_vm13 = vcmp.gt.f32.partialorder %v2802_v21, 0.0  ;;  %v2844_v14 = vmul.f32 0.2, %v2802_v21 }
 0x94a   : > { %v3710_v55 = vsel %vm3678_vm0, %v3661_v26, %v3694_v45  ;;  %vm2826_vm0 = vcmp.gt.f32.partialorder %v2797_v17, 0.0 }
 0x94b   : > { %v4707_v4 = vpack.i.bf16 %v3710_v55, %v3709_v54  ;;  %v2859_v54 = vsel %vm2827_vm3, %v2800_v23, %v2843_v39  ;;  %v2860_v55 = vsel %vm2828_vm13, %v2802_v21, %v2844_v14  ;;  %v2853_v23 = vsel %vm2821_vm7, %v2785_v12, %v2837_v13 }
 0x94c   : > { %v2854_v21 = vsel %vm2822_vm8, %v2787_v25, %v2838_v5  ;;  %vm3988_vm13 = vcmask 7168  }
 0x94d   : > { %4708 = vrot.lane.b32.xlu2 %v4707_v4, %s4897_s23  ;;  %4743 = vrot.lane.b32.xlu0 %v4742_v19, %s4897_s23 }
 0x94e   : > { %v2804_v7 = vpop.f32.mrf.mxu3 }
 0x94f   : > { %v2805_v11 = vadd.f32 %v2804_v7, %v7396_v3 }
 0x951   : > { %vm2829_vm2 = vcmp.gt.f32.partialorder %v2805_v11, 0.0  ;;  %v2845_v6 = vmul.f32 0.2, %v2805_v11 }
 0x955   : > { %4723 = vrot.lane.b32.xlu2 %v4722_v28, %s4897_s23 }
 0x956   : > { %v2806_v20 = vpop.f32.mrf.mxu3 }
 0x957   : > { %v2807_v58 = vadd.f32 %v2806_v20, %v7396_v3 }
 0x959   : > { %vm2830_vm6 = vcmp.gt.f32.partialorder %v2807_v58, 0.0  ;;  %v2846_v1 = vmul.f32 0.2, %v2807_v58 }
 0x95d   : > { %4738 = vrot.lane.b32.xlu2 %v4737_v46, %s4897_s23 }
 0x95e   : > { %v2809_v56 = vpop.f32.mrf.mxu3 }
 0x95f   : > { %v2810_v27 = vadd.f32 %v2809_v56, %v7396_v3  ;;  %v2861_v56 = vsel %vm2829_vm2, %v2805_v11, %v2845_v6  ;;  %v4358_v6 = vld [vmem:[%s7509_s7 + $0x10] sm:$0xff] }
 0x961   : > { %v2847_v37 = vmul.f32 0.2, %v2810_v27  ;;  %vm2831_vm4 = vcmp.gt.f32.partialorder %v2810_v27, 0.0 }
 0x963   : > { %v2863_v4 = vsel %vm2831_vm4, %v2810_v27, %v2847_v37  ;;  %v4359_v37 = vld [vmem:[%s7509_s7 + $0x18] sm:$0xff] }
 0x966   : > { %v2811_v9 = vpop.f32.mrf.mxu3 }
 0x967   : > { %v2812_v33 = vadd.f32 %v2811_v9, %v7396_v3  ;;  %v2862_v9 = vsel %vm2830_vm6, %v2807_v58, %v2846_v1  ;;  %v4362_v1 = vld [vmem:[%s7509_s7 + $0x30] sm:$0xff] }
 0x969   : > { %v2848_v31 = vmul.f32 0.2, %v2812_v33  ;;  %vm2832_vm5 = vcmp.gt.f32.partialorder %v2812_v33, 0.0 }
 0x96b   : > { %v2864_v36 = vsel %vm2832_vm5, %v2812_v33, %v2848_v31 }
 0x96e   : > { %v2814_v19 = vpop.f32.mrf.mxu3 }
 0x96f   : > { %v2815_v0 = vadd.f32 %v2814_v19, %v7396_v3 }
 0x971   : > { %v2849_v32 = vmul.f32 0.2, %v2815_v0  ;;  %vm2833_vm10 = vcmp.gt.f32.partialorder %v2815_v0, 0.0 }
 0x973   : > { %v2865_v38 = vsel %vm2833_vm10, %v2815_v0, %v2849_v32 }
 0x976   : > { %v2816_v28 = vpop.f32.mrf.mxu3 }
 0x977   : > { %v2817_v29 = vadd.f32 %v2816_v28, %v7396_v3 }
 0x979   : > { %v2850_v35 = vmul.f32 0.2, %v2817_v29  ;;  %vm2834_vm11 = vcmp.gt.f32.partialorder %v2817_v29, 0.0 }
 0x97b   : > { %v2866_v8 = vsel %vm2834_vm11, %v2817_v29, %v2850_v35 }
 0x992   : > { %v7398_v42 = vpop.permute.xlu1 %4718 }
 0x993   : > { %v4721_v48 = vunpack.i.h.bf16 %v7398_v42  ;;  %v4720_v24 = vunpack.i.l.bf16 %v7398_v42 }
 0x995   : > { %v3785_v19 = vsel %vm2244_vm14, %v2861_v56, %v4720_v24  ;;  %v3786_v60 = vsel %vm2244_vm14, %v2862_v9, %v4721_v48  ;;  %v4361_v48 = vld [vmem:[%s7509_s7 + $0x28] sm:$0xff]  ;;  %v4360_v24 = vld [vmem:[%s7509_s7 + $0x20] sm:$0xff] }
 0x996   : > { %v3796_v0 = vpack.c.bf16 %v3786_v60, %v3785_v19  ;;  %v4364_v56 = vld [vmem:[%s7509_s7 + $0x40] sm:$0xff] }
 0x99a   : > { %v4734_v47 = vpop.permute.xlu1 %4733 }
 0x99b   : > { %v4736_v15 = vunpack.i.h.bf16 %v4734_v47  ;;  %v4735_v46 = vunpack.i.l.bf16 %v4734_v47  ;;  %v2841_v47 = vmul.f32 0.2, %v2795_v50 }
 0x99d   : > { %v7403_v30 = vsel %vm2244_vm14, %v2855_v44, %v4735_v46  ;;  %v7406_v34 = vsel %vm2244_vm14, %v2856_v40, %v4736_v15  ;;  %v2842_v15 = vmul.f32 0.2, %v2797_v17  ;;  %v2780_v46 = vadd.f32 %v7365_v22, %v7396_v3 }
 0x99e   : > { %v3793_v49 = vpack.c.bf16 %v7406_v34, %v7403_v30  ;;  %v2782_v44 = vadd.f32 %v7367_v18, %v7396_v3  ;;  %v4357_v30 = vld [vmem:[%s7509_s7 + $0x8] sm:$0xff]  ;;  %v4356_v34 = vld [vmem:[%s7509_s7] sm:$0xff] }
 0x99f   : > { %vm2819_vm12 = vcmp.gt.f32.partialorder %v2780_v46, 0.0 }
 0x9a0   : > { %v2836_v11 = vmul.f32 0.2, %v2782_v44  ;;  %vm2820_vm9 = vcmp.gt.f32.partialorder %v2782_v44, 0.0 }
 0x9a2   : > { %v2852_v58 = vsel %vm2820_vm9, %v2782_v44, %v2836_v11 }
 0x9a7   : > { %v4709_v52 = vpop.permute.xlu2 %4708 }
 0x9a8   : > { %v4711_v57 = vunpack.i.h.bf16 %v4709_v52  ;;  %v4710_v63 = vunpack.i.l.bf16 %v4709_v52 }
 0x9aa   : > { %v3790_v59 = vsel %vm2244_vm14, %v2866_v8, %v4711_v57  ;;  %v3789_v61 = vsel %vm2244_vm14, %v2865_v38, %v4710_v63  ;;  %v2857_v57 = vsel %vm2825_vm15, %v2795_v50, %v2841_v47  ;;  %v2858_v63 = vsel %vm2826_vm0, %v2797_v17, %v2842_v15  ;;  %v7755_v17 = vld [vmem:[#allocation3_spill] sm:$0xff] }
 0x9ab   : > { %v3798_v53 = vpack.c.bf16 %v3790_v59, %v3789_v61  ;;  %v2835_v8 = vmul.f32 0.2, %v2780_v46  ;;  %v740_v14 = vmul.f32 0.0625, %v7755_v17 }
 0x9ad   : > { %3799 = vmatpush.bf16.msra.mxu1 %v3798_v53  ;;  %v2851_v25 = vsel %vm2819_vm12, %v2780_v46, %v2835_v8  ;;  %v741_v31 = vpack.c.bf16 %v740_v14, %v740_v14 }
 0x9af   : > { %v4714_v16 = vpop.permute.xlu0 %4713  ;;  %v4724_v2 = vpop.permute.xlu2 %4723 }
 0x9b0   : > { %v4716_v43 = vunpack.i.h.bf16 %v4714_v16  ;;  %v4715_v41 = vunpack.i.l.bf16 %v4714_v16  ;;  %v4726_v26 = vunpack.i.h.bf16 %v4724_v2  ;;  %v4725_v45 = vunpack.i.l.bf16 %v4724_v2 }
 0x9b2   : > { %v3787_v62 = vsel %vm2244_vm14, %v2863_v4, %v4715_v41  ;;  %v3788_v10 = vsel %vm2244_vm14, %v2864_v36, %v4716_v43  ;;  %v3783_v7 = vsel %vm2244_vm14, %v2859_v54, %v4725_v45  ;;  %v3784_v20 = vsel %vm2244_vm14, %v2860_v55, %v4726_v26  ;;  %v4367_v41 = vld [vmem:[%s7509_s7 + $0x58] sm:$0xff]  ;;  %v4366_v26 = vld [vmem:[%s7509_s7 + $0x50] sm:$0xff]  ;;  %v3836_v45 = vld [vmem:[%s7510_s8] sm:$0x7] }
 0x9b3   : > { %v3797_v42 = vpack.c.bf16 %v3788_v10, %v3787_v62  ;;  %v3795_v51 = vpack.c.bf16 %v3784_v20, %v3783_v7  ;;  %v3838_v54 = vperm.slane %v3836_v45, 0  ;;  %v4365_v20 = vld [vmem:[%s7509_s7 + $0x48] sm:$0xff]  ;;  %v3883_v9 = vperm.slane %v3836_v45, 1 }
 0x9b4   : > { %v3928_v47 = vperm.slane %v3836_v45, 2 }
 0x9b5   : > { %3800 = vmatpush.bf16.msra.mxu1 %v3797_v42 }
 0x9b7   : > { %v4729_v40 = vpop.permute.xlu0 %4728  ;;  %v4739_v28 = vpop.permute.xlu2 %4738 }
 0x9b8   : > { %v4731_v29 = vunpack.i.h.bf16 %v4729_v40  ;;  %v4730_v32 = vunpack.i.l.bf16 %v4729_v40  ;;  %v4741_v35 = vunpack.i.h.bf16 %v4739_v28  ;;  %v4740_v52 = vunpack.i.l.bf16 %v4739_v28 }
 0x9b9   : > { %3801 = vmatpush.bf16.msra.mxu1 %v3796_v0 }
 0x9ba   : > { %v3781_v27 = vsel %vm2244_vm14, %v2857_v57, %v4730_v32  ;;  %v3782_v33 = vsel %vm2244_vm14, %v2858_v63, %v4731_v29  ;;  %v3777_v22 = vsel %vm2244_vm14, %v2853_v23, %v4740_v52  ;;  %v3778_v18 = vsel %vm2244_vm14, %v2854_v21, %v4741_v35 }
 0x9bb   : > { %v3794_v3 = vpack.c.bf16 %v3782_v33, %v3781_v27  ;;  %v3792_v38 = vpack.c.bf16 %v3778_v18, %v3777_v22 }
 0x9bd   : > { %3802 = vmatpush.bf16.msra.mxu1 %v3795_v51 }
 0x9bf   : > { %v4744_v59 = vpop.permute.xlu0 %4743 }
 0x9c0   : > { %v4746_v61 = vunpack.i.h.bf16 %v4744_v59  ;;  %v4745_v12 = vunpack.i.l.bf16 %v4744_v59 }
 0x9c1   : > { %3803 = vmatpush.bf16.msra.mxu1 %v3794_v3 }
 0x9c2   : > { %v3775_v53 = vsel %vm2244_vm14, %v2851_v25, %v4745_v12  ;;  %v3776_v50 = vsel %vm2244_vm14, %v2852_v58, %v4746_v61 }
 0x9c3   : > { %v3791_v39 = vpack.c.bf16 %v3776_v50, %v3775_v53 }
 0x9c5   : > { %3804 = vmatpush.bf16.msra.mxu1 %v3793_v49  ;;  %v4363_v49 = vld [vmem:[%s7509_s7 + $0x38] sm:$0xff] }
 0x9c6   : > { %3915 = vmatpush.bf16.msra.mxu3 %v4363_v49 }
 0x9c9   : > { %3805 = vmatpush.bf16.msra.mxu1 %v3792_v38 }
 0x9ca   : > { %3916 = vmatpush.bf16.msra.mxu3 %v4362_v1 }
 0x9cd   : > { %3806 = vmatpush.bf16.msra.mxu1 %v3791_v39 }
 0x9ce   : > { %3917 = vmatpush.bf16.msra.mxu3 %v4361_v48 }
 0x9d0   : > { %3807 = vmatmul.bf16.vlgmr.msra.gmra.mxu1 %v741_v31 }
 0x9d1   : > { %3870 = vmatpush.bf16.msrb.mxu1 %v4359_v37 }
 0x9d2   : > { %3918 = vmatpush.bf16.msra.mxu3 %v4360_v24 }
 0x9d5   : > { %3871 = vmatpush.bf16.msrb.mxu1 %v4358_v6 }
 0x9d9   : > { %3872 = vmatpush.bf16.msrb.mxu1 %v4357_v30 }
 0x9dd   : > { %3873 = vmatpush.bf16.msrb.mxu1 %v4356_v34 }
 0x9e1   : > { %3960 = vmatpush.bf16.msra.mxu1 %v4367_v41 }
 0x9e5   : > { %3961 = vmatpush.bf16.msra.mxu1 %v4366_v26 }
 0x9e9   : > { %3962 = vmatpush.bf16.msra.mxu1 %v4365_v20 }
 0x9ed   : > { %3963 = vmatpush.bf16.msra.mxu1 %v4364_v56 }
 0xa4d   : > { %v3808_v16 = vpop.f32.mrf.mxu1 }
 0xa4e   : > { %v3837_v2 = vpack.c.bf16 %v3808_v16, %v3808_v16 }
 0xa50   : > { %4284 = vmatmul.msk.bf16.vlgmr.msrb.gmra.mxu1 %vm2261_vm1, %v3837_v2 }
 0xa55   : > { %v3810_v43 = vpop.f32.mrf.mxu1 }
 0xacd   : > { %v3875_v55 = vpop.f32.mrf.mxu1 }
 0xace   : > { %v3876_v4 = vadd.f32 %v3875_v55, %v3838_v54 }
 0xad0   : > { %vm3879_vm14 = vcmp.gt.f32.partialorder %v3876_v4, 0.0  ;;  %v3880_v36 = vmul.f32 0.2, %v3876_v4 }
 0xad2   : > { %v3881_v62 = vsel %vm3879_vm14, %v3876_v4, %v3880_v36 }
 0xad3   : > { %v3882_v10 = vpack.c.bf16 %v3881_v62, %v3881_v62 }
 0xad5   : > { %4301 = vmatmul.msk.bf16.vlgmr.msra.gmra.mxu3 %vm2261_vm1, %v3882_v10  ;;  %v3877_v7 = vpop.f32.mrf.mxu1 }
 0xb58   : > { %v3920_v42 = vpop.f32.mrf.mxu3 }
 0xb59   : > { %v3921_v51 = vadd.f32 %v3920_v42, %v3883_v9 }
 0xb5b   : > { %vm3924_vm10 = vcmp.gt.f32.partialorder %v3921_v51, 0.0  ;;  %v3925_v13 = vmul.f32 0.2, %v3921_v51 }
 0xb5d   : > { %v3926_v19 = vsel %vm3924_vm10, %v3921_v51, %v3925_v13 }
 0xb5e   : > { %v3927_v60 = vpack.c.bf16 %v3926_v19, %v3926_v19 }
 0xb60   : > { %4318 = vmatmul.msk.bf16.vlgmr.msra.gmra.mxu1 %vm2261_vm1, %v3927_v60  ;;  %v3922_v5 = vpop.f32.mrf.mxu3 }
 0xbdd   : > { %v3965_v15 = vpop.f32.mrf.mxu1 }
 0xbde   : > { %v3966_v46 = vadd.f32 %v3965_v15, %v3928_v47 }
 0xbe0   : > { %v3969_v44 = vsub.f32 0.0, %v3966_v46 }
 0xbe2   : > { %v3970_v40 = vmul.f32 1.442695, %v3969_v44 }
 0xbe4   : > { %4875 = vpow2.f32 %v3970_v40 }
 0xbe5   : > { %v3967_v28 = vpop.f32.mrf.mxu1 }
 0xbea   : > { %v4876_v0 = vpop.eup %4875 }
 0xbeb   : > { %v3972_v29 = vadd.f32 1.0, %v4876_v0 }
 0xbed   : > { %4877 = vrcp.f32 %v3972_v29  ;;  %v3984_v23 = vand.u32 2147483648, %v3972_v29  ;;  %v3982_v57 = vand.u32 2147483647, %v3972_v29  ;;  %vm3978_vm11 = vweird.f32 %v3972_v29 }
 0xbef   : > { %v3985_v27 = vor.u32 1.1754944e-38, %v3984_v23  ;;  %vm3983_vm2 = vcmp.eq.f32.partialorder %v3982_v57, 8.507059e+37 }
 0xbf3   : > { %v4878_v32 = vpop.eup %4877 }
 0xbf4   : > { %v3974_v35 = vmul.f32 %v4878_v32, %v3972_v29  ;;  %vm3979_vm1 = vweird.f32 %v4878_v32 }
 0xbf5   : > { %vm3980_vm3 = vmor %vm3978_vm11, %vm3979_vm1 }
 0xbf6   : > { %v3975_v52 = vsub.f32 1.0, %v3974_v35 }
 0xbf8   : > { %v3976_v21 = vmul.f32 %v4878_v32, %v3975_v52 }
 0xbfa   : > { %v3977_v63 = vadd.f32 %v4878_v32, %v3976_v21 }
 0xbfc   : > { %v3981_v33 = vsel %vm3980_vm3, %v4878_v32, %v3977_v63 }
 0xbfd   : > { %v3986_v22 = vsel %vm3983_vm2, %v3985_v27, %v3981_v33 }
 0xbfe   : > { %3989 = vst.msk [vmem:[%s335_s16] sm:$0xff] %vm3988_vm13, %v3986_v22 }
 0xbff PF: > { %s19_s30 = sadd.s32 1, %s4887_s30  }
 0xc00   : > { %p16_p5 = scmp.ge.s32.totalorder %s19_s30, 4  }
 0xc02   :  { %18 = sbr.rel (!%p16_p5) target bundleno = 1 (0x1), region = 86 }

</bundles_post_ra>
